<compile_context>
chip_gen: v7x
topology: tpu7x:2x2x1
jax: 0.10.0
libtpu: 0.0.40
codegen_flags: <defaults>
</compile_context>

<pallas_src>
import math

import jax
import jax.numpy as jnp
import numpy as np
from jax import lax
from jax.experimental import pallas as pl
from jax.experimental.pallas import tpu as pltpu

# ---- configuration (module defaults, embed_dim scaled 256 -> 128 for a small run) ----
INPUT_H = 20
INPUT_W = 12
IN_CHANS = 5
PATCH = 4
EMBED_DIM = 128
NUM_HEADS = 4
HEAD_DIM = EMBED_DIM // NUM_HEADS
MLP_HIDDEN = int(EMBED_DIM * 4.0)
NUM_CLASSES = 2
NUM_PATCHES = (INPUT_H // PATCH) * (INPUT_W // PATCH)   # 5 * 3 = 15
PATCH_FEATS = IN_CHANS * PATCH * PATCH                  # 80
N_PAD = 16            # tokens padded 15 -> 16 (sublane aligned; pad token masked)
PATCH_FEATS_PAD = 128 # patch features padded 80 -> 128 (lane aligned; zero weights)
LN_EPS = 1e-6
SCALE = HEAD_DIM ** (-0.5)


# ----------------------------- kernel helpers -----------------------------
def _layernorm(x, w, b):
    mu = jnp.mean(x, axis=-1, keepdims=True)
    xc = x - mu
    var = jnp.mean(xc * xc, axis=-1, keepdims=True)
    return xc * lax.rsqrt(var + LN_EPS) * w + b


def _gelu_exact(x):
    # PyTorch nn.GELU() default (erf-exact).
    # TODO(synk): on v6e/v7x this could run in bf16 on the EUP; kept f32 so the
    # erf lowering stays on the path already validated on-device (and v5e has no
    # bf16 VPU/EUP anyway).
    return 0.5 * x * (1.0 + lax.erf(x * 0.7071067811865476))


# ------------------------------- the kernel -------------------------------
def transformer_kernel(
    patches_ref,                     # (BT, N_PAD, PATCH_FEATS_PAD) bf16
    patch_w_ref,                     # (PATCH_FEATS_PAD, D) bf16
    pos_ref,                         # (N_PAD, D) f32  (conv bias folded in)
    attn_keep_ref,                   # (N_PAD, N_PAD) f32: 1 real key, 0 pad key
    pool_ref,                        # (N_PAD, D) f32: 1/num_patches real, 0 pad
    ln1_w_ref, ln1_b_ref,            # (1, D) f32
    qkv_w_ref, qkv_b_ref,            # (D, 3D) bf16 (Q cols pre-scaled), (1, 3D) f32
    proj_w_ref, proj_b_ref,          # (D, D) bf16, (1, D) f32
    ln2_w_ref, ln2_b_ref,            # (1, D) f32
    fc1_w_ref, fc1_b_ref,            # (D, 4D) bf16, (1, 4D) f32
    fc2_w_ref, fc2_b_ref,            # (4D, D) bf16, (1, D) f32
    lnf_w_ref, lnf_b_ref,            # (1, D) f32
    head_w_ref, head_b_ref,          # (D, C) bf16, (1, C) f32
    out_ref,                         # (1, BT, C) f32
):
    bt = patches_ref.shape[0]
    m = bt * N_PAD                                             # rows per tile

    # --- patch embedding (Conv2d k=s=patch == matmul over flattened patches) + pos ---
    p2 = patches_ref[...].reshape(m, PATCH_FEATS_PAD)
    x = jnp.dot(p2, patch_w_ref[...], preferred_element_type=jnp.float32)
    x = (x.reshape(bt, N_PAD, EMBED_DIM) + pos_ref[...]).reshape(m, EMBED_DIM)

    # --- Block: multi-head self attention --------------------------------
    h = _layernorm(x, ln1_w_ref[...], ln1_b_ref[...])
    qkv = jnp.dot(h.astype(jnp.bfloat16), qkv_w_ref[...],
                  preferred_element_type=jnp.float32) + qkv_b_ref[...]
    qkv = qkv.astype(jnp.bfloat16)                             # single (m, 3D) cast

    keep = attn_keep_ref[...]                                  # (N_PAD, N_PAD)
    heads = []
    for hh in range(NUM_HEADS):
        lo = hh * HEAD_DIM
        q_h = qkv[:, lo:lo + HEAD_DIM].reshape(bt, N_PAD, HEAD_DIM)
        k_h = qkv[:, EMBED_DIM + lo:EMBED_DIM + lo + HEAD_DIM].reshape(
            bt, N_PAD, HEAD_DIM)
        v_h = qkv[:, 2 * EMBED_DIM + lo:2 * EMBED_DIM + lo + HEAD_DIM].reshape(
            bt, N_PAD, HEAD_DIM)
        # softmax scale already folded into the Q columns of qkv_w (host side);
        # scores are small, so exp cannot overflow -> no max-subtraction needed.
        s = jnp.einsum('bqd,bkd->bqk', q_h, k_h,
                       preferred_element_type=jnp.float32)
        p = jnp.exp(s) * keep                                  # mask the pad key
        p = p * pl.reciprocal(jnp.sum(p, axis=-1, keepdims=True), approx=True)
        heads.append(jnp.einsum('bqk,bkd->bqd', p.astype(jnp.bfloat16), v_h,
                                preferred_element_type=jnp.float32))
    # lane-concat the 4 head outputs -> one full-K output projection matmul
    attn_out = jnp.concatenate(heads, axis=-1).reshape(m, EMBED_DIM)
    y = jnp.dot(attn_out.astype(jnp.bfloat16), proj_w_ref[...],
                preferred_element_type=jnp.float32)
    x = x + y + proj_b_ref[...]                                # residual

    # --- Block: MLP -------------------------------------------------------
    h = _layernorm(x, ln2_w_ref[...], ln2_b_ref[...])
    h = jnp.dot(h.astype(jnp.bfloat16), fc1_w_ref[...],
                preferred_element_type=jnp.float32) + fc1_b_ref[...]
    h = _gelu_exact(h)
    h = jnp.dot(h.astype(jnp.bfloat16), fc2_w_ref[...],
                preferred_element_type=jnp.float32) + fc2_b_ref[...]
    x = x + h                                                  # residual

    # --- final norm, masked mean pool over real tokens, classifier head ---
    x = _layernorm(x, lnf_w_ref[...], lnf_b_ref[...])
    pooled = jnp.sum(x.reshape(bt, N_PAD, EMBED_DIM) * pool_ref[...], axis=1)
    logits = jnp.dot(pooled.astype(jnp.bfloat16), head_w_ref[...],
                     preferred_element_type=jnp.float32) + head_b_ref[...]
    out_ref[0] = logits                                        # (bt, C)


# ------------------------------ JAX glue -----------------------------------
def extract_patches(x):
    """NCHW -> (B, num_patches, in_chans*patch*patch) matching Conv2d(k=s=patch)."""
    B, C, H, W = x.shape
    x = x.reshape(B, C, H // PATCH, PATCH, W // PATCH, PATCH)
    x = x.transpose(0, 2, 4, 1, 3, 5)            # (B, Hp, Wp, C, ph, pw)
    return x.reshape(B, NUM_PATCHES, PATCH_FEATS)


def _prep_kernel_params(params):
    """Pad / fold / cast module parameters into the kernel's layout."""
    bf16 = jnp.bfloat16
    patch_w = jnp.pad(params["patch_w"],
                      ((0, PATCH_FEATS_PAD - PATCH_FEATS), (0, 0))).astype(bf16)
    # fold the conv bias into the (token-padded) positional embedding
    pos = jnp.pad(params["pos"] + params["patch_b"],
                  ((0, N_PAD - NUM_PATCHES), (0, 0)))
    # fold the softmax scale into the Q columns of the QKV projection (free)
    qscale = jnp.concatenate([jnp.full((EMBED_DIM,), SCALE, jnp.float32),
                              jnp.ones((2 * EMBED_DIM,), jnp.float32)])
    qkv_w = (params["qkv_w"] * qscale[None, :]).astype(bf16)
    qkv_b = params["qkv_b"] * qscale[None, :]
    # tiny host constants: key-keep mask, and pool mask with 1/num_patches folded in
    keep_row = (np.arange(N_PAD) < NUM_PATCHES).astype(np.float32)
    attn_keep = jnp.asarray(np.ascontiguousarray(
        np.broadcast_to(keep_row[None, :], (N_PAD, N_PAD))))
    pool_col = keep_row / NUM_PATCHES
    pool_mask = jnp.asarray(np.ascontiguousarray(
        np.broadcast_to(pool_col[:, None], (N_PAD, EMBED_DIM))))
    return (patch_w, pos, attn_keep, pool_mask,
            params["ln1_w"], params["ln1_b"],
            qkv_w, qkv_b,
            params["proj_w"].astype(bf16), params["proj_b"],
            params["ln2_w"], params["ln2_b"],
            params["fc1_w"].astype(bf16), params["fc1_b"],
            params["fc2_w"].astype(bf16), params["fc2_b"],
            params["lnf_w"], params["lnf_b"],
            params["head_w"].astype(bf16), params["head_b"])


def tcr_pep_forward(x, params, block_batch=128, vmem_limit_bytes=64 << 20):
    """Forward pass.  Batch is tiled in groups of `bt` samples so every matmul has
    16*bt rows; one grid step per batch tile, weights pinned with constant maps."""
    B = x.shape[0]
    patches = extract_patches(x.astype(jnp.float32))
    patches = jnp.pad(patches, ((0, 0),
                                (0, N_PAD - NUM_PATCHES),
                                (0, PATCH_FEATS_PAD - PATCH_FEATS)))
    bt = min(block_batch, B)
    # v7x has two TensorCores: when a large batch would fit a single tile, split it
    # into two tiles so the "parallel" grid axis can feed both cores.
    if B > 32 and B <= block_batch:
        bt = -(-B // 2)
    nb = -(-B // bt)
    b_pad = nb * bt
    if b_pad != B:
        patches = jnp.pad(patches, ((0, b_pad - B), (0, 0), (0, 0)))
    patches = patches.astype(jnp.bfloat16)

    weights = _prep_kernel_params(params)

    in_specs = [pl.BlockSpec((bt, N_PAD, PATCH_FEATS_PAD), lambda b: (b, 0, 0))]
    for w in weights:                              # all weights are 2-D
        in_specs.append(pl.BlockSpec(w.shape, lambda b: (0, 0)))

    out = pl.pallas_call(
        transformer_kernel,
        out_shape=jax.ShapeDtypeStruct((nb, bt, NUM_CLASSES), jnp.float32),
        grid=(nb,),
        in_specs=in_specs,
        out_specs=pl.BlockSpec((1, bt, NUM_CLASSES), lambda b: (b, 0, 0)),
        compiler_params=pltpu.CompilerParams(
            dimension_semantics=("parallel",),
            vmem_limit_bytes=vmem_limit_bytes),
    )(patches, *weights)
    return out.reshape(b_pad, NUM_CLASSES)[:B]                 # (B, num_classes)


# -------------------------- deterministic params ---------------------------
def init_params(key):
    ks = jax.random.split(key, 8)
    p = {}
    # Conv2d: kaiming normal, mode='fan_out' -> std = sqrt(2 / (out*kh*kw))
    fan_out = EMBED_DIM * PATCH * PATCH
    conv_w = jax.random.normal(ks[0], (EMBED_DIM, IN_CHANS, PATCH, PATCH),
                               jnp.float32) * math.sqrt(2.0 / fan_out)
    conv_b = jax.random.normal(ks[1], (EMBED_DIM,), jnp.float32) * 0.01
    p["patch_w"] = conv_w.reshape(EMBED_DIM, PATCH_FEATS).T        # (P, D)
    p["patch_b"] = conv_b.reshape(1, EMBED_DIM)
    # pos_embed ~ N(0, sqrt(1/num_patches))
    p["pos"] = jax.random.normal(ks[2], (NUM_PATCHES, EMBED_DIM),
                                 jnp.float32) * math.sqrt(1.0 / NUM_PATCHES)

    def lin(k, din, dout):   # Linear weights: trunc_normal(std=0.02)-style
        return jax.random.normal(k, (din, dout), jnp.float32) * 0.02

    p["qkv_w"] = lin(ks[3], EMBED_DIM, 3 * EMBED_DIM)
    p["qkv_b"] = jnp.zeros((1, 3 * EMBED_DIM), jnp.float32)
    p["proj_w"] = lin(ks[4], EMBED_DIM, EMBED_DIM)
    p["proj_b"] = jnp.zeros((1, EMBED_DIM), jnp.float32)
    p["fc1_w"] = lin(ks[5], EMBED_DIM, MLP_HIDDEN)
    p["fc1_b"] = jnp.zeros((1, MLP_HIDDEN), jnp.float32)
    p["fc2_w"] = lin(ks[6], MLP_HIDDEN, EMBED_DIM)
    p["fc2_b"] = jnp.zeros((1, EMBED_DIM), jnp.float32)
    p["head_w"] = lin(ks[7], EMBED_DIM, NUM_CLASSES)
    p["head_b"] = jnp.zeros((1, NUM_CLASSES), jnp.float32)
    for name in ("ln1", "ln2", "lnf"):   # LayerNorm: weight=1, bias=0
        p[name + "_w"] = jnp.ones((1, EMBED_DIM), jnp.float32)
        p[name + "_b"] = jnp.zeros((1, EMBED_DIM), jnp.float32)
    return p


# ---------------------- pure-JAX f32 reference (for checking) --------------
def reference_forward(x, params):
    patches = extract_patches(x)
    x = patches @ params["patch_w"] + params["patch_b"] + params["pos"]

    def ln(t, w, b):
        mu = t.mean(-1, keepdims=True)
        var = ((t - mu) ** 2).mean(-1, keepdims=True)
        return (t - mu) / jnp.sqrt(var + LN_EPS) * w + b

    h = ln(x, params["ln1_w"], params["ln1_b"])
    qkv = h @ params["qkv_w"] + params["qkv_b"]
    B, N, _ = qkv.shape
    qkv = qkv.reshape(B, N, 3, NUM_HEADS, HEAD_DIM).transpose(2, 0, 3, 1, 4)
    q, k, v = qkv[0], qkv[1], qkv[2]
    attn = (q @ k.transpose(0, 1, 3, 2)) * SCALE
    attn = jax.nn.softmax(attn, axis=-1)
    a = (attn @ v).transpose(0, 2, 1, 3).reshape(B, N, EMBED_DIM)
    x = x + a @ params["proj_w"] + params["proj_b"]

    h = ln(x, params["ln2_w"], params["ln2_b"])
    h = h @ params["fc1_w"] + params["fc1_b"]
    h = 0.5 * h * (1.0 + lax.erf(h * 0.7071067811865476))
    h = h @ params["fc2_w"] + params["fc2_b"]
    x = x + h

    x = ln(x, params["lnf_w"], params["lnf_b"])
    pooled = x.mean(axis=1)
    return pooled @ params["head_w"] + params["head_b"]


if __name__ == "__main__":
    key = jax.random.PRNGKey(0)
    pkey, xkey, xkey2 = jax.random.split(key, 3)
    params = init_params(pkey)

    # Input matching the module's expected NCHW image: (B=2, C=5, H=20, W=12)
    x = jax.random.normal(xkey, (2, IN_CHANS, INPUT_H, INPUT_W), jnp.float32)
    out = tcr_pep_forward(x, params)
    jax.block_until_ready(out)
    ref = reference_forward(x, params)
    # bf16 MXU inputs (f32 accumulation) -> slightly looser tolerance than pure f32
    np.testing.assert_allclose(np.asarray(out), np.asarray(ref),
                               rtol=2e-2, atol=2e-2)

    # Exercise the multi-tile path (grid > 1, batch padding).
    x2 = jax.random.normal(xkey2, (18, IN_CHANS, INPUT_H, INPUT_W), jnp.float32)
    out2 = tcr_pep_forward(x2, params, block_batch=8)
    jax.block_until_ready(out2)
    ref2 = reference_forward(x2, params)
    np.testing.assert_allclose(np.asarray(out2), np.asarray(ref2),
                               rtol=2e-2, atol=2e-2)

    print("KERNEL_OK")
</pallas_src>

<mosaic_0001>
module attributes {stable_mosaic.version = 11 : i64} {
  func.func @transformer_kernel(%arg0: i32, %arg1: memref<2x16x128xbf16, #tpu.memory_space<vmem>>, %arg2: memref<128x128xbf16, #tpu.memory_space<vmem>>, %arg3: memref<16x128xf32, #tpu.memory_space<vmem>>, %arg4: memref<16x16xf32, #tpu.memory_space<vmem>>, %arg5: memref<16x128xf32, #tpu.memory_space<vmem>>, %arg6: memref<1x128xf32, #tpu.memory_space<vmem>>, %arg7: memref<1x128xf32, #tpu.memory_space<vmem>>, %arg8: memref<128x384xbf16, #tpu.memory_space<vmem>>, %arg9: memref<1x384xf32, #tpu.memory_space<vmem>>, %arg10: memref<128x128xbf16, #tpu.memory_space<vmem>>, %arg11: memref<1x128xf32, #tpu.memory_space<vmem>>, %arg12: memref<1x128xf32, #tpu.memory_space<vmem>>, %arg13: memref<1x128xf32, #tpu.memory_space<vmem>>, %arg14: memref<128x512xbf16, #tpu.memory_space<vmem>>, %arg15: memref<1x512xf32, #tpu.memory_space<vmem>>, %arg16: memref<512x128xbf16, #tpu.memory_space<vmem>>, %arg17: memref<1x128xf32, #tpu.memory_space<vmem>>, %arg18: memref<1x128xf32, #tpu.memory_space<vmem>>, %arg19: memref<1x128xf32, #tpu.memory_space<vmem>>, %arg20: memref<128x2xbf16, #tpu.memory_space<vmem>>, %arg21: memref<1x2xf32, #tpu.memory_space<vmem>>, %arg22: memref<1x2x2xf32, #tpu.memory_space<vmem>>) attributes {dimension_semantics = [#tpu.dimension_semantics<parallel>], iteration_bounds = array<i64: 1>, scalar_prefetch = 0 : i64, scratch_operands = 0 : i64, tpu.core_type = #tpu.core_type<tc>, window_params = [{transform_indices = @transform_0, window_bounds = array<i64: 2, 16, 128>}, {pipeline_mode = #tpu.pipeline_mode<synchronous>, transform_indices = @transform_1, window_bounds = array<i64: 128, 128>}, {pipeline_mode = #tpu.pipeline_mode<synchronous>, transform_indices = @transform_2, window_bounds = array<i64: 16, 128>}, {pipeline_mode = #tpu.pipeline_mode<synchronous>, transform_indices = @transform_3, window_bounds = array<i64: 16, 16>}, {pipeline_mode = #tpu.pipeline_mode<synchronous>, transform_indices = @transform_4, window_bounds = array<i64: 16, 128>}, {pipeline_mode = #tpu.pipeline_mode<synchronous>, transform_indices = @transform_5, window_bounds = array<i64: 1, 128>}, {pipeline_mode = #tpu.pipeline_mode<synchronous>, transform_indices = @transform_6, window_bounds = array<i64: 1, 128>}, {pipeline_mode = #tpu.pipeline_mode<synchronous>, transform_indices = @transform_7, window_bounds = array<i64: 128, 384>}, {pipeline_mode = #tpu.pipeline_mode<synchronous>, transform_indices = @transform_8, window_bounds = array<i64: 1, 384>}, {pipeline_mode = #tpu.pipeline_mode<synchronous>, transform_indices = @transform_9, window_bounds = array<i64: 128, 128>}, {pipeline_mode = #tpu.pipeline_mode<synchronous>, transform_indices = @transform_10, window_bounds = array<i64: 1, 128>}, {pipeline_mode = #tpu.pipeline_mode<synchronous>, transform_indices = @transform_11, window_bounds = array<i64: 1, 128>}, {pipeline_mode = #tpu.pipeline_mode<synchronous>, transform_indices = @transform_12, window_bounds = array<i64: 1, 128>}, {pipeline_mode = #tpu.pipeline_mode<synchronous>, transform_indices = @transform_13, window_bounds = array<i64: 128, 512>}, {pipeline_mode = #tpu.pipeline_mode<synchronous>, transform_indices = @transform_14, window_bounds = array<i64: 1, 512>}, {pipeline_mode = #tpu.pipeline_mode<synchronous>, transform_indices = @transform_15, window_bounds = array<i64: 512, 128>}, {pipeline_mode = #tpu.pipeline_mode<synchronous>, transform_indices = @transform_16, window_bounds = array<i64: 1, 128>}, {pipeline_mode = #tpu.pipeline_mode<synchronous>, transform_indices = @transform_17, window_bounds = array<i64: 1, 128>}, {pipeline_mode = #tpu.pipeline_mode<synchronous>, transform_indices = @transform_18, window_bounds = array<i64: 1, 128>}, {pipeline_mode = #tpu.pipeline_mode<synchronous>, transform_indices = @transform_19, window_bounds = array<i64: 128, 2>}, {pipeline_mode = #tpu.pipeline_mode<synchronous>, transform_indices = @transform_20, window_bounds = array<i64: 1, 2>}, {transform_indices = @transform_21, window_bounds = array<i64: 1, 2, 2>}]} {
    %c0 = arith.constant 0 : index
    %c0_0 = arith.constant 0 : index
    %c0_1 = arith.constant 0 : index
    %0 = vector.load %arg1[%c0, %c0_0, %c0_1] : memref<2x16x128xbf16, #tpu.memory_space<vmem>>, vector<2x16x128xbf16>
    %1 = vector.shape_cast %0 : vector<2x16x128xbf16> to vector<32x128xbf16>
    %c0_2 = arith.constant 0 : index
    %c0_3 = arith.constant 0 : index
    %2 = vector.load %arg2[%c0_2, %c0_3] : memref<128x128xbf16, #tpu.memory_space<vmem>>, vector<128x128xbf16>
    %cst = arith.constant dense<0.000000e+00> : vector<32x128xf32>
    %3 = tpu.matmul %1, %2, %cst {dimension_numbers = #tpu.dot_dimension_numbers<[1], [0], [0], [1], [0, 0, 1, 1], [], []>} : vector<32x128xbf16>, vector<128x128xbf16>, vector<32x128xf32> -> vector<32x128xf32>
    %4 = vector.shape_cast %3 : vector<32x128xf32> to vector<2x16x128xf32>
    %c0_4 = arith.constant 0 : index
    %c0_5 = arith.constant 0 : index
    %5 = vector.load %arg3[%c0_4, %c0_5] : memref<16x128xf32, #tpu.memory_space<vmem>>, vector<16x128xf32>
    %6 = vector.shape_cast %5 : vector<16x128xf32> to vector<1x16x128xf32>
    %7 = vector.broadcast %6 : vector<1x16x128xf32> to vector<2x16x128xf32>
    %8 = arith.addf %4, %7 : vector<2x16x128xf32>
    %9 = vector.shape_cast %8 : vector<2x16x128xf32> to vector<32x128xf32>
    %c0_6 = arith.constant 0 : index
    %c0_7 = arith.constant 0 : index
    %10 = vector.load %arg6[%c0_6, %c0_7] : memref<1x128xf32, #tpu.memory_space<vmem>>, vector<1x128xf32>
    %c0_8 = arith.constant 0 : index
    %c0_9 = arith.constant 0 : index
    %11 = vector.load %arg7[%c0_8, %c0_9] : memref<1x128xf32, #tpu.memory_space<vmem>>, vector<1x128xf32>
    %cst_10 = arith.constant dense<0.000000e+00> : vector<32xf32>
    %12 = vector.multi_reduction <add>, %9, %cst_10 [1] : vector<32x128xf32> to vector<32xf32>
    %13 = vector.shape_cast %12 : vector<32xf32> to vector<32x1xf32>
    %cst_11 = arith.constant 1.280000e+02 : f32
    %14 = vector.broadcast %cst_11 : f32 to vector<32x1xf32>
    %15 = arith.divf %13, %14 : vector<32x1xf32>
    %16 = vector.broadcast %15 : vector<32x1xf32> to vector<32x128xf32>
    %17 = arith.subf %9, %16 : vector<32x128xf32>
    %18 = arith.mulf %17, %17 : vector<32x128xf32>
    %cst_12 = arith.constant dense<0.000000e+00> : vector<32xf32>
    %19 = vector.multi_reduction <add>, %18, %cst_12 [1] : vector<32x128xf32> to vector<32xf32>
    %20 = vector.shape_cast %19 : vector<32xf32> to vector<32x1xf32>
    %cst_13 = arith.constant 1.280000e+02 : f32
    %21 = vector.broadcast %cst_13 : f32 to vector<32x1xf32>
    %22 = arith.divf %20, %21 : vector<32x1xf32>
    %cst_14 = arith.constant 9.99999997E-7 : f32
    %23 = vector.broadcast %cst_14 : f32 to vector<32x1xf32>
    %24 = arith.addf %22, %23 : vector<32x1xf32>
    %25 = math.rsqrt %24 : vector<32x1xf32>
    %26 = vector.broadcast %25 : vector<32x1xf32> to vector<32x128xf32>
    %27 = arith.mulf %17, %26 : vector<32x128xf32>
    %28 = vector.broadcast %10 : vector<1x128xf32> to vector<32x128xf32>
    %29 = arith.mulf %27, %28 : vector<32x128xf32>
    %30 = vector.broadcast %11 : vector<1x128xf32> to vector<32x128xf32>
    %31 = arith.addf %29, %30 : vector<32x128xf32>
    %32 = arith.truncf %31 : vector<32x128xf32> to vector<32x128xbf16>
    %c0_15 = arith.constant 0 : index
    %c0_16 = arith.constant 0 : index
    %33 = vector.load %arg8[%c0_15, %c0_16] : memref<128x384xbf16, #tpu.memory_space<vmem>>, vector<128x384xbf16>
    %cst_17 = arith.constant dense<0.000000e+00> : vector<32x384xf32>
    %34 = tpu.matmul %32, %33, %cst_17 {dimension_numbers = #tpu.dot_dimension_numbers<[1], [0], [0], [1], [0, 0, 1, 1], [], []>} : vector<32x128xbf16>, vector<128x384xbf16>, vector<32x384xf32> -> vector<32x384xf32>
    %c0_18 = arith.constant 0 : index
    %c0_19 = arith.constant 0 : index
    %35 = vector.load %arg9[%c0_18, %c0_19] : memref<1x384xf32, #tpu.memory_space<vmem>>, vector<1x384xf32>
    %36 = vector.broadcast %35 : vector<1x384xf32> to vector<32x384xf32>
    %37 = arith.addf %34, %36 : vector<32x384xf32>
    %38 = arith.truncf %37 : vector<32x384xf32> to vector<32x384xbf16>
    %c0_20 = arith.constant 0 : index
    %c0_21 = arith.constant 0 : index
    %39 = vector.load %arg4[%c0_20, %c0_21] : memref<16x16xf32, #tpu.memory_space<vmem>>, vector<16x16xf32>
    %40 = vector.extract_strided_slice %38 {offsets = [0, 0], sizes = [32, 32], strides = [1, 1]} : vector<32x384xbf16> to vector<32x32xbf16>
    %41 = vector.shape_cast %40 : vector<32x32xbf16> to vector<2x16x32xbf16>
    %42 = vector.extract_strided_slice %38 {offsets = [0, 128], sizes = [32, 32], strides = [1, 1]} : vector<32x384xbf16> to vector<32x32xbf16>
    %43 = vector.shape_cast %42 : vector<32x32xbf16> to vector<2x16x32xbf16>
    %44 = vector.extract_strided_slice %38 {offsets = [0, 256], sizes = [32, 32], strides = [1, 1]} : vector<32x384xbf16> to vector<32x32xbf16>
    %45 = vector.shape_cast %44 : vector<32x32xbf16> to vector<2x16x32xbf16>
    "tpu.trace_start"() <{level = 10 : i32, message = "bqd,bkd->bqk"}> : () -> ()
    %cst_22 = arith.constant dense<0.000000e+00> : vector<2x16x16xf32>
    %46 = tpu.matmul %41, %43, %cst_22 {dimension_numbers = #tpu.dot_dimension_numbers<[2], [2], [1], [1], [0, 0, 0, 1, 1, 1], [0], [0]>} : vector<2x16x32xbf16>, vector<2x16x32xbf16>, vector<2x16x16xf32> -> vector<2x16x16xf32>
    "tpu.trace_stop"() : () -> ()
    %47 = math.exp %46 : vector<2x16x16xf32>
    %48 = vector.shape_cast %39 : vector<16x16xf32> to vector<1x16x16xf32>
    %49 = vector.broadcast %48 : vector<1x16x16xf32> to vector<2x16x16xf32>
    %50 = arith.mulf %47, %49 : vector<2x16x16xf32>
    %cst_23 = arith.constant dense<0.000000e+00> : vector<2x16xf32>
    %51 = vector.multi_reduction <add>, %50, %cst_23 [2] : vector<2x16x16xf32> to vector<2x16xf32>
    %52 = vector.shape_cast %51 : vector<2x16xf32> to vector<2x16x1xf32>
    %53 = tpu.reciprocal %52 {approx = true} : vector<2x16x1xf32> -> vector<2x16x1xf32>
    %54 = vector.broadcast %53 : vector<2x16x1xf32> to vector<2x16x16xf32>
    %55 = arith.mulf %50, %54 : vector<2x16x16xf32>
    %56 = arith.truncf %55 : vector<2x16x16xf32> to vector<2x16x16xbf16>
    "tpu.trace_start"() <{level = 10 : i32, message = "bqk,bkd->bqd"}> : () -> ()
    %cst_24 = arith.constant dense<0.000000e+00> : vector<2x16x32xf32>
    %57 = tpu.matmul %56, %45, %cst_24 {dimension_numbers = #tpu.dot_dimension_numbers<[2], [1], [1], [2], [0, 0, 0, 1, 1, 2], [0], [0]>} : vector<2x16x16xbf16>, vector<2x16x32xbf16>, vector<2x16x32xf32> -> vector<2x16x32xf32>
    "tpu.trace_stop"() : () -> ()
    %58 = vector.extract_strided_slice %38 {offsets = [0, 32], sizes = [32, 32], strides = [1, 1]} : vector<32x384xbf16> to vector<32x32xbf16>
    %59 = vector.shape_cast %58 : vector<32x32xbf16> to vector<2x16x32xbf16>
    %60 = vector.extract_strided_slice %38 {offsets = [0, 160], sizes = [32, 32], strides = [1, 1]} : vector<32x384xbf16> to vector<32x32xbf16>
    %61 = vector.shape_cast %60 : vector<32x32xbf16> to vector<2x16x32xbf16>
    %62 = vector.extract_strided_slice %38 {offsets = [0, 288], sizes = [32, 32], strides = [1, 1]} : vector<32x384xbf16> to vector<32x32xbf16>
    %63 = vector.shape_cast %62 : vector<32x32xbf16> to vector<2x16x32xbf16>
    "tpu.trace_start"() <{level = 10 : i32, message = "bqd,bkd->bqk"}> : () -> ()
    %cst_25 = arith.constant dense<0.000000e+00> : vector<2x16x16xf32>
    %64 = tpu.matmul %59, %61, %cst_25 {dimension_numbers = #tpu.dot_dimension_numbers<[2], [2], [1], [1], [0, 0, 0, 1, 1, 1], [0], [0]>} : vector<2x16x32xbf16>, vector<2x16x32xbf16>, vector<2x16x16xf32> -> vector<2x16x16xf32>
    "tpu.trace_stop"() : () -> ()
    %65 = math.exp %64 : vector<2x16x16xf32>
    %66 = vector.shape_cast %39 : vector<16x16xf32> to vector<1x16x16xf32>
    %67 = vector.broadcast %66 : vector<1x16x16xf32> to vector<2x16x16xf32>
    %68 = arith.mulf %65, %67 : vector<2x16x16xf32>
    %cst_26 = arith.constant dense<0.000000e+00> : vector<2x16xf32>
    %69 = vector.multi_reduction <add>, %68, %cst_26 [2] : vector<2x16x16xf32> to vector<2x16xf32>
    %70 = vector.shape_cast %69 : vector<2x16xf32> to vector<2x16x1xf32>
    %71 = tpu.reciprocal %70 {approx = true} : vector<2x16x1xf32> -> vector<2x16x1xf32>
    %72 = vector.broadcast %71 : vector<2x16x1xf32> to vector<2x16x16xf32>
    %73 = arith.mulf %68, %72 : vector<2x16x16xf32>
    %74 = arith.truncf %73 : vector<2x16x16xf32> to vector<2x16x16xbf16>
    "tpu.trace_start"() <{level = 10 : i32, message = "bqk,bkd->bqd"}> : () -> ()
    %cst_27 = arith.constant dense<0.000000e+00> : vector<2x16x32xf32>
    %75 = tpu.matmul %74, %63, %cst_27 {dimension_numbers = #tpu.dot_dimension_numbers<[2], [1], [1], [2], [0, 0, 0, 1, 1, 2], [0], [0]>} : vector<2x16x16xbf16>, vector<2x16x32xbf16>, vector<2x16x32xf32> -> vector<2x16x32xf32>
    "tpu.trace_stop"() : () -> ()
    %76 = vector.extract_strided_slice %38 {offsets = [0, 64], sizes = [32, 32], strides = [1, 1]} : vector<32x384xbf16> to vector<32x32xbf16>
    %77 = vector.shape_cast %76 : vector<32x32xbf16> to vector<2x16x32xbf16>
    %78 = vector.extract_strided_slice %38 {offsets = [0, 192], sizes = [32, 32], strides = [1, 1]} : vector<32x384xbf16> to vector<32x32xbf16>
    %79 = vector.shape_cast %78 : vector<32x32xbf16> to vector<2x16x32xbf16>
    %80 = vector.extract_strided_slice %38 {offsets = [0, 320], sizes = [32, 32], strides = [1, 1]} : vector<32x384xbf16> to vector<32x32xbf16>
    %81 = vector.shape_cast %80 : vector<32x32xbf16> to vector<2x16x32xbf16>
    "tpu.trace_start"() <{level = 10 : i32, message = "bqd,bkd->bqk"}> : () -> ()
    %cst_28 = arith.constant dense<0.000000e+00> : vector<2x16x16xf32>
    %82 = tpu.matmul %77, %79, %cst_28 {dimension_numbers = #tpu.dot_dimension_numbers<[2], [2], [1], [1], [0, 0, 0, 1, 1, 1], [0], [0]>} : vector<2x16x32xbf16>, vector<2x16x32xbf16>, vector<2x16x16xf32> -> vector<2x16x16xf32>
    "tpu.trace_stop"() : () -> ()
    %83 = math.exp %82 : vector<2x16x16xf32>
    %84 = vector.shape_cast %39 : vector<16x16xf32> to vector<1x16x16xf32>
    %85 = vector.broadcast %84 : vector<1x16x16xf32> to vector<2x16x16xf32>
    %86 = arith.mulf %83, %85 : vector<2x16x16xf32>
    %cst_29 = arith.constant dense<0.000000e+00> : vector<2x16xf32>
    %87 = vector.multi_reduction <add>, %86, %cst_29 [2] : vector<2x16x16xf32> to vector<2x16xf32>
    %88 = vector.shape_cast %87 : vector<2x16xf32> to vector<2x16x1xf32>
    %89 = tpu.reciprocal %88 {approx = true} : vector<2x16x1xf32> -> vector<2x16x1xf32>
    %90 = vector.broadcast %89 : vector<2x16x1xf32> to vector<2x16x16xf32>
    %91 = arith.mulf %86, %90 : vector<2x16x16xf32>
    %92 = arith.truncf %91 : vector<2x16x16xf32> to vector<2x16x16xbf16>
    "tpu.trace_start"() <{level = 10 : i32, message = "bqk,bkd->bqd"}> : () -> ()
    %cst_30 = arith.constant dense<0.000000e+00> : vector<2x16x32xf32>
    %93 = tpu.matmul %92, %81, %cst_30 {dimension_numbers = #tpu.dot_dimension_numbers<[2], [1], [1], [2], [0, 0, 0, 1, 1, 2], [0], [0]>} : vector<2x16x16xbf16>, vector<2x16x32xbf16>, vector<2x16x32xf32> -> vector<2x16x32xf32>
    "tpu.trace_stop"() : () -> ()
    %94 = vector.extract_strided_slice %38 {offsets = [0, 96], sizes = [32, 32], strides = [1, 1]} : vector<32x384xbf16> to vector<32x32xbf16>
    %95 = vector.shape_cast %94 : vector<32x32xbf16> to vector<2x16x32xbf16>
    %96 = vector.extract_strided_slice %38 {offsets = [0, 224], sizes = [32, 32], strides = [1, 1]} : vector<32x384xbf16> to vector<32x32xbf16>
    %97 = vector.shape_cast %96 : vector<32x32xbf16> to vector<2x16x32xbf16>
    %98 = vector.extract_strided_slice %38 {offsets = [0, 352], sizes = [32, 32], strides = [1, 1]} : vector<32x384xbf16> to vector<32x32xbf16>
    %99 = vector.shape_cast %98 : vector<32x32xbf16> to vector<2x16x32xbf16>
    "tpu.trace_start"() <{level = 10 : i32, message = "bqd,bkd->bqk"}> : () -> ()
    %cst_31 = arith.constant dense<0.000000e+00> : vector<2x16x16xf32>
    %100 = tpu.matmul %95, %97, %cst_31 {dimension_numbers = #tpu.dot_dimension_numbers<[2], [2], [1], [1], [0, 0, 0, 1, 1, 1], [0], [0]>} : vector<2x16x32xbf16>, vector<2x16x32xbf16>, vector<2x16x16xf32> -> vector<2x16x16xf32>
    "tpu.trace_stop"() : () -> ()
    %101 = math.exp %100 : vector<2x16x16xf32>
    %102 = vector.shape_cast %39 : vector<16x16xf32> to vector<1x16x16xf32>
    %103 = vector.broadcast %102 : vector<1x16x16xf32> to vector<2x16x16xf32>
    %104 = arith.mulf %101, %103 : vector<2x16x16xf32>
    %cst_32 = arith.constant dense<0.000000e+00> : vector<2x16xf32>
    %105 = vector.multi_reduction <add>, %104, %cst_32 [2] : vector<2x16x16xf32> to vector<2x16xf32>
    %106 = vector.shape_cast %105 : vector<2x16xf32> to vector<2x16x1xf32>
    %107 = tpu.reciprocal %106 {approx = true} : vector<2x16x1xf32> -> vector<2x16x1xf32>
    %108 = vector.broadcast %107 : vector<2x16x1xf32> to vector<2x16x16xf32>
    %109 = arith.mulf %104, %108 : vector<2x16x16xf32>
    %110 = arith.truncf %109 : vector<2x16x16xf32> to vector<2x16x16xbf16>
    "tpu.trace_start"() <{level = 10 : i32, message = "bqk,bkd->bqd"}> : () -> ()
    %cst_33 = arith.constant dense<0.000000e+00> : vector<2x16x32xf32>
    %111 = tpu.matmul %110, %99, %cst_33 {dimension_numbers = #tpu.dot_dimension_numbers<[2], [1], [1], [2], [0, 0, 0, 1, 1, 2], [0], [0]>} : vector<2x16x16xbf16>, vector<2x16x32xbf16>, vector<2x16x32xf32> -> vector<2x16x32xf32>
    "tpu.trace_stop"() : () -> ()
    %112 = tpu.concatenate %57, %75, %93, %111 in 2 : vector<2x16x32xf32>, vector<2x16x32xf32>, vector<2x16x32xf32>, vector<2x16x32xf32> -> vector<2x16x128xf32>
    %113 = vector.shape_cast %112 : vector<2x16x128xf32> to vector<32x128xf32>
    %114 = arith.truncf %113 : vector<32x128xf32> to vector<32x128xbf16>
    %c0_34 = arith.constant 0 : index
    %c0_35 = arith.constant 0 : index
    %115 = vector.load %arg10[%c0_34, %c0_35] : memref<128x128xbf16, #tpu.memory_space<vmem>>, vector<128x128xbf16>
    %cst_36 = arith.constant dense<0.000000e+00> : vector<32x128xf32>
    %116 = tpu.matmul %114, %115, %cst_36 {dimension_numbers = #tpu.dot_dimension_numbers<[1], [0], [0], [1], [0, 0, 1, 1], [], []>} : vector<32x128xbf16>, vector<128x128xbf16>, vector<32x128xf32> -> vector<32x128xf32>
    %117 = arith.addf %9, %116 : vector<32x128xf32>
    %c0_37 = arith.constant 0 : index
    %c0_38 = arith.constant 0 : index
    %118 = vector.load %arg11[%c0_37, %c0_38] : memref<1x128xf32, #tpu.memory_space<vmem>>, vector<1x128xf32>
    %119 = vector.broadcast %118 : vector<1x128xf32> to vector<32x128xf32>
    %120 = arith.addf %117, %119 : vector<32x128xf32>
    %c0_39 = arith.constant 0 : index
    %c0_40 = arith.constant 0 : index
    %121 = vector.load %arg12[%c0_39, %c0_40] : memref<1x128xf32, #tpu.memory_space<vmem>>, vector<1x128xf32>
    %c0_41 = arith.constant 0 : index
    %c0_42 = arith.constant 0 : index
    %122 = vector.load %arg13[%c0_41, %c0_42] : memref<1x128xf32, #tpu.memory_space<vmem>>, vector<1x128xf32>
    %cst_43 = arith.constant dense<0.000000e+00> : vector<32xf32>
    %123 = vector.multi_reduction <add>, %120, %cst_43 [1] : vector<32x128xf32> to vector<32xf32>
    %124 = vector.shape_cast %123 : vector<32xf32> to vector<32x1xf32>
    %cst_44 = arith.constant 1.280000e+02 : f32
    %125 = vector.broadcast %cst_44 : f32 to vector<32x1xf32>
    %126 = arith.divf %124, %125 : vector<32x1xf32>
    %127 = vector.broadcast %126 : vector<32x1xf32> to vector<32x128xf32>
    %128 = arith.subf %120, %127 : vector<32x128xf32>
    %129 = arith.mulf %128, %128 : vector<32x128xf32>
    %cst_45 = arith.constant dense<0.000000e+00> : vector<32xf32>
    %130 = vector.multi_reduction <add>, %129, %cst_45 [1] : vector<32x128xf32> to vector<32xf32>
    %131 = vector.shape_cast %130 : vector<32xf32> to vector<32x1xf32>
    %cst_46 = arith.constant 1.280000e+02 : f32
    %132 = vector.broadcast %cst_46 : f32 to vector<32x1xf32>
    %133 = arith.divf %131, %132 : vector<32x1xf32>
    %cst_47 = arith.constant 9.99999997E-7 : f32
    %134 = vector.broadcast %cst_47 : f32 to vector<32x1xf32>
    %135 = arith.addf %133, %134 : vector<32x1xf32>
    %136 = math.rsqrt %135 : vector<32x1xf32>
    %137 = vector.broadcast %136 : vector<32x1xf32> to vector<32x128xf32>
    %138 = arith.mulf %128, %137 : vector<32x128xf32>
    %139 = vector.broadcast %121 : vector<1x128xf32> to vector<32x128xf32>
    %140 = arith.mulf %138, %139 : vector<32x128xf32>
    %141 = vector.broadcast %122 : vector<1x128xf32> to vector<32x128xf32>
    %142 = arith.addf %140, %141 : vector<32x128xf32>
    %143 = arith.truncf %142 : vector<32x128xf32> to vector<32x128xbf16>
    %c0_48 = arith.constant 0 : index
    %c0_49 = arith.constant 0 : index
    %144 = vector.load %arg14[%c0_48, %c0_49] : memref<128x512xbf16, #tpu.memory_space<vmem>>, vector<128x512xbf16>
    %cst_50 = arith.constant dense<0.000000e+00> : vector<32x512xf32>
    %145 = tpu.matmul %143, %144, %cst_50 {dimension_numbers = #tpu.dot_dimension_numbers<[1], [0], [0], [1], [0, 0, 1, 1], [], []>} : vector<32x128xbf16>, vector<128x512xbf16>, vector<32x512xf32> -> vector<32x512xf32>
    %c0_51 = arith.constant 0 : index
    %c0_52 = arith.constant 0 : index
    %146 = vector.load %arg15[%c0_51, %c0_52] : memref<1x512xf32, #tpu.memory_space<vmem>>, vector<1x512xf32>
    %147 = vector.broadcast %146 : vector<1x512xf32> to vector<32x512xf32>
    %148 = arith.addf %145, %147 : vector<32x512xf32>
    %cst_53 = arith.constant 5.000000e-01 : f32
    %149 = vector.broadcast %cst_53 : f32 to vector<32x512xf32>
    %150 = arith.mulf %149, %148 : vector<32x512xf32>
    %cst_54 = arith.constant 0.707106769 : f32
    %151 = vector.broadcast %cst_54 : f32 to vector<32x512xf32>
    %152 = arith.mulf %148, %151 : vector<32x512xf32>
    %153 = math.erf %152 : vector<32x512xf32>
    %cst_55 = arith.constant 1.000000e+00 : f32
    %154 = vector.broadcast %cst_55 : f32 to vector<32x512xf32>
    %155 = arith.addf %154, %153 : vector<32x512xf32>
    %156 = arith.mulf %150, %155 : vector<32x512xf32>
    %157 = arith.truncf %156 : vector<32x512xf32> to vector<32x512xbf16>
    %c0_56 = arith.constant 0 : index
    %c0_57 = arith.constant 0 : index
    %158 = vector.load %arg16[%c0_56, %c0_57] : memref<512x128xbf16, #tpu.memory_space<vmem>>, vector<512x128xbf16>
    %cst_58 = arith.constant dense<0.000000e+00> : vector<32x128xf32>
    %159 = tpu.matmul %157, %158, %cst_58 {dimension_numbers = #tpu.dot_dimension_numbers<[1], [0], [0], [1], [0, 0, 1, 1], [], []>} : vector<32x512xbf16>, vector<512x128xbf16>, vector<32x128xf32> -> vector<32x128xf32>
    %c0_59 = arith.constant 0 : index
    %c0_60 = arith.constant 0 : index
    %160 = vector.load %arg17[%c0_59, %c0_60] : memref<1x128xf32, #tpu.memory_space<vmem>>, vector<1x128xf32>
    %161 = vector.broadcast %160 : vector<1x128xf32> to vector<32x128xf32>
    %162 = arith.addf %159, %161 : vector<32x128xf32>
    %163 = arith.addf %120, %162 : vector<32x128xf32>
    %c0_61 = arith.constant 0 : index
    %c0_62 = arith.constant 0 : index
    %164 = vector.load %arg18[%c0_61, %c0_62] : memref<1x128xf32, #tpu.memory_space<vmem>>, vector<1x128xf32>
    %c0_63 = arith.constant 0 : index
    %c0_64 = arith.constant 0 : index
    %165 = vector.load %arg19[%c0_63, %c0_64] : memref<1x128xf32, #tpu.memory_space<vmem>>, vector<1x128xf32>
    %cst_65 = arith.constant dense<0.000000e+00> : vector<32xf32>
    %166 = vector.multi_reduction <add>, %163, %cst_65 [1] : vector<32x128xf32> to vector<32xf32>
    %167 = vector.shape_cast %166 : vector<32xf32> to vector<32x1xf32>
    %cst_66 = arith.constant 1.280000e+02 : f32
    %168 = vector.broadcast %cst_66 : f32 to vector<32x1xf32>
    %169 = arith.divf %167, %168 : vector<32x1xf32>
    %170 = vector.broadcast %169 : vector<32x1xf32> to vector<32x128xf32>
    %171 = arith.subf %163, %170 : vector<32x128xf32>
    %172 = arith.mulf %171, %171 : vector<32x128xf32>
    %cst_67 = arith.constant dense<0.000000e+00> : vector<32xf32>
    %173 = vector.multi_reduction <add>, %172, %cst_67 [1] : vector<32x128xf32> to vector<32xf32>
    %174 = vector.shape_cast %173 : vector<32xf32> to vector<32x1xf32>
    %cst_68 = arith.constant 1.280000e+02 : f32
    %175 = vector.broadcast %cst_68 : f32 to vector<32x1xf32>
    %176 = arith.divf %174, %175 : vector<32x1xf32>
    %cst_69 = arith.constant 9.99999997E-7 : f32
    %177 = vector.broadcast %cst_69 : f32 to vector<32x1xf32>
    %178 = arith.addf %176, %177 : vector<32x1xf32>
    %179 = math.rsqrt %178 : vector<32x1xf32>
    %180 = vector.broadcast %179 : vector<32x1xf32> to vector<32x128xf32>
    %181 = arith.mulf %171, %180 : vector<32x128xf32>
    %182 = vector.broadcast %164 : vector<1x128xf32> to vector<32x128xf32>
    %183 = arith.mulf %181, %182 : vector<32x128xf32>
    %184 = vector.broadcast %165 : vector<1x128xf32> to vector<32x128xf32>
    %185 = arith.addf %183, %184 : vector<32x128xf32>
    %186 = vector.shape_cast %185 : vector<32x128xf32> to vector<2x16x128xf32>
    %c0_70 = arith.constant 0 : index
    %c0_71 = arith.constant 0 : index
    %187 = vector.load %arg5[%c0_70, %c0_71] : memref<16x128xf32, #tpu.memory_space<vmem>>, vector<16x128xf32>
    %188 = vector.shape_cast %187 : vector<16x128xf32> to vector<1x16x128xf32>
    %189 = vector.broadcast %188 : vector<1x16x128xf32> to vector<2x16x128xf32>
    %190 = arith.mulf %186, %189 : vector<2x16x128xf32>
    %cst_72 = arith.constant dense<0.000000e+00> : vector<2x128xf32>
    %191 = vector.multi_reduction <add>, %190, %cst_72 [1] : vector<2x16x128xf32> to vector<2x128xf32>
    %192 = arith.truncf %191 : vector<2x128xf32> to vector<2x128xbf16>
    %c0_73 = arith.constant 0 : index
    %c0_74 = arith.constant 0 : index
    %193 = vector.load %arg20[%c0_73, %c0_74] : memref<128x2xbf16, #tpu.memory_space<vmem>>, vector<128x2xbf16>
    %cst_75 = arith.constant dense<0.000000e+00> : vector<2x2xf32>
    %194 = tpu.matmul %192, %193, %cst_75 {dimension_numbers = #tpu.dot_dimension_numbers<[1], [0], [0], [1], [0, 0, 1, 1], [], []>} : vector<2x128xbf16>, vector<128x2xbf16>, vector<2x2xf32> -> vector<2x2xf32>
    %c0_76 = arith.constant 0 : index
    %c0_77 = arith.constant 0 : index
    %195 = vector.load %arg21[%c0_76, %c0_77] : memref<1x2xf32, #tpu.memory_space<vmem>>, vector<1x2xf32>
    %196 = vector.broadcast %195 : vector<1x2xf32> to vector<2x2xf32>
    %197 = arith.addf %194, %196 : vector<2x2xf32>
    %c0_78 = arith.constant 0 : index
    %c0_79 = arith.constant 0 : index
    %c0_80 = arith.constant 0 : index
    %198 = vector.load %arg22[%c0_78, %c0_79, %c0_80] : memref<1x2x2xf32, #tpu.memory_space<vmem>>, vector<1x2x2xf32>
    %199 = vector.shape_cast %198 : vector<1x2x2xf32> to vector<2x2xf32>
    %200 = vector.shape_cast %197 : vector<2x2xf32> to vector<1x2x2xf32>
    tpu.vector_store %arg22[%c0_78, %c0_79, %c0_80], %200 {strides = array<i32>} : memref<1x2x2xf32, #tpu.memory_space<vmem>>, vector<1x2x2xf32>,
    return
  }
  func.func @transform_0(%arg0: i32) -> (i32, i32, i32) {
    %c0_i32 = arith.constant 0 : i32
    %c0_i32_0 = arith.constant 0 : i32
    %c0_i32_1 = arith.constant 0 : i32
    return %arg0, %c0_i32, %c0_i32_0 : i32, i32, i32
  }
  func.func @transform_1(%arg0: i32) -> (i32, i32) {
    %c0_i32 = arith.constant 0 : i32
    %c0_i32_0 = arith.constant 0 : i32
    %c0_i32_1 = arith.constant 0 : i32
    return %c0_i32, %c0_i32_0 : i32, i32
  }
  func.func @transform_2(%arg0: i32) -> (i32, i32) {
    %c0_i32 = arith.constant 0 : i32
    %c0_i32_0 = arith.constant 0 : i32
    %c0_i32_1 = arith.constant 0 : i32
    return %c0_i32, %c0_i32_0 : i32, i32
  }
  func.func @transform_3(%arg0: i32) -> (i32, i32) {
    %c0_i32 = arith.constant 0 : i32
    %c0_i32_0 = arith.constant 0 : i32
    %c0_i32_1 = arith.constant 0 : i32
    return %c0_i32, %c0_i32_0 : i32, i32
  }
  func.func @transform_4(%arg0: i32) -> (i32, i32) {
    %c0_i32 = arith.constant 0 : i32
    %c0_i32_0 = arith.constant 0 : i32
    %c0_i32_1 = arith.constant 0 : i32
    return %c0_i32, %c0_i32_0 : i32, i32
  }
  func.func @transform_5(%arg0: i32) -> (i32, i32) {
    %c0_i32 = arith.constant 0 : i32
    %c0_i32_0 = arith.constant 0 : i32
    %c0_i32_1 = arith.constant 0 : i32
    return %c0_i32, %c0_i32_0 : i32, i32
  }
  func.func @transform_6(%arg0: i32) -> (i32, i32) {
    %c0_i32 = arith.constant 0 : i32
    %c0_i32_0 = arith.constant 0 : i32
    %c0_i32_1 = arith.constant 0 : i32
    return %c0_i32, %c0_i32_0 : i32, i32
  }
  func.func @transform_7(%arg0: i32) -> (i32, i32) {
    %c0_i32 = arith.constant 0 : i32
    %c0_i32_0 = arith.constant 0 : i32
    %c0_i32_1 = arith.constant 0 : i32
    return %c0_i32, %c0_i32_0 : i32, i32
  }
  func.func @transform_8(%arg0: i32) -> (i32, i32) {
    %c0_i32 = arith.constant 0 : i32
    %c0_i32_0 = arith.constant 0 : i32
    %c0_i32_1 = arith.constant 0 : i32
    return %c0_i32, %c0_i32_0 : i32, i32
  }
  func.func @transform_9(%arg0: i32) -> (i32, i32) {
    %c0_i32 = arith.constant 0 : i32
    %c0_i32_0 = arith.constant 0 : i32
    %c0_i32_1 = arith.constant 0 : i32
    return %c0_i32, %c0_i32_0 : i32, i32
  }
  func.func @transform_10(%arg0: i32) -> (i32, i32) {
    %c0_i32 = arith.constant 0 : i32
    %c0_i32_0 = arith.constant 0 : i32
    %c0_i32_1 = arith.constant 0 : i32
    return %c0_i32, %c0_i32_0 : i32, i32
  }
  func.func @transform_11(%arg0: i32) -> (i32, i32) {
    %c0_i32 = arith.constant 0 : i32
    %c0_i32_0 = arith.constant 0 : i32
    %c0_i32_1 = arith.constant 0 : i32
    return %c0_i32, %c0_i32_0 : i32, i32
  }
  func.func @transform_12(%arg0: i32) -> (i32, i32) {
    %c0_i32 = arith.constant 0 : i32
    %c0_i32_0 = arith.constant 0 : i32
    %c0_i32_1 = arith.constant 0 : i32
    return %c0_i32, %c0_i32_0 : i32, i32
  }
  func.func @transform_13(%arg0: i32) -> (i32, i32) {
    %c0_i32 = arith.constant 0 : i32
    %c0_i32_0 = arith.constant 0 : i32
    %c0_i32_1 = arith.constant 0 : i32
    return %c0_i32, %c0_i32_0 : i32, i32
  }
  func.func @transform_14(%arg0: i32) -> (i32, i32) {
    %c0_i32 = arith.constant 0 : i32
    %c0_i32_0 = arith.constant 0 : i32
    %c0_i32_1 = arith.constant 0 : i32
    return %c0_i32, %c0_i32_0 : i32, i32
  }
  func.func @transform_15(%arg0: i32) -> (i32, i32) {
    %c0_i32 = arith.constant 0 : i32
    %c0_i32_0 = arith.constant 0 : i32
    %c0_i32_1 = arith.constant 0 : i32
    return %c0_i32, %c0_i32_0 : i32, i32
  }
  func.func @transform_16(%arg0: i32) -> (i32, i32) {
    %c0_i32 = arith.constant 0 : i32
    %c0_i32_0 = arith.constant 0 : i32
    %c0_i32_1 = arith.constant 0 : i32
    return %c0_i32, %c0_i32_0 : i32, i32
  }
  func.func @transform_17(%arg0: i32) -> (i32, i32) {
    %c0_i32 = arith.constant 0 : i32
    %c0_i32_0 = arith.constant 0 : i32
    %c0_i32_1 = arith.constant 0 : i32
    return %c0_i32, %c0_i32_0 : i32, i32
  }
  func.func @transform_18(%arg0: i32) -> (i32, i32) {
    %c0_i32 = arith.constant 0 : i32
    %c0_i32_0 = arith.constant 0 : i32
    %c0_i32_1 = arith.constant 0 : i32
    return %c0_i32, %c0_i32_0 : i32, i32
  }
  func.func @transform_19(%arg0: i32) -> (i32, i32) {
    %c0_i32 = arith.constant 0 : i32
    %c0_i32_0 = arith.constant 0 : i32
    %c0_i32_1 = arith.constant 0 : i32
    return %c0_i32, %c0_i32_0 : i32, i32
  }
  func.func @transform_20(%arg0: i32) -> (i32, i32) {
    %c0_i32 = arith.constant 0 : i32
    %c0_i32_0 = arith.constant 0 : i32
    %c0_i32_1 = arith.constant 0 : i32
    return %c0_i32, %c0_i32_0 : i32, i32
  }
  func.func @transform_21(%arg0: i32) -> (i32, i32, i32) {
    %c0_i32 = arith.constant 0 : i32
    %c0_i32_0 = arith.constant 0 : i32
    %c0_i32_1 = arith.constant 0 : i32
    return %arg0, %c0_i32, %c0_i32_0 : i32, i32, i32
  }
}

</mosaic_0001>

<bundles_post_ra>
// kernel: tpu_custom_call.1
= control target key start
LH: loop header
LB: loop body
LE: loop exit
PB: predicated region body
PF: predicated region fallthrough
CT: control target
= control target key end

     0   :  { %s5075_s0 = inlined_call_operand.hbm [shape: bf16[2,16,128], index: 0, kind: input, shape index: {}]   ;;  %s5076_s1 = inlined_call_operand.hbm [shape: bf16[128,128], index: 1, kind: input, shape index: {}]   ;;  %s5077_s2 = inlined_call_operand.hbm [shape: f32[16,128], index: 2, kind: input, shape index: {}]   ;;  %s5078_s3 = inlined_call_operand.hbm [shape: f32[16,16], index: 3, kind: input, shape index: {}]   ;;  %s5079_s4 = inlined_call_operand.hbm [shape: f32[16,128], index: 4, kind: input, shape index: {}]   ;;  %s5080_s5 = inlined_call_operand.hbm [shape: f32[1,128], index: 5, kind: input, shape index: {}]   ;;  %s5081_s6 = inlined_call_operand.hbm [shape: f32[1,128], index: 6, kind: input, shape index: {}]   ;;  %s5082_s7 = inlined_call_operand.hbm [shape: bf16[128,384], index: 7, kind: input, shape index: {}]   ;;  %s5083_s8 = inlined_call_operand.hbm [shape: f32[1,384], index: 8, kind: input, shape index: {}]   ;;  %s5084_s9 = inlined_call_operand.hbm [shape: bf16[128,128], index: 9, kind: input, shape index: {}]   ;;  %s5085_s10 = inlined_call_operand.hbm [shape: f32[1,128], index: 10, kind: input, shape index: {}]   ;;  %s5086_s11 = inlined_call_operand.hbm [shape: f32[1,128], index: 11, kind: input, shape index: {}]   ;;  %s5087_s12 = inlined_call_operand.hbm [shape: f32[1,128], index: 12, kind: input, shape index: {}]   ;;  %s5088_s13 = inlined_call_operand.hbm [shape: bf16[128,512], index: 13, kind: input, shape index: {}]   ;;  %s5089_s14 = inlined_call_operand.hbm [shape: f32[1,512], index: 14, kind: input, shape index: {}]   ;;  %s5090_s15 = inlined_call_operand.hbm [shape: bf16[512,128], index: 15, kind: input, shape index: {}]   ;;  %s5091_s16 = inlined_call_operand.hbm [shape: f32[1,128], index: 16, kind: input, shape index: {}]   ;;  %s5092_s17 = inlined_call_operand.hbm [shape: f32[1,128], index: 17, kind: input, shape index: {}]   ;;  %s5093_s18 = inlined_call_operand.hbm [shape: f32[1,128], index: 18, kind: input, shape index: {}]   ;;  %s5094_s19 = inlined_call_operand.hbm [shape: bf16[128,2], index: 19, kind: input, shape index: {}]   ;;  %s5095_s20 = inlined_call_operand.hbm [shape: f32[1,2], index: 20, kind: input, shape index: {}]   ;;  %s5096_s21 = inlined_call_operand.hbm [shape: f32[1,2,2], index: 21, kind: output, shape index: {}]  }
   0x1   :  { %5110 = sst [smem:[#allocation48_spill]] %s5075_s0 }
   0x2   :  { %5111 = sst [smem:[#allocation49_spill]] %s5076_s1 }
   0x3   :  { %5112 = sst [smem:[#allocation50_spill]] %s5077_s2 }
   0x4   :  { %5113 = sst [smem:[#allocation51_spill]] %s5078_s3 }
   0x5   :  { %5114 = sst [smem:[#allocation52_spill]] %s5079_s4 }
   0x6   :  { %5115 = sst [smem:[#allocation53_spill]] %s5080_s5 }
   0x7   :  { %5116 = sst [smem:[#allocation54_spill]] %s5093_s18 }
   0x8   :  { %5117 = sst [smem:[#allocation55_spill]] %s5095_s20 }
   0x9   :  { %5118 = sst [smem:[#allocation56_spill]] %s5096_s21 }
   0xa   :  { %26 = vsyncpa [#allocation3], 0 }
   0xb   :  { %27 = vsyncpa [#allocation6], 0 }
   0xc   :  { %28 = vsyncpa [#allocation9], 0 }
   0xd   :  { %29 = vsyncpa [#allocation12], 0 }
   0xe   :  { %30 = vsyncpa [#allocation15], 0 }
   0xf   :  { %31 = vsyncpa [#allocation18], 0 }
  0x10   :  { %32 = vsyncpa [#allocation21], 0 }
  0x11   :  { %33 = vsyncpa [#allocation24], 0 }
  0x12   :  { %34 = vsyncpa [#allocation27], 0 }
  0x13   :  { %35 = vsyncpa [#allocation30], 0 }
  0x14   :  { %36 = vsyncpa [#allocation33], 0 }
  0x15   :  { %37 = vsyncpa [#allocation4], 0  ;;  %s4277_s2 = smov [#allocation5]   ;;  %s5119_s3 = sld [smem:[#allocation49_spill]] }
  0x16   :  { %s55_s25 = sshll.u32 %s4277_s2, 4  ;;  %s56_s25 = int_to_ptr.vmem [resolvable:$true] %s55_s25 }
  0x1b   :  { %s3769_s28 = scalar_lea.hbm %s5119_s3, 1024 }
  0x1c   :  { %p3770_p0 = scmp.ne.s32.totalorder %s5119_s3, %s3769_s28  ;;  %p3773_p1 = scmp.lt.u32.totalorder %s3769_s28, %s5119_s3 }
  0x1e   :  { %p3775_p2 = pnand %p3773_p1, %p3770_p0 }
  0x20   :  { %3778 = shalt.err (!%p3775_p2)
}
  0x21   :  { %s3779_s5 = scalar_lea.vmem %s56_s25, 1024  ;;  %p3784_p4 = scmp.lt.s32.totalorder %s56_s25, %s56_s25 }
  0x22   :  { %p3780_p3 = scmp.ne.s32.totalorder %s56_s25, %s3779_s5  ;;  %p3785_p5 = scmp.lt.s32.totalorder %s3779_s5, %s3779_s5 }
  0x24   :  { %p3786_p6 = por %p3785_p5, %p3784_p4 }
  0x26   :  { %p3787_p7 = pnand %p3786_p6, %p3780_p3 }
  0x28   :  { %3790 = shalt.err (!%p3787_p7)
}
  0x29   :  { %s5106_s22 = smov 64   ;;  %s4279_s23 = smov 4  }
  0x2a   :  { %61 = dma.hbm_to_vmem [thread:$0]  %s5119_s3, 1024, %s56_s25, [#allocation6], %s5106_s22, %s5106_s22, %s4279_s23  }
  0x2b   :  { %s4280_s2 = smov [#allocation8]   ;;  %s4281_s27 = smov [#allocation11]  }
  0x2c   :  { %s79_s26 = sshll.u32 %s4280_s2, 4  ;;  %s104_s28 = sshll.u32 %s4281_s27, 4  ;;  %s80_s26 = int_to_ptr.vmem [resolvable:$true] %s79_s26  ;;  %s105_s28 = int_to_ptr.vmem [resolvable:$true] %s104_s28 }
  0x2d   :  { %s5120_s4 = sld [smem:[#allocation51_spill]] }
  0x33   :  { %s3791_s30 = scalar_lea.hbm %s5120_s4, 256 }
  0x34   :  { %p3792_p8 = scmp.ne.s32.totalorder %s5120_s4, %s3791_s30  ;;  %p3795_p9 = scmp.lt.u32.totalorder %s3791_s30, %s5120_s4 }
  0x36   :  { %p3797_p10 = pnand %p3795_p9, %p3792_p8 }
  0x38   :  { %3800 = shalt.err (!%p3797_p10)
}
  0x39   :  { %s3801_s25 = scalar_lea.vmem %s80_s26, 256  ;;  %p3806_p12 = scmp.lt.s32.totalorder %s80_s26, %s80_s26 }
  0x3a   :  { %p3802_p11 = scmp.ne.s32.totalorder %s80_s26, %s3801_s25  ;;  %p3807_p13 = scmp.lt.s32.totalorder %s3801_s25, %s3801_s25 }
  0x3c   :  { %p3808_p0 = por %p3807_p13, %p3806_p12 }
  0x3e   :  { %p3809_p1 = pnand %p3808_p0, %p3802_p11 }
  0x40   :  { %3812 = shalt.err (!%p3809_p1)
}
  0x41   :  { %s5108_s3 = smov 128   ;;  %s4283_s1 = smov 8  }
  0x42   :  { %85 = dma.hbm_to_vmem [thread:$0]  %s5120_s4, 256, %s80_s26, [#allocation9], %s5108_s3, %s5108_s3, %s4283_s1  }
  0x43   :  { %s5121_s2 = sld [smem:[#allocation53_spill]] }
  0x49   :  { %s3813_s27 = scalar_lea.hbm %s5121_s2, 16 }
  0x4a   :  { %p3814_p2 = scmp.ne.s32.totalorder %s5121_s2, %s3813_s27  ;;  %p3817_p3 = scmp.lt.u32.totalorder %s3813_s27, %s5121_s2 }
  0x4c   :  { %p3819_p4 = pnand %p3817_p3, %p3814_p2 }
  0x4e   :  { %3822 = shalt.err (!%p3819_p4)
}
  0x4f   :  { %s3823_s25 = scalar_lea.vmem %s105_s28, 16  ;;  %s3827_s22 = scalar_lea.vmem %s105_s28, 32 }
  0x50   :  { %p3824_p5 = scmp.ne.s32.totalorder %s105_s28, %s3823_s25  ;;  %p3828_p6 = scmp.lt.s32.totalorder %s105_s28, %s105_s28 }
  0x51   :  { %p3829_p7 = scmp.lt.s32.totalorder %s3827_s22, %s3823_s25 }
  0x53   :  { %p3830_p8 = por %p3829_p7, %p3828_p6 }
  0x55   :  { %p3831_p9 = pnand %p3830_p8, %p3824_p5 }
  0x57   :  { %3834 = shalt.err (!%p3831_p9)
}
  0x58   :  { %107 = dma.hbm_to_vmem [thread:$0]  %s5121_s2, 16, %s105_s28, [#allocation12]  }
  0x59   :  { %s4284_s21 = smov [#allocation14]   ;;  %s3835_s27 = scalar_lea.hbm %s5082_s7, 3072 }
  0x5a   :  { %s123_s24 = sshll.u32 %s4284_s21, 4  ;;  %p3836_p10 = scmp.ne.s32.totalorder %s5082_s7, %s3835_s27  ;;  %s124_s24 = int_to_ptr.vmem [resolvable:$true] %s123_s24 }
  0x5b   :  { %p3839_p11 = scmp.lt.u32.totalorder %s3835_s27, %s5082_s7 }
  0x5d   :  { %p3841_p12 = pnand %p3839_p11, %p3836_p10 }
  0x5f   :  { %3844 = shalt.err (!%p3841_p12)
}
  0x60   :  { %s3845_s5 = scalar_lea.vmem %s124_s24, 3072  ;;  %p3850_p0 = scmp.lt.s32.totalorder %s124_s24, %s124_s24 }
  0x61   :  { %p3846_p13 = scmp.ne.s32.totalorder %s124_s24, %s3845_s5  ;;  %p3851_p1 = scmp.lt.s32.totalorder %s3845_s5, %s3845_s5 }
  0x63   :  { %p3852_p2 = por %p3851_p1, %p3850_p0 }
  0x65   :  { %p3853_p3 = pnand %p3852_p2, %p3846_p13 }
  0x67   :  { %3856 = shalt.err (!%p3853_p3)
}
  0x68   :  { %s4285_s28 = smov 192   ;;  %s4286_s2 = smov 12  }
  0x69   :  { %129 = dma.hbm_to_vmem [thread:$0]  %s5082_s7, 3072, %s124_s24, [#allocation15], %s4285_s28, %s4285_s28, %s4286_s2  }
  0x6a   :  { %s4287_s4 = smov [#allocation17]   ;;  %s4288_s18 = smov [#allocation20]  }
  0x6b   :  { %s145_s21 = sshll.u32 %s4287_s4, 4  ;;  %s168_s20 = sshll.u32 %s4288_s18, 4  ;;  %s146_s21 = int_to_ptr.vmem [resolvable:$true] %s145_s21  ;;  %s169_s20 = int_to_ptr.vmem [resolvable:$true] %s168_s20 }
  0x6c   :  { %s3857_s0 = scalar_lea.hbm %s5084_s9, 1024 }
  0x6d   :  { %p3858_p4 = scmp.ne.s32.totalorder %s5084_s9, %s3857_s0  ;;  %p3861_p5 = scmp.lt.u32.totalorder %s3857_s0, %s5084_s9 }
  0x6f   :  { %p3863_p6 = pnand %p3861_p5, %p3858_p4 }
  0x71   :  { %3866 = shalt.err (!%p3863_p6)
}
  0x72   :  { %s3867_s7 = scalar_lea.vmem %s146_s21, 1024  ;;  %p3872_p8 = scmp.lt.s32.totalorder %s146_s21, %s146_s21 }
  0x73   :  { %p3868_p7 = scmp.ne.s32.totalorder %s146_s21, %s3867_s7  ;;  %p3873_p9 = scmp.lt.s32.totalorder %s3867_s7, %s3867_s7 }
  0x75   :  { %p3874_p10 = por %p3873_p9, %p3872_p8 }
  0x77   :  { %p3875_p11 = pnand %p3874_p10, %p3868_p7 }
  0x79   :  { %3878 = shalt.err (!%p3875_p11)
}
  0x7a   :  { %s5122_s24 = smov 64   ;;  %s3879_s3 = scalar_lea.hbm %s5086_s11, 16 }
  0x7b   :  { %151 = dma.hbm_to_vmem [thread:$0]  %s5084_s9, 1024, %s146_s21, [#allocation18], %s5122_s24, %s5122_s24, %s4279_s23  }
  0x7c   :  { %p3880_p12 = scmp.ne.s32.totalorder %s5086_s11, %s3879_s3  ;;  %p3883_p13 = scmp.lt.u32.totalorder %s3879_s3, %s5086_s11 }
  0x7e   :  { %p3885_p0 = pnand %p3883_p13, %p3880_p12 }
  0x80   :  { %3888 = shalt.err (!%p3885_p0)
}
  0x81   :  { %s3889_s0 = scalar_lea.vmem %s169_s20, 16  ;;  %s3893_s30 = scalar_lea.vmem %s169_s20, 32 }
  0x82   :  { %p3890_p1 = scmp.ne.s32.totalorder %s169_s20, %s3889_s0  ;;  %p3894_p2 = scmp.lt.s32.totalorder %s169_s20, %s169_s20 }
  0x83   :  { %p3895_p3 = scmp.lt.s32.totalorder %s3893_s30, %s3889_s0 }
  0x85   :  { %p3896_p4 = por %p3895_p3, %p3894_p2 }
  0x87   :  { %p3897_p5 = pnand %p3896_p4, %p3890_p1 }
  0x89   :  { %3900 = shalt.err (!%p3897_p5)
}
  0x8a   :  { %171 = dma.hbm_to_vmem [thread:$0]  %s5086_s11, 16, %s169_s20, [#allocation21]  }
  0x8b   :  { %s4289_s22 = smov [#allocation23]   ;;  %s3901_s2 = scalar_lea.hbm %s5088_s13, 4096 }
  0x8c   :  { %s187_s5 = sshll.u32 %s4289_s22, 4  ;;  %p3902_p6 = scmp.ne.s32.totalorder %s5088_s13, %s3901_s2  ;;  %s188_s5 = int_to_ptr.vmem [resolvable:$true] %s187_s5 }
  0x8d   :  { %p3905_p7 = scmp.lt.u32.totalorder %s3901_s2, %s5088_s13 }
  0x8f   :  { %p3907_p8 = pnand %p3905_p7, %p3902_p6 }
  0x91   :  { %3910 = shalt.err (!%p3907_p8)
}
  0x92   :  { %s3911_s18 = scalar_lea.vmem %s188_s5, 4096  ;;  %p3916_p10 = scmp.lt.s32.totalorder %s188_s5, %s188_s5 }
  0x93   :  { %p3912_p9 = scmp.ne.s32.totalorder %s188_s5, %s3911_s18  ;;  %p3917_p11 = scmp.lt.s32.totalorder %s3911_s18, %s3911_s18 }
  0x95   :  { %p3918_p12 = por %p3917_p11, %p3916_p10 }
  0x97   :  { %p3919_p13 = pnand %p3918_p12, %p3912_p9 }
  0x99   :  { %3922 = shalt.err (!%p3919_p13)
}
  0x9a   :  { %s4290_s11 = smov 256   ;;  %s4291_s20 = smov 16  }
  0x9b   :  { %193 = dma.hbm_to_vmem [thread:$0]  %s5088_s13, 4096, %s188_s5, [#allocation24], %s4290_s11, %s4290_s11, %s4291_s20  }
  0x9c   :  { %s4292_s0 = smov [#allocation26]   ;;  %s4293_s9 = smov [#allocation29]  }
  0x9d   :  { %s209_s30 = sshll.u32 %s4292_s0, 4  ;;  %s232_s21 = sshll.u32 %s4293_s9, 4  ;;  %s210_s30 = int_to_ptr.vmem [resolvable:$true] %s209_s30  ;;  %s233_s21 = int_to_ptr.vmem [resolvable:$true] %s232_s21 }
  0x9e   :  { %s3923_s28 = scalar_lea.hbm %s5090_s15, 4096 }
  0x9f   :  { %p3924_p0 = scmp.ne.s32.totalorder %s5090_s15, %s3923_s28  ;;  %p3927_p1 = scmp.lt.u32.totalorder %s3923_s28, %s5090_s15 }
  0xa1   :  { %p3929_p2 = pnand %p3927_p1, %p3924_p0 }
  0xa3   :  { %3932 = shalt.err (!%p3929_p2)
}
  0xa4   :  { %s3933_s13 = scalar_lea.vmem %s210_s30, 4096  ;;  %p3938_p4 = scmp.lt.s32.totalorder %s210_s30, %s210_s30 }
  0xa5   :  { %p3934_p3 = scmp.ne.s32.totalorder %s210_s30, %s3933_s13  ;;  %p3939_p5 = scmp.lt.s32.totalorder %s3933_s13, %s3933_s13 }
  0xa7   :  { %p3940_p6 = por %p3939_p5, %p3938_p4 }
  0xa9   :  { %p3941_p7 = pnand %p3940_p6, %p3934_p3 }
  0xab   :  { %3944 = shalt.err (!%p3941_p7)
}
  0xac   :  { %215 = dma.hbm_to_vmem [thread:$0]  %s5090_s15, 4096, %s210_s30, [#allocation27], %s5122_s24, %s5122_s24, %s4279_s23  }
  0xad   :  { %s3945_s20 = scalar_lea.hbm %s5092_s17, 16 }
  0xae   :  { %p3946_p8 = scmp.ne.s32.totalorder %s5092_s17, %s3945_s20  ;;  %p3949_p9 = scmp.lt.u32.totalorder %s3945_s20, %s5092_s17 }
  0xb0   :  { %p3951_p10 = pnand %p3949_p9, %p3946_p8 }
  0xb2   :  { %3954 = shalt.err (!%p3951_p10)
}
  0xb3   :  { %s3955_s22 = scalar_lea.vmem %s233_s21, 16  ;;  %s3959_s7 = scalar_lea.vmem %s233_s21, 32 }
  0xb4   :  { %p3956_p11 = scmp.ne.s32.totalorder %s233_s21, %s3955_s22  ;;  %p3960_p12 = scmp.lt.s32.totalorder %s233_s21, %s233_s21 }
  0xb5   :  { %p3961_p13 = scmp.lt.s32.totalorder %s3959_s7, %s3955_s22 }
  0xb7   :  { %p3962_p0 = por %p3961_p13, %p3960_p12 }
  0xb9   :  { %p3963_p1 = pnand %p3962_p0, %p3956_p11 }
  0xbb   :  { %3966 = shalt.err (!%p3963_p1)
}
  0xbc   :  { %235 = dma.hbm_to_vmem [thread:$0]  %s5092_s17, 16, %s233_s21, [#allocation30]  }
  0xbd   :  { %s4294_s28 = smov [#allocation32]   ;;  %s4295_s25 = smov [#allocation2]  }
  0xbe   :  { %s251_s2 = sshll.u32 %s4294_s28, 4  ;;  %s43_s26 = sshll.u32 %s4295_s25, 4  ;;  %s252_s2 = int_to_ptr.vmem [resolvable:$true] %s251_s2  ;;  %s44_s26 = int_to_ptr.vmem [resolvable:$true] %s43_s26 }
  0xbf   :  { %s3967_s5 = scalar_lea.hbm %s5094_s19, 1024 }
  0xc0   :  { %p3968_p2 = scmp.ne.s32.totalorder %s5094_s19, %s3967_s5  ;;  %p3971_p3 = scmp.lt.u32.totalorder %s3967_s5, %s5094_s19 }
  0xc2   :  { %p3973_p4 = pnand %p3971_p3, %p3968_p2 }
  0xc4   :  { %3976 = shalt.err (!%p3973_p4)
}
  0xc5   :  { %s3977_s17 = scalar_lea.vmem %s252_s2, 1024  ;;  %p3982_p6 = scmp.lt.s32.totalorder %s252_s2, %s252_s2 }
  0xc6   :  { %p3978_p5 = scmp.ne.s32.totalorder %s252_s2, %s3977_s17  ;;  %p3983_p7 = scmp.lt.s32.totalorder %s3977_s17, %s3977_s17 }
  0xc8   :  { %p3984_p8 = por %p3983_p7, %p3982_p6 }
  0xca   :  { %p3985_p9 = pnand %p3984_p8, %p3978_p5 }
  0xcc   :  { %3988 = shalt.err (!%p3985_p9)
}
  0xcd   :  { %257 = dma.hbm_to_vmem [thread:$0]  %s5094_s19, 1024, %s252_s2, [#allocation33], %s5122_s24, %s5122_s24, %s4279_s23  }
  0xce   :  { %s5123_s9 = sld [smem:[#allocation48_spill]] }
  0xd4   :  { %s3989_s22 = scalar_lea.hbm %s5123_s9, 256 }
  0xd5   :  { %p3990_p10 = scmp.ne.s32.totalorder %s5123_s9, %s3989_s22  ;;  %p3993_p11 = scmp.lt.u32.totalorder %s3989_s22, %s5123_s9 }
  0xd7   :  { %p3995_p12 = pnand %p3993_p11, %p3990_p10 }
  0xd9   :  { %3998 = shalt.err (!%p3995_p12)
}
  0xda   :  { %s3999_s25 = scalar_lea.vmem %s44_s26, 256  ;;  %p4004_p0 = scmp.lt.s32.totalorder %s44_s26, %s44_s26 }
  0xdb   :  { %p4000_p13 = scmp.ne.s32.totalorder %s44_s26, %s3999_s25  ;;  %p4005_p1 = scmp.lt.s32.totalorder %s3999_s25, %s3999_s25 }
  0xdd   :  { %p4006_p2 = por %p4005_p1, %p4004_p0 }
  0xdf   :  { %p4007_p3 = pnand %p4006_p2, %p4000_p13 }
  0xe1   :  { %4010 = shalt.err (!%p4007_p3)
}
  0xe2   :  { %49 = dma.hbm_to_vmem [thread:$0]  %s5123_s9, 256, %s44_s26, [#allocation3], %s5122_s24, %s5122_s24, %s4279_s23  }
  0xe3   :  { %s4296_s3 = smov [#allocation7]   ;;  %s4297_s5 = smov [#allocation10]  }
  0xe4   :  { %s67_s13 = sshll.u32 %s4296_s3, 4  ;;  %s91_s4 = sshll.u32 %s4297_s5, 4  ;;  %s68_s13 = int_to_ptr.vmem [resolvable:$true] %s67_s13  ;;  %s92_s4 = int_to_ptr.vmem [resolvable:$true] %s91_s4 }
  0xe5   :  { %s5124_s20 = sld [smem:[#allocation50_spill]] }
  0xeb   :  { %s4011_s17 = scalar_lea.hbm %s5124_s20, 256 }
  0xec   :  { %p4012_p4 = scmp.ne.s32.totalorder %s5124_s20, %s4011_s17  ;;  %p4015_p5 = scmp.lt.u32.totalorder %s4011_s17, %s5124_s20 }
  0xee   :  { %p4017_p6 = pnand %p4015_p5, %p4012_p4 }
  0xf0   :  { %4020 = shalt.err (!%p4017_p6)
}
  0xf1   :  { %s4021_s23 = scalar_lea.vmem %s68_s13, 256  ;;  %p4026_p8 = scmp.lt.s32.totalorder %s68_s13, %s68_s13 }
  0xf2   :  { %p4022_p7 = scmp.ne.s32.totalorder %s68_s13, %s4021_s23  ;;  %p4027_p9 = scmp.lt.s32.totalorder %s4021_s23, %s4021_s23 }
  0xf4   :  { %p4028_p10 = por %p4027_p9, %p4026_p8 }
  0xf6   :  { %p4029_p11 = pnand %p4028_p10, %p4022_p7 }
  0xf8   :  { %4032 = shalt.err (!%p4029_p11)
}
  0xf9   :  { %s5125_s26 = smov 128   ;;  %s5126_s30 = sld [smem:[#allocation52_spill]] }
  0xfa   :  { %73 = dma.hbm_to_vmem [thread:$0]  %s5124_s20, 256, %s68_s13, [#allocation6], %s5125_s26, %s5125_s26, %s4283_s1  }
  0xff   :  { %s4033_s28 = scalar_lea.hbm %s5126_s30, 256 }
 0x100   :  { %p4034_p12 = scmp.ne.s32.totalorder %s5126_s30, %s4033_s28  ;;  %p4037_p13 = scmp.lt.u32.totalorder %s4033_s28, %s5126_s30 }
 0x102   :  { %p4039_p0 = pnand %p4037_p13, %p4034_p12 }
 0x104   :  { %4042 = shalt.err (!%p4039_p0)
}
 0x105   :  { %s4043_s5 = scalar_lea.vmem %s92_s4, 256  ;;  %p4048_p2 = scmp.lt.s32.totalorder %s92_s4, %s92_s4 }
 0x106   :  { %p4044_p1 = scmp.ne.s32.totalorder %s92_s4, %s4043_s5  ;;  %p4049_p3 = scmp.lt.s32.totalorder %s4043_s5, %s4043_s5 }
 0x108   :  { %p4050_p4 = por %p4049_p3, %p4048_p2 }
 0x10a   :  { %p4051_p5 = pnand %p4050_p4, %p4044_p1 }
 0x10c   :  { %4054 = shalt.err (!%p4051_p5)
}
 0x10d   :  { %97 = dma.hbm_to_vmem [thread:$0]  %s5126_s30, 256, %s92_s4, [#allocation9], %s5125_s26, %s5125_s26, %s4283_s1  }
 0x10e   :  { %s4298_s11 = smov [#allocation13]   ;;  %s4299_s17 = smov [#allocation16]  }
 0x10f   :  { %s114_s20 = sshll.u32 %s4298_s11, 4  ;;  %s136_s21 = sshll.u32 %s4299_s17, 4  ;;  %s115_s20 = int_to_ptr.vmem [resolvable:$true] %s114_s20  ;;  %s137_s21 = int_to_ptr.vmem [resolvable:$true] %s136_s21 }
 0x110   :  { %s4055_s0 = scalar_lea.hbm %s5081_s6, 16 }
 0x111   :  { %p4056_p6 = scmp.ne.s32.totalorder %s5081_s6, %s4055_s0  ;;  %p4059_p7 = scmp.lt.u32.totalorder %s4055_s0, %s5081_s6 }
 0x113   :  { %p4061_p8 = pnand %p4059_p7, %p4056_p6 }
 0x115   :  { %4064 = shalt.err (!%p4061_p8)
}
 0x116   :  { %s4065_s1 = scalar_lea.vmem %s115_s20, 16  ;;  %s4069_s4 = scalar_lea.vmem %s115_s20, 32 }
 0x117   :  { %p4066_p9 = scmp.ne.s32.totalorder %s115_s20, %s4065_s1  ;;  %p4070_p10 = scmp.lt.s32.totalorder %s115_s20, %s115_s20 }
 0x118   :  { %p4071_p11 = scmp.lt.s32.totalorder %s4069_s4, %s4065_s1 }
 0x11a   :  { %p4072_p12 = por %p4071_p11, %p4070_p10 }
 0x11c   :  { %p4073_p13 = pnand %p4072_p12, %p4066_p9 }
 0x11e   :  { %4076 = shalt.err (!%p4073_p13)
}
 0x11f   :  { %117 = dma.hbm_to_vmem [thread:$0]  %s5081_s6, 16, %s115_s20, [#allocation12]  }
 0x120   :  { %s4077_s25 = scalar_lea.hbm %s5083_s8, 48 }
 0x121   :  { %p4078_p0 = scmp.ne.s32.totalorder %s5083_s8, %s4077_s25  ;;  %p4081_p1 = scmp.lt.u32.totalorder %s4077_s25, %s5083_s8 }
 0x123   :  { %p4083_p2 = pnand %p4081_p1, %p4078_p0 }
 0x125   :  { %4086 = shalt.err (!%p4083_p2)
}
 0x126   :  { %s4087_s13 = scalar_lea.vmem %s137_s21, 48  ;;  %s4091_s18 = scalar_lea.vmem %s137_s21, 64 }
 0x127   :  { %p4088_p3 = scmp.ne.s32.totalorder %s137_s21, %s4087_s13  ;;  %p4092_p4 = scmp.lt.s32.totalorder %s137_s21, %s137_s21 }
 0x128   :  { %p4093_p5 = scmp.lt.s32.totalorder %s4091_s18, %s4087_s13 }
 0x12a   :  { %p4094_p6 = por %p4093_p5, %p4092_p4 }
 0x12c   :  { %p4095_p7 = pnand %p4094_p6, %p4088_p3 }
 0x12e   :  { %4098 = shalt.err (!%p4095_p7)
}
 0x12f   :  { %139 = dma.hbm_to_vmem [thread:$0]  %s5083_s8, 48, %s137_s21, [#allocation15]  }
 0x130   :  { %s4300_s20 = smov [#allocation19]   ;;  %s4301_s27 = smov [#allocation22]  }
 0x131   :  { %s158_s17 = sshll.u32 %s4300_s20, 4  ;;  %s178_s29 = sshll.u32 %s4301_s27, 4  ;;  %s159_s17 = int_to_ptr.vmem [resolvable:$true] %s158_s17  ;;  %s179_s29 = int_to_ptr.vmem [resolvable:$true] %s178_s29 }
 0x132   :  { %s4099_s9 = scalar_lea.hbm %s5085_s10, 16 }
 0x133   :  { %p4100_p8 = scmp.ne.s32.totalorder %s5085_s10, %s4099_s9  ;;  %p4103_p9 = scmp.lt.u32.totalorder %s4099_s9, %s5085_s10 }
 0x135   :  { %p4105_p10 = pnand %p4103_p9, %p4100_p8 }
 0x137   :  { %4108 = shalt.err (!%p4105_p10)
}
 0x138   :  { %s4109_s8 = scalar_lea.vmem %s159_s17, 16  ;;  %s4113_s21 = scalar_lea.vmem %s159_s17, 32 }
 0x139   :  { %p4110_p11 = scmp.ne.s32.totalorder %s159_s17, %s4109_s8  ;;  %p4114_p12 = scmp.lt.s32.totalorder %s159_s17, %s159_s17 }
 0x13a   :  { %p4115_p13 = scmp.lt.s32.totalorder %s4113_s21, %s4109_s8 }
 0x13c   :  { %p4116_p0 = por %p4115_p13, %p4114_p12 }
 0x13e   :  { %p4117_p1 = pnand %p4116_p0, %p4110_p11 }
 0x140   :  { %4120 = shalt.err (!%p4117_p1)
}
 0x141   :  { %161 = dma.hbm_to_vmem [thread:$0]  %s5085_s10, 16, %s159_s17, [#allocation18]  }
 0x142   :  { %s4121_s25 = scalar_lea.hbm %s5087_s12, 16 }
 0x143   :  { %p4122_p2 = scmp.ne.s32.totalorder %s5087_s12, %s4121_s25  ;;  %p4125_p3 = scmp.lt.u32.totalorder %s4121_s25, %s5087_s12 }
 0x145   :  { %p4127_p4 = pnand %p4125_p3, %p4122_p2 }
 0x147   :  { %4130 = shalt.err (!%p4127_p4)
}
 0x148   :  { %s4131_s13 = scalar_lea.vmem %s179_s29, 16  ;;  %s4135_s18 = scalar_lea.vmem %s179_s29, 32 }
 0x149   :  { %p4132_p5 = scmp.ne.s32.totalorder %s179_s29, %s4131_s13  ;;  %p4136_p6 = scmp.lt.s32.totalorder %s179_s29, %s179_s29 }
 0x14a   :  { %p4137_p7 = scmp.lt.s32.totalorder %s4135_s18, %s4131_s13 }
 0x14c   :  { %p4138_p8 = por %p4137_p7, %p4136_p6 }
 0x14e   :  { %p4139_p9 = pnand %p4138_p8, %p4132_p5 }
 0x150   :  { %4142 = shalt.err (!%p4139_p9)
}
 0x151   :  { %181 = dma.hbm_to_vmem [thread:$0]  %s5087_s12, 16, %s179_s29, [#allocation21]  }
 0x152   :  { %s4302_s11 = smov [#allocation25]   ;;  %s4303_s17 = smov [#allocation28]  }
 0x153   :  { %s200_s20 = sshll.u32 %s4302_s11, 4  ;;  %s222_s27 = sshll.u32 %s4303_s17, 4  ;;  %s201_s20 = int_to_ptr.vmem [resolvable:$true] %s200_s20  ;;  %s223_s27 = int_to_ptr.vmem [resolvable:$true] %s222_s27 }
 0x154   :  { %s4143_s9 = scalar_lea.hbm %s5089_s14, 64 }
 0x155   :  { %p4144_p10 = scmp.ne.s32.totalorder %s5089_s14, %s4143_s9  ;;  %p4147_p11 = scmp.lt.u32.totalorder %s4143_s9, %s5089_s14 }
 0x157   :  { %p4149_p12 = pnand %p4147_p11, %p4144_p10 }
 0x159   :  { %4152 = shalt.err (!%p4149_p12)
}
 0x15a   :  { %s4153_s12 = scalar_lea.vmem %s201_s20, 64  ;;  %p4158_p0 = scmp.lt.s32.totalorder %s201_s20, %s201_s20 }
 0x15b   :  { %p4154_p13 = scmp.ne.s32.totalorder %s201_s20, %s4153_s12  ;;  %p4159_p1 = scmp.lt.s32.totalorder %s4153_s12, %s4153_s12 }
 0x15d   :  { %p4160_p2 = por %p4159_p1, %p4158_p0 }
 0x15f   :  { %p4161_p3 = pnand %p4160_p2, %p4154_p13 }
 0x161   :  { %4164 = shalt.err (!%p4161_p3)
}
 0x162   :  { %203 = dma.hbm_to_vmem [thread:$0]  %s5089_s14, 64, %s201_s20, [#allocation24]  }
 0x163   :  { %s4165_s15 = scalar_lea.hbm %s5091_s16, 16 }
 0x164   :  { %p4166_p4 = scmp.ne.s32.totalorder %s5091_s16, %s4165_s15  ;;  %p4169_p5 = scmp.lt.u32.totalorder %s4165_s15, %s5091_s16 }
 0x166   :  { %p4171_p6 = pnand %p4169_p5, %p4166_p4 }
 0x168   :  { %4174 = shalt.err (!%p4171_p6)
}
 0x169   :  { %s4175_s2 = scalar_lea.vmem %s223_s27, 16  ;;  %s4179_s3 = scalar_lea.vmem %s223_s27, 32 }
 0x16a   :  { %p4176_p7 = scmp.ne.s32.totalorder %s223_s27, %s4175_s2  ;;  %p4180_p8 = scmp.lt.s32.totalorder %s223_s27, %s223_s27 }
 0x16b   :  { %p4181_p9 = scmp.lt.s32.totalorder %s4179_s3, %s4175_s2 }
 0x16d   :  { %p4182_p10 = por %p4181_p9, %p4180_p8 }
 0x16f   :  { %p4183_p11 = pnand %p4182_p10, %p4176_p7 }
 0x171   :  { %4186 = shalt.err (!%p4183_p11)
}
 0x172   :  { %225 = dma.hbm_to_vmem [thread:$0]  %s5091_s16, 16, %s223_s27, [#allocation27]  }
 0x173   :  { %s4304_s13 = smov [#allocation31]   ;;  %s4305_s10 = smov [#allocation34]  }
 0x174   :  { %s242_s18 = sshll.u32 %s4304_s13, 4  ;;  %s264_s6 = sshll.u32 %s4305_s10, 4  ;;  %s243_s18 = int_to_ptr.vmem [resolvable:$true] %s242_s18  ;;  %s265_s6 = int_to_ptr.vmem [resolvable:$true] %s264_s6 }
 0x175   :  { %s5127_s17 = sld [smem:[#allocation54_spill]] }
 0x17b   :  { %s4187_s0 = scalar_lea.hbm %s5127_s17, 16 }
 0x17c   :  { %p4188_p12 = scmp.ne.s32.totalorder %s5127_s17, %s4187_s0  ;;  %p4191_p13 = scmp.lt.u32.totalorder %s4187_s0, %s5127_s17 }
 0x17e   :  { %p4193_p0 = pnand %p4191_p13, %p4188_p12 }
 0x180   :  { %4196 = shalt.err (!%p4193_p0)
}
 0x181   :  { %s4197_s16 = scalar_lea.vmem %s243_s18, 16  ;;  %s4201_s27 = scalar_lea.vmem %s243_s18, 32 }
 0x182   :  { %p4198_p1 = scmp.ne.s32.totalorder %s243_s18, %s4197_s16  ;;  %p4202_p2 = scmp.lt.s32.totalorder %s243_s18, %s243_s18 }
 0x183   :  { %p4203_p3 = scmp.lt.s32.totalorder %s4201_s27, %s4197_s16 }
 0x185   :  { %p4204_p4 = por %p4203_p3, %p4202_p2 }
 0x187   :  { %p4205_p5 = pnand %p4204_p4, %p4198_p1 }
 0x189   :  { %4208 = shalt.err (!%p4205_p5)
}
 0x18a   :  { %245 = dma.hbm_to_vmem [thread:$0]  %s5127_s17, 16, %s243_s18, [#allocation30]  }
 0x18b   :  { %s5128_s8 = sld [smem:[#allocation55_spill]] }
 0x191   :  { %s4209_s21 = scalar_lea.hbm %s5128_s8, 16 }
 0x192   :  { %p4210_p6 = scmp.ne.s32.totalorder %s5128_s8, %s4209_s21  ;;  %p4213_p7 = scmp.lt.u32.totalorder %s4209_s21, %s5128_s8 }
 0x194   :  { %p4215_p8 = pnand %p4213_p7, %p4210_p6 }
 0x196   :  { %4218 = shalt.err (!%p4215_p8)
}
 0x197   :  { %s4219_s25 = scalar_lea.vmem %s265_s6, 16  ;;  %s4223_s19 = scalar_lea.vmem %s265_s6, 32 }
 0x198   :  { %p4220_p9 = scmp.ne.s32.totalorder %s265_s6, %s4219_s25  ;;  %p4224_p10 = scmp.lt.s32.totalorder %s265_s6, %s265_s6 }
 0x199   :  { %p4225_p11 = scmp.lt.s32.totalorder %s4223_s19, %s4219_s25 }
 0x19b   :  { %p4226_p12 = por %p4225_p11, %p4224_p10 }
 0x19d   :  { %p4227_p13 = pnand %p4226_p12, %p4220_p9 }
 0x19f   :  { %4230 = shalt.err (!%p4227_p13)
}
 0x1a0   :  { %267 = dma.hbm_to_vmem [thread:$0]  %s5128_s8, 16, %s265_s6, [#allocation33]  }
 0x1a1   :  { %4253 = dma.done.wait [#allocation3], 256  }
 0x1a2   :  { %4254 = vsyncadd [#allocation3], 4294967040 }
 0x1a3   :  { %4255 = dma.done.wait [#allocation6], 1280  }
 0x1a4   :  { %4256 = vsyncadd [#allocation6], 4294966016 }
 0x1a5   :  { %4257 = dma.done.wait [#allocation9], 512  }
 0x1a6   :  { %4258 = vsyncadd [#allocation9], 4294966784 }
 0x1a7   :  { %4259 = dma.done.wait [#allocation12], 32  }
 0x1a8   :  { %4260 = vsyncadd [#allocation12], 4294967264 }
 0x1a9   :  { %4261 = dma.done.wait [#allocation15], 3120  }
 0x1aa   :  { %4262 = vsyncadd [#allocation15], 4294964176 }
 0x1ab   :  { %4263 = dma.done.wait [#allocation18], 1040  }
 0x1ac   :  { %4264 = vsyncadd [#allocation18], 4294966256 }
 0x1ad   :  { %4265 = dma.done.wait [#allocation21], 32  }
 0x1ae   :  { %4266 = vsyncadd [#allocation21], 4294967264 }
 0x1af   :  { %4267 = dma.done.wait [#allocation24], 4160  }
 0x1b0   :  { %4268 = vsyncadd [#allocation24], 4294963136 }
 0x1b1   :  { %4269 = dma.done.wait [#allocation27], 4112  }
 0x1b2   :  { %4270 = vsyncadd [#allocation27], 4294963184 }
 0x1b3   :  { %4271 = dma.done.wait [#allocation30], 32  }
 0x1b4   :  { %4272 = vsyncadd [#allocation30], 4294967264 }
 0x1b5   :  { %4273 = dma.done.wait [#allocation33], 1040  }
 0x1b6   :  { %4274 = vsyncadd [#allocation33], 4294966256  ;;  %v3511_v0 = vld [vmem:[#allocation5] sm:$0xff]   ;;  %v3512_v1 = vld [vmem:[#allocation5 + $0x8] sm:$0xff]   ;;  %v4306_v59 = vmov 0   ;;  %vm4308_vm0 = vmmov 0  }
 0x1b7   :  { %3270 = vmatprep.subr.bf16.mxu0 %v3511_v0  ;;  %v3513_v2 = vld [vmem:[#allocation5 + $0x10] sm:$0xff]   ;;  %v3514_v3 = vld [vmem:[#allocation5 + $0x18] sm:$0xff]   ;;  %v3515_v5 = vld [vmem:[#allocation5 + $0x20] sm:$0xff]   ;;  %745 = vmatprep.mubr.bf16.mxu1 %v4306_v59  ;;  %vm823_vm1 = vcmask 261120   ;;  %vm930_vm2 = vcmask 130048   ;;  %s4309_s14 = smov 96  }
 0x1b8   :  { %3271 = vmatpush3.bf16.msra.mxu0 %v3511_v0  ;;  %v3519_v4 = vld [vmem:[#allocation2] sm:$0xff]   ;;  %v3516_v6 = vld [vmem:[#allocation5 + $0x28] sm:$0xff]   ;;  %v3518_v8 = vld [vmem:[#allocation5 + $0x38] sm:$0xff]   ;;  %s4310_s5 = smov 32   ;;  %vm1789_vm3 = vcmask 523264   ;;  %vm1794_vm4 = vcmask 785408  }
 0x1b9   :  { %3272 = vmatprep.subr.bf16.mxu0 %v3512_v1  ;;  %3286 = vmatprep.mubr.bf16.mxu0 %v3519_v4  ;;  %v3517_v7 = vld [vmem:[#allocation5 + $0x30] sm:$0xff]   ;;  %v3520_v9 = vld [vmem:[#allocation2 + $0x8] sm:$0xff]   ;;  %v461_v10 = vld [vmem:[#allocation7] sm:$0xff]  ;;  %vm2885_vm5 = vcmask 1041409   ;;  %vm2977_vm6 = vcmask 9216  }
 0x1ba   :  { %v462_v16 = vld [vmem:[#allocation7 + $0x8] sm:$0xff]  ;;  %v3521_v20 = vld [vmem:[#allocation14 + $0x4] ss:$12 sps:$4 sm:$0xff]   ;;  %v3523_v21 = vld [vmem:[#allocation14] ss:$12 sps:$4 sm:$0xff]  }
 0x1bb   :  { %v3524_v22 = vld [vmem:[#allocation14 + $0x1c] ss:$12 sps:$4 sm:$0xff]   ;;  %713 = vmatprep.subr.bf16.mxu1 %v3521_v20  ;;  %v3527_v40 = vld [vmem:[#allocation14 + $0x18] ss:$12 sps:$4 sm:$0xff]   ;;  %v3528_v41 = vld [vmem:[#allocation14 + $0x34] ss:$12 sps:$4 sm:$0xff]  }
 0x1bc   :  { %3273 = vmatpush3.bf16.msra.mxu0 %v3512_v1  ;;  %v3526_v23 = vld [vmem:[#allocation14 + $0x8] ss:$12 sps:$4 sm:$0xff]   ;;  %714 = vmatpush1.bf16.msra.mxu1 %v3523_v21  ;;  %v3530_v42 = vld [vmem:[#allocation14 + $0x20] ss:$12 sps:$4 sm:$0xff]   ;;  %v3531_v43 = vld [vmem:[#allocation14 + $0x30] ss:$12 sps:$4 sm:$0xff]  }
 0x1bd   :  { %3274 = vmatprep.subr.bf16.mxu0 %v3513_v2  ;;  %715 = vmatprep.subr.bf16.mxu1 %v3524_v22  ;;  %v3532_v44 = vld [vmem:[#allocation14 + $0x4c] ss:$12 sps:$4 sm:$0xff]   ;;  %v3535_v46 = vld [vmem:[#allocation14 + $0x48] ss:$12 sps:$4 sm:$0xff]   ;;  %v3536_v47 = vld [vmem:[#allocation14 + $0x64] ss:$12 sps:$4 sm:$0xff]  }
 0x1be   :  { %v3534_v45 = vld [vmem:[#allocation14 + $0x38] ss:$12 sps:$4 sm:$0xff]   ;;  %v3538_v48 = vld [vmem:[#allocation14 + $0x50] ss:$12 sps:$4 sm:$0xff]   ;;  %v3539_v49 = vld [vmem:[#allocation14 + $0x60] ss:$12 sps:$4 sm:$0xff]  }
 0x1bf   :  { %v3540_v50 = vld [vmem:[#allocation14 + $0x7c] ss:$12 sps:$4 sm:$0xff]   ;;  %v3543_v52 = vld [vmem:[#allocation14 + $0x78] ss:$12 sps:$4 sm:$0xff]   ;;  %v3544_v53 = vld [vmem:[#allocation14 + $0x94] ss:$12 sps:$4 sm:$0xff]  }
 0x1c0   :  { %3275 = vmatpush3.bf16.msra.mxu0 %v3513_v2  ;;  %716 = vmatpush1.bf16.msra.mxu1 %v3527_v40  ;;  %v3542_v51 = vld [vmem:[#allocation14 + $0x68] ss:$12 sps:$4 sm:$0xff]   ;;  %v3546_v54 = vld [vmem:[#allocation14 + $0x80] ss:$12 sps:$4 sm:$0xff]   ;;  %v3547_v55 = vld [vmem:[#allocation14 + $0x90] ss:$12 sps:$4 sm:$0xff]  }
 0x1c1   :  { %3276 = vmatprep.subr.bf16.mxu0 %v3514_v3  ;;  %717 = vmatprep.subr.bf16.mxu1 %v3528_v41  ;;  %v3548_v56 = vld [vmem:[#allocation14 + $0xac] ss:$12 sps:$4 sm:$0xff]   ;;  %v3551_v58 = vld [vmem:[#allocation14 + $0xa8] ss:$12 sps:$4 sm:$0xff]   ;;  %v3552_v60 = vld [vmem:[#allocation14 + $0xb0] ss:$12 sps:$4 sm:$0xff]  }
 0x1c2   :  { %v3550_v57 = vld [vmem:[#allocation14 + $0x98] ss:$12 sps:$4 sm:$0xff]   ;;  %v3015_v21 = vld [vmem:[#allocation13] ss:$0 sm:$0xff] }
 0x1c4   :  { %3277 = vmatpush3.bf16.msra.mxu0 %v3514_v3  ;;  %718 = vmatpush1.bf16.msra.mxu1 %v3531_v43 }
 0x1c5   :  { %3278 = vmatprep.subr.bf16.mxu0 %v3515_v5  ;;  %719 = vmatprep.subr.bf16.mxu1 %v3532_v44 }
 0x1c8   :  { %3279 = vmatpush3.bf16.msra.mxu0 %v3515_v5  ;;  %720 = vmatpush1.bf16.msra.mxu1 %v3535_v46 }
 0x1c9   :  { %3280 = vmatprep.subr.bf16.mxu0 %v3516_v6  ;;  %721 = vmatprep.subr.bf16.mxu1 %v3536_v47 }
 0x1cc   :  { %3281 = vmatpush3.bf16.msra.mxu0 %v3516_v6  ;;  %722 = vmatpush1.bf16.msra.mxu1 %v3539_v49 }
 0x1cd   :  { %3282 = vmatprep.subr.bf16.mxu0 %v3517_v7  ;;  %723 = vmatprep.subr.bf16.mxu1 %v3540_v50 }
 0x1d0   :  { %3283 = vmatpush3.bf16.msra.mxu0 %v3517_v7  ;;  %724 = vmatpush1.bf16.msra.mxu1 %v3543_v52 }
 0x1d1   :  { %3284 = vmatprep.subr.bf16.mxu0 %v3518_v8  ;;  %725 = vmatprep.subr.bf16.mxu1 %v3544_v53 }
 0x1d4   :  { %3285 = vmatpush3.bf16.msra.mxu0 %v3518_v8  ;;  %726 = vmatpush1.bf16.msra.mxu1 %v3547_v55 }
 0x1d5   :  { %3290 = vmatprep.subr.bf16.mxu0 %v3526_v23  ;;  %727 = vmatprep.subr.bf16.mxu1 %v3548_v56 }
 0x1d7   :  { %3287 = vmatmul.mubr.bf16.vlgmr.msra.gmra.mrb[0].mxu0 %v3520_v9 }
 0x1d8   :  { %3291 = vmatpush3.bf16.msra.mxu0 %v3526_v23  ;;  %728 = vmatpush1.bf16.msra.mxu1 %v3551_v58 }
 0x1d9   :  { %3292 = vmatprep.subr.bf16.mxu0 %v3530_v42 }
 0x1dc   :  { %3293 = vmatpush3.bf16.msra.mxu0 %v3530_v42 }
 0x1dd   :  { %3294 = vmatprep.subr.bf16.mxu0 %v3534_v45 }
 0x1e0   :  { %3295 = vmatpush3.bf16.msra.mxu0 %v3534_v45 }
 0x1e1   :  { %3296 = vmatprep.subr.bf16.mxu0 %v3538_v48 }
 0x1e4   :  { %3297 = vmatpush3.bf16.msra.mxu0 %v3538_v48 }
 0x1e5   :  { %3298 = vmatprep.subr.bf16.mxu0 %v3542_v51 }
 0x1e8   :  { %3299 = vmatpush3.bf16.msra.mxu0 %v3542_v51 }
 0x1e9   :  { %3300 = vmatprep.subr.bf16.mxu0 %v3546_v54 }
 0x1ec   :  { %3301 = vmatpush3.bf16.msra.mxu0 %v3546_v54 }
 0x1ed   :  { %3302 = vmatprep.subr.bf16.mxu0 %v3550_v57 }
 0x1f0   :  { %3303 = vmatpush3.bf16.msra.mxu0 %v3550_v57 }
 0x1f1   :  { %3304 = vmatprep.subr.bf16.mxu0 %v3552_v60 }
 0x1f4   :  { %3305 = vmatpush3.bf16.msra.mxu0 %v3552_v60 }
 0x2aa   :  { %v3288_v11 = vpop.f32.mrb[0].mxu0 }
 0x2ab   :  { %v4698_v12 = vadd.f32 %v3288_v11, %v461_v10  ;;  %v446_v13 = vpop.f32.mrb[1].mxu0  ;;  %v3014_v11 = vld [vmem:[#allocation11] ss:$0 sm:$0xff] }
 0x2ac   :  { %v4700_v14 = vadd.f32 %v461_v10, %v446_v13  ;;  %v3289_v15 = vpop.f32.mrb[2].mxu0 }
 0x2ad   :  { %473 = vadd.xlane.f32.xlu1 %v4698_v12  ;;  %v449_v17 = vpop.f32.mrb[3].mxu0  ;;  %v4704_v18 = vadd.f32 %v3289_v15, %v462_v16 }
 0x2ae   :  { %469 = vadd.xlane.f32.xlu0 %v4700_v14  ;;  %v4706_v19 = vadd.f32 %v462_v16, %v449_v17 }
 0x2b1   :  { %475 = vadd.xlane.f32.xlu1 %v4704_v18 }
 0x2b2   :  { %471 = vadd.xlane.f32.xlu0 %v4706_v19 }
 0x33a   :  { %v474_v24 = vpop.xlane.xlu1 %473 }
 0x33b   :  { %v470_v25 = vpop.xlane.xlu0 %469  ;;  %v480_v26 = vmul.f32 0.0078125, %v474_v24 }
 0x33c   :  { %v478_v27 = vmul.f32 0.0078125, %v470_v25 }
 0x33d   :  { %v4714_v31 = vsub.f32 %v4698_v12, %v480_v26 }
 0x33e   :  { %v4711_v28 = vsub.f32 %v4700_v14, %v478_v27  ;;  %v476_v29 = vpop.xlane.xlu1 %475 }
 0x33f   :  { %v472_v30 = vpop.xlane.xlu0 %471  ;;  %v481_v32 = vmul.f32 0.0078125, %v476_v29  ;;  %v488_v37 = vmul.f32 %v4714_v31, %v4714_v31 }
 0x340   :  { %v479_v33 = vmul.f32 0.0078125, %v472_v30  ;;  %v486_v34 = vmul.f32 %v4711_v28, %v4711_v28 }
 0x341   :  { %v4722_v36 = vsub.f32 %v4704_v18, %v481_v32 }
 0x342   :  { %v4719_v35 = vsub.f32 %v4706_v19, %v479_v33  ;;  %490 = vadd.xlane.f32.xlu0 %v486_v34  ;;  %v570_v34 = vlaneseq }
 0x343   :  { %v489_v39 = vmul.f32 %v4722_v36, %v4722_v36 }
 0x344   :  { %v487_v38 = vmul.f32 %v4719_v35, %v4719_v35 }
 0x346   :  { %494 = vadd.xlane.f32.xlu0 %v488_v37  ;;  %492 = vadd.xlane.f32.xlu1 %v487_v38  ;;  %v568_v37 = vld [vmem:[#allocation16] sm:$0x7] }
 0x34a   :  { %496 = vadd.xlane.f32.xlu1 %v489_v39 }
 0x3cf   :  { %v491_v61 = vpop.xlane.xlu0 %490 }
 0x3d0   :  { %v498_v62 = vmul.f32 0.0078125, %v491_v61 }
 0x3d2   :  { %v502_v63 = vadd.f32 1e-06, %v498_v62 }
 0x3d3   :  { %v493_v0 = vpop.xlane.xlu1 %492  ;;  %v495_v1 = vpop.xlane.xlu0 %494 }
 0x3d4   :  { %3649 = vrsqrt.f32 %v502_v63  ;;  %v499_v2 = vmul.f32 0.0078125, %v493_v0  ;;  %v500_v3 = vmul.f32 0.0078125, %v495_v1 }
 0x3d6   :  { %v503_v4 = vadd.f32 1e-06, %v499_v2  ;;  %v504_v5 = vadd.f32 1e-06, %v500_v3 }
 0x3d7   :  { %v497_v6 = vpop.xlane.xlu1 %496 }
 0x3d8   :  { %3651 = vrsqrt.f32 %v503_v4  ;;  %v501_v7 = vmul.f32 0.0078125, %v497_v6 }
 0x3d9   :  { %3653 = vrsqrt.f32 %v504_v5 }
 0x3da   :  { %v505_v8 = vadd.f32 1e-06, %v501_v7 }
 0x3dc   :  { %3655 = vrsqrt.f32 %v505_v8 }
 0x3de   :  { %v3650_v9 = vpop.eup %3649 }
 0x3df   :  { %v510_v10 = vmul.f32 %v3650_v9, %v4711_v28 }
 0x3e1   :  { %v520_v17 = vmul.f32 %v3014_v11, %v510_v10 }
 0x3e2   :  { %v3652_v13 = vpop.eup %3651 }
 0x3e3   :  { %v3654_v15 = vpop.eup %3653  ;;  %v511_v16 = vmul.f32 %v3652_v13, %v4719_v35  ;;  %v530_v25 = vadd.f32 %v3015_v21, %v520_v17  ;;  %v4742_v35 = vshrl.u32 %v570_v34, 7 }
 0x3e4   :  { %v512_v20 = vmul.f32 %v3654_v15, %v4714_v31  ;;  %v4307_v31 = vmov 0.0  }
 0x3e5   :  { %v521_v22 = vmul.f32 %v3014_v11, %v511_v16  ;;  %3310 = vmatprep.subr.bf16.mxu1 %v4307_v31  ;;  %3328 = vmatprep.subr.bf16.mxu0 %v4307_v31  ;;  %v576_v38 = vsub.s32 1, %v4742_v35  ;;  %v580_v40 = vsub.s32 2, %v4742_v35 }
 0x3e6   :  { %v3656_v23 = vpop.eup %3655  ;;  %v522_v27 = vmul.f32 %v3014_v11, %v512_v20 }
 0x3e7   :  { %v513_v24 = vmul.f32 %v3656_v23, %v4722_v36  ;;  %v531_v26 = vadd.f32 %v3015_v21, %v521_v22  ;;  %v572_v36 = vsub.s32 0, %v4742_v35  ;;  %v577_v42 = vrot.slane %v568_v37, %v576_v38 }
 0x3e8   :  { %v532_v28 = vadd.f32 %v3015_v21, %v522_v27  ;;  %v581_v48 = vrot.slane %v568_v37, %v580_v40  ;;  %v4783_v27 = vld [vmem:[#allocation8] sm:$0xff] }
 0x3e9   :  { %v534_v29 = vpack.c.bf16 %v531_v26, %v530_v25  ;;  %v523_v30 = vmul.f32 %v3014_v11, %v513_v24  ;;  %v573_v39 = vrot.slane %v568_v37, %v572_v36 }
 0x3eb   :  { %746 = vmatmul.mubr.bf16.vlgmr.msra.gmra.mrb[0].mxu1 %v534_v29  ;;  %3306 = vmatprep.mubr.bf16.mxu0 %v534_v29  ;;  %v533_v32 = vadd.f32 %v3015_v21, %v523_v30  ;;  %v4785_v30 = vld [vmem:[#allocation8 + $0x8] sm:$0xff] }
 0x3ec   :  { %755 = vmatprep.mubr.bf16.mxu1 %v4306_v59 }
 0x3ed   :  { %v535_v33 = vpack.c.bf16 %v533_v32, %v532_v28 }
 0x3ef   :  { %3307 = vmatmul.mubr.bf16.vlgmr.msra.gmra.mrb[4].mxu0 %v535_v33 }
 0x3f0   :  { %3330 = vmatprep.mubr.msk.bf16.mxu0 %vm4308_vm0, %v4307_v31 }
 0x3f3   :  { %756 = vmatmul.mubr.bf16.gmra.mrb[4].mxu1 %v535_v33 }
 0x3f4   :  { %3312 = vmatprep.mubr.msk.bf16.mxu1 %vm4308_vm0, %v4307_v31 }
 0x4be   :  { %v747_v41 = vpop.f32.mrb[0].mxu1 }
 0x4bf   :  { %v749_v43 = vpop.f32.mrb[1].mxu1  ;;  %v748_v45 = vadd.f32 %v747_v41, %v573_v39 }
 0x4c0   :  { %v751_v44 = vpop.f32.mrb[2].mxu1  ;;  %v750_v49 = vadd.f32 %v749_v43, %v577_v42 }
 0x4c1   :  { %v752_v46 = vadd.f32 %v751_v44, %v573_v39  ;;  %v753_v47 = vpop.f32.mrb[3].mxu1 }
 0x4c2   :  { %v754_v50 = vadd.f32 %v753_v47, %v577_v42  ;;  %v3308_v51 = vpop.f32.mrb[4].mxu0 }
 0x4c3   :  { %v4753_v52 = vpack.c.bf16 %v752_v46, %v748_v45  ;;  %v800_v53 = vpop.f32.mrb[5].mxu0  ;;  %v809_v56 = vadd.f32 %v3308_v51, %v581_v48 }
 0x4c4   :  { %v4755_v54 = vpack.c.bf16 %v754_v50, %v750_v49  ;;  %v3309_v55 = vpop.f32.mrb[6].mxu0  ;;  %v801_v60 = vadd.f32 %v800_v53, %v581_v48 }
 0x4c5   :  { %v812_v57 = vadd.f32 %v3309_v55, %v581_v48  ;;  %v803_v58 = vpop.f32.mrb[7].mxu0 }
 0x4c6   :  { %v804_v61 = vadd.f32 %v803_v58, %v581_v48  ;;  %v757_v62 = vpop.f32.mrb[4].mxu1  ;;  %v828_v63 = vsel %vm823_vm1, %v4755_v54, 0 }
 0x4c7   :  { %v4759_v0 = vpack.c.bf16 %v812_v57, %v809_v56  ;;  %v759_v1 = vpop.f32.mrb[5].mxu1  ;;  %3311 = vmatpush3.bf16.xpose.msra.mxu1 %v828_v63  ;;  %v758_v4 = vadd.f32 %v757_v62, %v573_v39 }
 0x4c8   :  { %v4761_v2 = vpack.c.bf16 %v804_v61, %v801_v60  ;;  %v761_v3 = vpop.f32.mrb[6].mxu1  ;;  %3316 = vmatprep.subr.bf16.mxu1 %v4307_v31  ;;  %v760_v7 = vadd.f32 %v759_v1, %v577_v42 }
 0x4c9   :  { %v762_v5 = vadd.f32 %v761_v3, %v573_v39  ;;  %v763_v6 = vpop.f32.mrb[7].mxu1  ;;  %3329 = vmatpush3.bf16.msra.mxu0 %v4759_v0 }
 0x4ca   :  { %v764_v8 = vadd.f32 %v763_v6, %v577_v42  ;;  %3340 = vmatprep.subr.bf16.mxu0 %v4307_v31 }
 0x4cb   :  { %v4766_v9 = vpack.c.bf16 %v762_v5, %v758_v4 }
 0x4cc   :  { %v4768_v10 = vpack.c.bf16 %v764_v8, %v760_v7 }
 0x4ce   :  { %3313 = vmatmul.mubr.msk.bf16.vlgmr.msra.gmra.mrb[8].mxu1 %vm823_vm1, %v4753_v52  ;;  %v875_v11 = vsel %vm823_vm1, %v4768_v10, 0 }
 0x4cf   :  { %3317 = vmatpush3.bf16.xpose.msra.mxu1 %v875_v11  ;;  %3318 = vmatprep.mubr.msk.bf16.mxu1 %vm4308_vm0, %v4307_v31 }
 0x4d0   :  { %3322 = vmatprep.subr.bf16.mxu1 %v4307_v31 }
 0x4d6   :  { %3319 = vmatmul.mubr.msk.bf16.vlgmr.msra.gmra.mrb[12].mxu1 %vm823_vm1, %v4766_v9 }
 0x4d7   :  { %3323 = vmatpush3.bf16.msra.mxu1 %v4761_v2  ;;  %3324 = vmatprep.mubr.msk.bf16.mxu1 %vm4308_vm0, %v4307_v31 }
 0x4d8   :  { %3334 = vmatprep.subr.bf16.mxu1 %v4307_v31 }
 0x5a1   :  { %v864_v13 = vpop.f32.mrb[8].mxu1 }
 0x5a2   :  { %v918_v15 = vmul.f32 1.442695, %v864_v13  ;;  %v3314_v16 = vpop.f32.mrb[9].mxu1 }
 0x5a3   :  { %v867_v17 = vpop.f32.mrb[10].mxu1 }
 0x5a4   :  { %3657 = vpow2.f32 %v918_v15  ;;  %v920_v20 = vmul.f32 1.442695, %v867_v17  ;;  %v3315_v21 = vpop.f32.mrb[11].mxu1 }
 0x5a6   :  { %3659 = vpow2.f32 %v920_v20 }
 0x5a9   :  { %v911_v22 = vpop.f32.mrb[12].mxu1 }
 0x5aa   :  { %v922_v23 = vmul.f32 1.442695, %v911_v22  ;;  %v3320_v24 = vpop.f32.mrb[13].mxu1 }
 0x5ab   :  { %v914_v25 = vpop.f32.mrb[14].mxu1 }
 0x5ac   :  { %3661 = vpow2.f32 %v922_v23  ;;  %v3321_v26 = vpop.f32.mrb[15].mxu1  ;;  %v924_v43 = vmul.f32 1.442695, %v914_v25 }
 0x5ae   :  { %v3658_v29 = vpop.eup %3657  ;;  %3663 = vpow2.f32 %v924_v43 }
 0x5af   :  { %v926_v28 = vmul.f32 %v3658_v29, %v4783_v27 }
 0x5b0   :  { %v3660_v32 = vpop.eup %3659 }
 0x5b1   :  { %v931_v33 = vsel %vm930_vm2, %v926_v28, 0.0  ;;  %v927_v34 = vmul.f32 %v3660_v32, %v4785_v30 }
 0x5b2   :  { %932 = vadd.xlane.f32.xlu0 %v931_v33 }
 0x5b3   :  { %v934_v37 = vsel %vm930_vm2, %v927_v34, 0.0 }
 0x5b4   :  { %935 = vadd.xlane.f32.xlu1 %v934_v37 }
 0x5b6   :  { %v3662_v39 = vpop.eup %3661 }
 0x5b7   :  { %v928_v41 = vmul.f32 %v3662_v39, %v4783_v27 }
 0x5b8   :  { %v3664_v44 = vpop.eup %3663 }
 0x5b9   :  { %v937_v42 = vsel %vm930_vm2, %v928_v41, 0.0  ;;  %v929_v45 = vmul.f32 %v3664_v44, %v4785_v30 }
 0x5ba   :  { %938 = vadd.xlane.f32.xlu0 %v937_v42 }
 0x5bb   :  { %v940_v46 = vsel %vm930_vm2, %v929_v45, 0.0 }
 0x5c5   :  { %1098 = vrot.lane.b32.xlu1 %v4768_v10, %s4309_s14 }
 0x5d0   :  { %1045 = vrot.lane.b32.xlu0 %v4755_v54, %s4309_s14 }
 0x5e9   :  { %941 = vadd.xlane.f32.xlu1 %v940_v46 }
 0x5fa   :  { %1042 = vrot.lane.b32.xlu1 %v4753_v52, %s4309_s14 }
 0x5fe   :  { %1095 = vrot.lane.b32.xlu1 %v4766_v9, %s4309_s14 }
 0x63f   :  { %v933_v47 = vpop.xlane.xlu0 %932 }
 0x640   :  { %3665 = vrcp.f32 %v933_v47 }
 0x641   :  { %v936_v48 = vpop.xlane.xlu1 %935 }
 0x642   :  { %3667 = vrcp.f32 %v936_v48 }
 0x645   :  { %v1099_v60 = vpop.permute.xlu1 %1098 }
 0x646   :  { %v1104_v6 = vsel %vm823_vm1, %v1099_v60, 0 }
 0x647   :  { %v939_v49 = vpop.xlane.xlu0 %938 }
 0x648   :  { %3669 = vrcp.f32 %v939_v49 }
 0x64a   :  { %v3666_v50 = vpop.eup %3665 }
 0x64b   :  { %v947_v53 = vmul.f32 %v3666_v50, %v926_v28  ;;  %v1046_v56 = vpop.permute.xlu0 %1045 }
 0x64c   :  { %v3668_v51 = vpop.eup %3667  ;;  %v1051_v58 = vsel %vm823_vm1, %v1046_v56, 0 }
 0x64d   :  { %v948_v55 = vmul.f32 %v3668_v51, %v927_v34 }
 0x64f   :  { %v951_v57 = vpack.c.bf16 %v948_v55, %v947_v53 }
 0x651   :  { %3325 = vmatmul.mubr.msk.bf16.vlgmr.msra.gmra.mrb[16].mxu1 %vm930_vm2, %v951_v57 }
 0x652   :  { %3335 = vmatpush3.bf16.xpose.msra.mxu1 %v1051_v58  ;;  %3336 = vmatprep.mubr.msk.bf16.mxu1 %vm4308_vm0, %v4307_v31  ;;  %v3670_v63 = vpop.eup %3669 }
 0x653   :  { %3346 = vmatprep.subr.bf16.mxu1 %v4307_v31  ;;  %v949_v3 = vmul.f32 %v3670_v63, %v928_v41 }
 0x676   :  { %v942_v61 = vpop.xlane.xlu1 %941 }
 0x677   :  { %3671 = vrcp.f32 %v942_v61 }
 0x67a   :  { %v1043_v62 = vpop.permute.xlu1 %1042 }
 0x67b   :  { %3337 = vmatmul.mubr.msk.bf16.vlgmr.msra.gmra.mrb[20].mxu1 %vm823_vm1, %v1043_v62 }
 0x67c   :  { %3348 = vmatprep.mubr.msk.bf16.mxu1 %vm4308_vm0, %v4307_v31 }
 0x67e   :  { %v1096_v7 = vpop.permute.xlu1 %1095 }
 0x681   :  { %v3672_v1 = vpop.eup %3671 }
 0x682   :  { %v950_v4 = vmul.f32 %v3672_v1, %v929_v45 }
 0x684   :  { %v952_v5 = vpack.c.bf16 %v950_v4, %v949_v3 }
 0x686   :  { %3331 = vmatmul.mubr.msk.bf16.vlgmr.msra.gmra.mrb[8].mxu0 %vm930_vm2, %v952_v5 }
 0x687   :  { %3341 = vmatpush3.bf16.xpose.msra.mxu0 %v1104_v6  ;;  %3342 = vmatprep.mubr.msk.bf16.mxu0 %vm4308_vm0, %v4307_v31 }
 0x688   :  { %3352 = vmatprep.subr.bf16.mxu0 %v4307_v31 }
 0x68e   :  { %3343 = vmatmul.mubr.msk.bf16.vlgmr.msra.gmra.mrb[12].mxu0 %vm823_vm1, %v1096_v7 }
 0x68f   :  { %3354 = vmatprep.mubr.msk.bf16.mxu0 %vm4308_vm0, %v4307_v31 }
 0x724   :  { %v4819_v8 = vpop.f32.mrb[16].mxu1 }
 0x725   :  { %v3326_v11 = vpop.f32.mrb[17].mxu1 }
 0x726   :  { %v4821_v13 = vpop.f32.mrb[18].mxu1 }
 0x727   :  { %v3327_v15 = vpop.f32.mrb[19].mxu1 }
 0x74e   :  { %v1087_v16 = vpop.f32.mrb[20].mxu1 }
 0x74f   :  { %v1147_v17 = vmul.f32 1.442695, %v1087_v16  ;;  %v3338_v20 = vpop.f32.mrb[21].mxu1 }
 0x750   :  { %v1090_v21 = vpop.f32.mrb[22].mxu1 }
 0x751   :  { %3673 = vpow2.f32 %v1147_v17  ;;  %v1149_v22 = vmul.f32 1.442695, %v1090_v21  ;;  %v3339_v23 = vpop.f32.mrb[23].mxu1 }
 0x753   :  { %3675 = vpow2.f32 %v1149_v22 }
 0x759   :  { %v4823_v24 = vpop.f32.mrb[8].mxu0 }
 0x75a   :  { %v3332_v25 = vpop.f32.mrb[9].mxu0 }
 0x75b   :  { %v3674_v26 = vpop.eup %3673  ;;  %v4825_v29 = vpop.f32.mrb[10].mxu0 }
 0x75c   :  { %v3333_v28 = vpop.f32.mrb[11].mxu0  ;;  %v1155_v32 = vmul.f32 %v3674_v26, %v4783_v27 }
 0x75d   :  { %v3676_v33 = vpop.eup %3675 }
 0x75e   :  { %v1159_v34 = vsel %vm930_vm2, %v1155_v32, 0.0  ;;  %v1156_v37 = vmul.f32 %v3676_v33, %v4785_v30 }
 0x75f   :  { %1160 = vadd.xlane.f32.xlu0 %v1159_v34 }
 0x760   :  { %v1162_v39 = vsel %vm930_vm2, %v1156_v37, 0.0 }
 0x761   :  { %v1140_v41 = vpop.f32.mrb[12].mxu0  ;;  %1163 = vadd.xlane.f32.xlu1 %v1162_v39 }
 0x762   :  { %v1151_v42 = vmul.f32 1.442695, %v1140_v41  ;;  %v3344_v43 = vpop.f32.mrb[13].mxu0 }
 0x763   :  { %v1143_v44 = vpop.f32.mrb[14].mxu0 }
 0x764   :  { %3677 = vpow2.f32 %v1151_v42  ;;  %v1153_v45 = vmul.f32 1.442695, %v1143_v44  ;;  %v3345_v46 = vpop.f32.mrb[15].mxu0 }
 0x766   :  { %3679 = vpow2.f32 %v1153_v45 }
 0x76e   :  { %v3678_v47 = vpop.eup %3677 }
 0x76f   :  { %v1157_v48 = vmul.f32 %v3678_v47, %v4783_v27 }
 0x770   :  { %v3680_v49 = vpop.eup %3679 }
 0x771   :  { %v1165_v50 = vsel %vm930_vm2, %v1157_v48, 0.0  ;;  %v1158_v51 = vmul.f32 %v3680_v49, %v4785_v30 }
 0x772   :  { %1166 = vadd.xlane.f32.xlu0 %v1165_v50  ;;  %1230 = vrot.lane.b32.xlu1 %v4759_v0, %s4309_s14 }
 0x773   :  { %v1168_v53 = vsel %vm930_vm2, %v1158_v51, 0.0 }
 0x776   :  { %1169 = vadd.xlane.f32.xlu0 %v1168_v53  ;;  %1279 = vrot.lane.b32.xlu1 %v4755_v54, %s5122_s24 }
 0x77a   :  { %1330 = vrot.lane.b32.xlu1 %v4768_v10, %s5122_s24 }
 0x77e   :  { %1328 = vrot.lane.b32.xlu1 %v4766_v9, %s5122_s24 }
 0x78c   :  { %1182 = vrot.lane.b32.xlu0 %v4761_v2, %s4309_s14 }
 0x790   :  { %1277 = vrot.lane.b32.xlu0 %v4753_v52, %s5122_s24 }
 0x7ec   :  { %v1161_v57 = vpop.xlane.xlu0 %1160 }
 0x7ee   :  { %v1164_v55 = vpop.xlane.xlu1 %1163 }
 0x7ef   :  { %3681 = vrcp.f32 %v1164_v55 }
 0x7f0   :  { %3683 = vrcp.f32 %v1161_v57 }
 0x7f2   :  { %v1231_v56 = vpop.permute.xlu1 %1230 }
 0x7f3   :  { %3353 = vmatpush3.bf16.msra.mxu0 %v1231_v56 }
 0x7f4   :  { %3364 = vmatprep.subr.bf16.mxu0 %v4307_v31 }
 0x7f6   :  { %v1280_v5 = vpop.permute.xlu1 %1279 }
 0x7f7   :  { %v1285_v16 = vsel %vm823_vm1, %v1280_v5, 0 }
 0x7f9   :  { %v3682_v60 = vpop.eup %3681 }
 0x7fa   :  { %v3684_v62 = vpop.eup %3683  ;;  %v1176_v63 = vmul.f32 %v3682_v60, %v1156_v37  ;;  %v1331_v17 = vpop.permute.xlu1 %1330 }
 0x7fb   :  { %v1175_v1 = vmul.f32 %v3684_v62, %v1155_v32  ;;  %v1336_v21 = vsel %vm823_vm1, %v1331_v17, 0 }
 0x7fd   :  { %v1179_v4 = vpack.c.bf16 %v1176_v63, %v1175_v1 }
 0x7fe   :  { %v1329_v23 = vpop.permute.xlu1 %1328 }
 0x7ff   :  { %v1167_v58 = vpop.xlane.xlu0 %1166 }
 0x800   :  { %3685 = vrcp.f32 %v1167_v58 }
 0x803   :  { %v1170_v61 = vpop.xlane.xlu0 %1169 }
 0x804   :  { %3687 = vrcp.f32 %v1170_v61 }
 0x807   :  { %v1183_v3 = vpop.permute.xlu0 %1182 }
 0x808   :  { %3347 = vmatpush3.bf16.msra.mxu1 %v1183_v3 }
 0x809   :  { %3358 = vmatprep.subr.bf16.mxu1 %v4307_v31 }
 0x80a   :  { %v3686_v6 = vpop.eup %3685 }
 0x80b   :  { %3349 = vmatmul.mubr.msk.bf16.vlgmr.msra.gmra.mrb[24].mxu1 %vm930_vm2, %v1179_v4  ;;  %v1177_v11 = vmul.f32 %v3686_v6, %v1157_v48  ;;  %v1278_v22 = vpop.permute.xlu0 %1277 }
 0x80c   :  { %3360 = vmatprep.mubr.msk.bf16.mxu1 %vm4308_vm0, %v4307_v31 }
 0x80e   :  { %v3688_v7 = vpop.eup %3687 }
 0x80f   :  { %v1178_v15 = vmul.f32 %v3688_v7, %v1158_v51 }
 0x811   :  { %3359 = vmatpush3.bf16.xpose.msra.mxu1 %v1285_v16  ;;  %v1180_v20 = vpack.c.bf16 %v1178_v15, %v1177_v11 }
 0x812   :  { %3370 = vmatprep.subr.bf16.mxu1 %v4307_v31 }
 0x813   :  { %3355 = vmatmul.mubr.msk.bf16.vlgmr.msra.gmra.mrb[16].mxu0 %vm930_vm2, %v1180_v20 }
 0x814   :  { %3365 = vmatpush3.bf16.xpose.msra.mxu0 %v1336_v21  ;;  %3366 = vmatprep.mubr.msk.bf16.mxu0 %vm4308_vm0, %v4307_v31 }
 0x815   :  { %3376 = vmatprep.subr.bf16.mxu0 %v4307_v31 }
 0x818   :  { %3361 = vmatmul.mubr.msk.bf16.vlgmr.msra.gmra.mrb[28].mxu1 %vm823_vm1, %v1278_v22 }
 0x819   :  { %3372 = vmatprep.mubr.msk.bf16.mxu1 %vm4308_vm0, %v4307_v31 }
 0x81b   :  { %3367 = vmatmul.mubr.msk.bf16.vlgmr.msra.gmra.mrb[20].mxu0 %vm823_vm1, %v1329_v23 }
 0x81c   :  { %3378 = vmatprep.mubr.msk.bf16.mxu0 %vm4308_vm0, %v4307_v31 }
 0x8de   :  { %v4865_v25 = vpop.f32.mrb[24].mxu1 }
 0x8df   :  { %v3350_v26 = vpop.f32.mrb[25].mxu1 }
 0x8e0   :  { %v4867_v28 = vpop.f32.mrb[26].mxu1 }
 0x8e1   :  { %v3481_v32 = vpack.i.bf16 %v4867_v28, %v4865_v25  ;;  %v3351_v33 = vpop.f32.mrb[27].mxu1 }
 0x8e6   :  { %v4871_v34 = vpop.f32.mrb[16].mxu0 }
 0x8e7   :  { %v3356_v37 = vpop.f32.mrb[17].mxu0 }
 0x8e8   :  { %v4873_v39 = vpop.f32.mrb[18].mxu0 }
 0x8e9   :  { %v3486_v41 = vpack.i.bf16 %v4873_v39, %v4871_v34  ;;  %v3357_v42 = vpop.f32.mrb[19].mxu0 }
 0x8eb   :  { %v1321_v43 = vpop.f32.mrb[28].mxu1 }
 0x8ec   :  { %v1379_v44 = vmul.f32 1.442695, %v1321_v43  ;;  %v3362_v45 = vpop.f32.mrb[29].mxu1 }
 0x8ed   :  { %v1324_v46 = vpop.f32.mrb[30].mxu1 }
 0x8ee   :  { %3689 = vpow2.f32 %v1379_v44  ;;  %v1381_v47 = vmul.f32 1.442695, %v1324_v46  ;;  %v3363_v48 = vpop.f32.mrb[31].mxu1  ;;  %v1372_v49 = vpop.f32.mrb[20].mxu0 }
 0x8ef   :  { %v1383_v50 = vmul.f32 1.442695, %v1372_v49  ;;  %v3368_v51 = vpop.f32.mrb[21].mxu0 }
 0x8f0   :  { %3691 = vpow2.f32 %v1381_v47  ;;  %v1375_v53 = vpop.f32.mrb[22].mxu0 }
 0x8f1   :  { %3693 = vpow2.f32 %v1383_v50  ;;  %v1385_v55 = vmul.f32 1.442695, %v1375_v53  ;;  %v3369_v56 = vpop.f32.mrb[23].mxu0 }
 0x8f3   :  { %3695 = vpow2.f32 %v1385_v55 }
 0x8f8   :  { %v3690_v57 = vpop.eup %3689 }
 0x8f9   :  { %v1387_v58 = vmul.f32 %v3690_v57, %v4783_v27 }
 0x8fa   :  { %v3692_v60 = vpop.eup %3691 }
 0x8fb   :  { %v3694_v61 = vpop.eup %3693  ;;  %v1391_v62 = vsel %vm930_vm2, %v1387_v58, 0.0  ;;  %v1388_v63 = vmul.f32 %v3692_v60, %v4785_v30 }
 0x8fc   :  { %1392 = vadd.xlane.f32.xlu0 %v1391_v62  ;;  %v1389_v1 = vmul.f32 %v3694_v61, %v4783_v27 }
 0x8fd   :  { %v3696_v3 = vpop.eup %3695  ;;  %v1394_v4 = vsel %vm930_vm2, %v1388_v63, 0.0 }
 0x8fe   :  { %1395 = vadd.xlane.f32.xlu1 %v1394_v4  ;;  %v1397_v5 = vsel %vm930_vm2, %v1389_v1, 0.0  ;;  %v1390_v6 = vmul.f32 %v3696_v3, %v4785_v30 }
 0x900   :  { %1398 = vadd.xlane.f32.xlu0 %v1397_v5  ;;  %v1400_v7 = vsel %vm930_vm2, %v1390_v6, 0.0 }
 0x904   :  { %1401 = vadd.xlane.f32.xlu0 %v1400_v7 }
 0x90f   :  { %1460 = vrot.lane.b32.xlu1 %v4759_v0, %s5122_s24 }
 0x913   :  { %1509 = vrot.lane.b32.xlu1 %v4755_v54, %s4310_s5 }
 0x917   :  { %1560 = vrot.lane.b32.xlu1 %v4768_v10, %s4310_s5 }
 0x91a   :  { %1413 = vrot.lane.b32.xlu0 %v4761_v2, %s5122_s24 }
 0x91b   :  { %1558 = vrot.lane.b32.xlu1 %v4766_v9, %s4310_s5 }
 0x91e   :  { %1507 = vrot.lane.b32.xlu0 %v4753_v52, %s4310_s5 }
 0x989   :  { %v1393_v11 = vpop.xlane.xlu0 %1392 }
 0x98a   :  { %3697 = vrcp.f32 %v1393_v11 }
 0x98b   :  { %v1396_v15 = vpop.xlane.xlu1 %1395 }
 0x98c   :  { %3699 = vrcp.f32 %v1396_v15 }
 0x98d   :  { %v1399_v16 = vpop.xlane.xlu0 %1398 }
 0x98e   :  { %3701 = vrcp.f32 %v1399_v16 }
 0x98f   :  { %v1461_v17 = vpop.permute.xlu1 %1460 }
 0x990   :  { %3377 = vmatpush3.bf16.msra.mxu0 %v1461_v17 }
 0x991   :  { %v1402_v54 = vpop.xlane.xlu0 %1401  ;;  %3388 = vmatprep.subr.bf16.mxu0 %v4307_v31 }
 0x992   :  { %3703 = vrcp.f32 %v1402_v54 }
 0x993   :  { %v1510_v52 = vpop.permute.xlu1 %1509 }
 0x994   :  { %v3698_v10 = vpop.eup %3697  ;;  %v1515_v43 = vsel %vm823_vm1, %v1510_v52, 0 }
 0x995   :  { %v1414_v20 = vpop.permute.xlu0 %1413  ;;  %v1407_v9 = vmul.f32 %v3698_v10, %v1387_v58 }
 0x996   :  { %v3700_v21 = vpop.eup %3699  ;;  %3371 = vmatpush3.bf16.msra.mxu1 %v1414_v20 }
 0x997   :  { %v1408_v22 = vmul.f32 %v3700_v21, %v1388_v63  ;;  %3382 = vmatprep.subr.bf16.mxu1 %v4307_v31  ;;  %v1561_v44 = vpop.permute.xlu1 %1560 }
 0x998   :  { %v3702_v26 = vpop.eup %3701  ;;  %v1566_v46 = vsel %vm823_vm1, %v1561_v44, 0 }
 0x999   :  { %v1411_v23 = vpack.c.bf16 %v1408_v22, %v1407_v9  ;;  %v1409_v37 = vmul.f32 %v3702_v26, %v1389_v1  ;;  %v1508_v47 = vpop.permute.xlu0 %1507 }
 0x99b   :  { %3373 = vmatmul.mubr.msk.bf16.vlgmr.msra.gmra.mrb[32].mxu1 %vm930_vm2, %v1411_v23  ;;  %v1559_v48 = vpop.permute.xlu1 %1558 }
 0x99c   :  { %v3704_v33 = vpop.eup %3703  ;;  %3384 = vmatprep.mubr.msk.bf16.mxu1 %vm4308_vm0, %v4307_v31 }
 0x99d   :  { %v1410_v42 = vmul.f32 %v3704_v33, %v1390_v6 }
 0x99f   :  { %3383 = vmatpush3.bf16.xpose.msra.mxu1 %v1515_v43  ;;  %v1412_v45 = vpack.c.bf16 %v1410_v42, %v1409_v37 }
 0x9a0   :  { %3394 = vmatprep.subr.bf16.mxu1 %v4307_v31 }
 0x9a1   :  { %3379 = vmatmul.mubr.msk.bf16.vlgmr.msra.gmra.mrb[24].mxu0 %vm930_vm2, %v1412_v45 }
 0x9a2   :  { %3389 = vmatpush3.bf16.xpose.msra.mxu0 %v1566_v46  ;;  %3390 = vmatprep.mubr.msk.bf16.mxu0 %vm4308_vm0, %v4307_v31 }
 0x9a3   :  { %3400 = vmatprep.subr.bf16.mxu0 %v4307_v31 }
 0x9a6   :  { %3385 = vmatmul.mubr.msk.bf16.vlgmr.msra.gmra.mrb[36].mxu1 %vm823_vm1, %v1508_v47 }
 0x9a7   :  { %3396 = vmatprep.mubr.msk.bf16.mxu1 %vm4308_vm0, %v4307_v31 }
 0x9a9   :  { %3391 = vmatmul.mubr.msk.bf16.vlgmr.msra.gmra.mrb[28].mxu0 %vm823_vm1, %v1559_v48 }
 0x9aa   :  { %3402 = vmatprep.mubr.msk.bf16.mxu0 %vm4308_vm0, %v4307_v31 }
 0xa6e   :  { %v1453_v49 = vpop.f32.mrb[32].mxu1 }
 0xa6f   :  { %v3374_v50 = vpop.f32.mrb[33].mxu1 }
 0xa70   :  { %v1456_v51 = vpop.f32.mrb[34].mxu1  ;;  %v3554_v50 = vld [vmem:[#allocation17 + $0x8] sm:$0xff]  }
 0xa71   :  { %v3491_v53 = vpack.i.bf16 %v1456_v51, %v1453_v49  ;;  %v3375_v55 = vpop.f32.mrb[35].mxu1  ;;  %v3553_v49 = vld [vmem:[#allocation17] sm:$0xff]   ;;  %v3555_v51 = vld [vmem:[#allocation17 + $0x10] sm:$0xff]  }
 0xa72   :  { %v3557_v55 = vld [vmem:[#allocation17 + $0x20] sm:$0xff]  }
 0xa74   :  { %v1500_v56 = vpop.f32.mrb[24].mxu0 }
 0xa75   :  { %v3380_v57 = vpop.f32.mrb[25].mxu0 }
 0xa76   :  { %v1503_v58 = vpop.f32.mrb[26].mxu0  ;;  %v3559_v57 = vld [vmem:[#allocation17 + $0x30] sm:$0xff]  }
 0xa77   :  { %v3496_v60 = vpack.i.bf16 %v1503_v58, %v1500_v56  ;;  %v3381_v61 = vpop.f32.mrb[27].mxu0  ;;  %v3558_v56 = vld [vmem:[#allocation17 + $0x28] sm:$0xff]   ;;  %v3560_v58 = vld [vmem:[#allocation17 + $0x38] sm:$0xff]  }
 0xa79   :  { %v1551_v62 = vpop.f32.mrb[36].mxu1 }
 0xa7a   :  { %v1609_v63 = vmul.f32 1.442695, %v1551_v62  ;;  %v3386_v1 = vpop.f32.mrb[37].mxu1 }
 0xa7b   :  { %v1554_v3 = vpop.f32.mrb[38].mxu1 }
 0xa7c   :  { %3705 = vpow2.f32 %v1609_v63  ;;  %v1611_v4 = vmul.f32 1.442695, %v1554_v3  ;;  %v3387_v5 = vpop.f32.mrb[39].mxu1  ;;  %v1602_v6 = vpop.f32.mrb[28].mxu0 }
 0xa7d   :  { %v1613_v7 = vmul.f32 1.442695, %v1602_v6  ;;  %v3392_v11 = vpop.f32.mrb[29].mxu0 }
 0xa7e   :  { %3707 = vpow2.f32 %v1611_v4  ;;  %v1605_v15 = vpop.f32.mrb[30].mxu0 }
 0xa7f   :  { %3709 = vpow2.f32 %v1613_v7  ;;  %v1615_v16 = vmul.f32 1.442695, %v1605_v15  ;;  %v3393_v17 = vpop.f32.mrb[31].mxu0 }
 0xa81   :  { %3711 = vpow2.f32 %v1615_v16 }
 0xa86   :  { %v3706_v54 = vpop.eup %3705 }
 0xa87   :  { %v1617_v10 = vmul.f32 %v3706_v54, %v4783_v27 }
 0xa88   :  { %v3708_v20 = vpop.eup %3707 }
 0xa89   :  { %v3710_v21 = vpop.eup %3709  ;;  %v1621_v9 = vsel %vm930_vm2, %v1617_v10, 0.0  ;;  %v1618_v22 = vmul.f32 %v3708_v20, %v4785_v30 }
 0xa8a   :  { %1622 = vadd.xlane.f32.xlu0 %v1621_v9  ;;  %v1619_v52 = vmul.f32 %v3710_v21, %v4783_v27 }
 0xa8b   :  { %v3712_v23 = vpop.eup %3711  ;;  %v1624_v26 = vsel %vm930_vm2, %v1618_v22, 0.0 }
 0xa8c   :  { %1625 = vadd.xlane.f32.xlu1 %v1624_v26  ;;  %v1627_v33 = vsel %vm930_vm2, %v1619_v52, 0.0  ;;  %v1620_v37 = vmul.f32 %v3712_v23, %v4785_v30 }
 0xa8e   :  { %1628 = vadd.xlane.f32.xlu0 %v1627_v33  ;;  %v1630_v42 = vsel %vm930_vm2, %v1620_v37, 0.0 }
 0xa92   :  { %1631 = vadd.xlane.f32.xlu0 %v1630_v42 }
 0xa9d   :  { %1690 = vrot.lane.b32.xlu1 %v4759_v0, %s4310_s5 }
 0xaa1   :  { %3482 = vrot.lane.b32.xlu1 %v3481_v32, %s4310_s5 }
 0xaa5   :  { %3487 = vrot.lane.b32.xlu1 %v3486_v41, %s4310_s5 }
 0xaa8   :  { %1643 = vrot.lane.b32.xlu0 %v4761_v2, %s4310_s5 }
 0xaa9   :  { %3497 = vrot.lane.b32.xlu1 %v3496_v60, %s5122_s24 }
 0xaac   :  { %3492 = vrot.lane.b32.xlu0 %v3491_v53, %s5122_s24  ;;  %v3556_v53 = vld [vmem:[#allocation17 + $0x18] sm:$0xff]   ;;  %s4311_s24 = smov [#allocation35]  }
 0xaad   :  { %s2985_s13 = sshll.u32 %s4311_s24, 4  ;;  %s2986_s13 = int_to_ptr.vmem [resolvable:$true] %s2985_s13 }
 0xaae   :  { %s4231_s18 = scalar_lea.vmem %s2986_s13, 32  ;;  %p4236_p1 = scmp.lt.s32.totalorder %s2986_s13, %s2986_s13 }
 0xaaf   :  { %p4232_p0 = scmp.ne.s32.totalorder %s2986_s13, %s4231_s18  ;;  %p4237_p2 = scmp.lt.s32.totalorder %s4231_s18, %s4231_s18 }
 0xab1   :  { %p4238_p3 = por %p4237_p2, %p4236_p1 }
 0xab3   :  { %p4239_p4 = pnand %p4238_p3, %p4232_p0 }
 0xb17   :  { %v1623_v27 = vpop.xlane.xlu0 %1622 }
 0xb18   :  { %3713 = vrcp.f32 %v1623_v27 }
 0xb19   :  { %v1626_v0 = vpop.xlane.xlu1 %1625 }
 0xb1a   :  { %3715 = vrcp.f32 %v1626_v0 }
 0xb1b   :  { %v1629_v30 = vpop.xlane.xlu0 %1628 }
 0xb1c   :  { %3717 = vrcp.f32 %v1629_v30 }
 0xb1d   :  { %v1691_v43 = vpop.permute.xlu1 %1690 }
 0xb1e   :  { %3401 = vmatpush3.bf16.msra.mxu0 %v1691_v43 }
 0xb1f   :  { %v1632_v25 = vpop.xlane.xlu0 %1631 }
 0xb20   :  { %3719 = vrcp.f32 %v1632_v25 }
 0xb21   :  { %v3483_v11 = vpop.permute.xlu1 %3482 }
 0xb22   :  { %v3714_v28 = vpop.eup %3713  ;;  %v3485_v17 = vunpack.i.h.bf16 %v3483_v11  ;;  %v3484_v54 = vunpack.i.l.bf16 %v3483_v11 }
 0xb23   :  { %v1644_v32 = vpop.permute.xlu0 %1643  ;;  %v1637_v39 = vmul.f32 %v3714_v28, %v1617_v10 }
 0xb24   :  { %v3716_v34 = vpop.eup %3715  ;;  %3395 = vmatpush3.bf16.msra.mxu1 %v1644_v32  ;;  %v1786_v9 = vsel %vm823_vm1, %v4821_v13, %v3485_v17 }
 0xb25   :  { %v1638_v2 = vmul.f32 %v3716_v34, %v1618_v22  ;;  %3406 = vmatprep.subr.bf16.mxu1 %v3553_v49  ;;  %v3488_v15 = vpop.permute.xlu1 %3487  ;;  %v1785_v22 = vsel %vm823_vm1, %v4819_v8, %v3484_v54 }
 0xb26   :  { %v3718_v44 = vpop.eup %3717  ;;  %v3490_v42 = vunpack.i.h.bf16 %v3488_v15  ;;  %v3489_v27 = vunpack.i.l.bf16 %v3488_v15 }
 0xb27   :  { %v1641_v41 = vpack.c.bf16 %v1638_v2, %v1637_v39  ;;  %v1639_v46 = vmul.f32 %v3718_v44, %v1619_v52  ;;  %v3493_v16 = vpop.permute.xlu0 %3492 }
 0xb28   :  { %v3495_v10 = vunpack.i.h.bf16 %v3493_v16  ;;  %v3494_v20 = vunpack.i.l.bf16 %v3493_v16  ;;  %v1788_v8 = vsel %vm823_vm1, %v4825_v29, %v3490_v42  ;;  %v1787_v32 = vsel %vm823_vm1, %v4823_v24, %v3489_v27  ;;  %v3581_v42 = vld [vmem:[#allocation23 + $0x64] ss:$16 sps:$4 sm:$0xff]   ;;  %v3584_v27 = vld [vmem:[#allocation23 + $0x6c] ss:$16 sps:$4 sm:$0xff]  }
 0xb29   :  { %3397 = vmatmul.mubr.msk.bf16.vlgmr.msra.gmra.mrb[40].mxu1 %vm930_vm2, %v1641_v41  ;;  %v3498_v52 = vpop.permute.xlu1 %3497 }
 0xb2a   :  { %v3720_v45 = vpop.eup %3719  ;;  %3407 = vmatpush3.bf16.msra.mxu1 %v3553_v49  ;;  %v1790_v33 = vsel %vm1789_vm3, %v1785_v22, %v3494_v20  ;;  %v3500_v43 = vunpack.i.h.bf16 %v3498_v52  ;;  %v3499_v25 = vunpack.i.l.bf16 %v3498_v52 }
 0xb2b   :  { %v1640_v47 = vmul.f32 %v3720_v45, %v1620_v37  ;;  %3408 = vmatprep.subr.bf16.mxu1 %v3554_v50  ;;  %v1791_v37 = vsel %vm1789_vm3, %v1786_v9, %v3495_v10 }
 0xb2c   :  { %v1792_v2 = vsel %vm1789_vm3, %v1787_v32, %v3499_v25  ;;  %v1793_v41 = vsel %vm1789_vm3, %v1788_v8, %v3500_v43  ;;  %v3587_v43 = vld [vmem:[#allocation23 + $0x84] ss:$16 sps:$4 sm:$0xff]   ;;  %v3590_v25 = vld [vmem:[#allocation23 + $0x8c] ss:$16 sps:$4 sm:$0xff]  }
 0xb2d   :  { %v1642_v48 = vpack.c.bf16 %v1640_v47, %v1639_v46  ;;  %v3593_v8 = vld [vmem:[#allocation23 + $0xa4] ss:$16 sps:$4 sm:$0xff]   ;;  %v3596_v32 = vld [vmem:[#allocation23 + $0xac] ss:$16 sps:$4 sm:$0xff]  }
 0xb2e   :  { %3409 = vmatpush3.bf16.msra.mxu1 %v3554_v50 }
 0xb2f   :  { %3403 = vmatmul.mubr.msk.bf16.vlgmr.msra.gmra.mrb[32].mxu0 %vm930_vm2, %v1642_v48  ;;  %3410 = vmatprep.subr.bf16.mxu1 %v3555_v51  ;;  %v3064_v48 = vld [vmem:[#allocation19] ss:$0 sm:$0xff] }
 0xb30   :  { %2243 = vmatprep.mubr.bf16.mxu0 %v4306_v59 }
 0xb32   :  { %3411 = vmatpush3.bf16.msra.mxu1 %v3555_v51 }
 0xb33   :  { %3412 = vmatprep.subr.bf16.mxu1 %v3556_v53 }
 0xb36   :  { %3413 = vmatpush3.bf16.msra.mxu1 %v3556_v53 }
 0xb37   :  { %3414 = vmatprep.subr.bf16.mxu1 %v3557_v55 }
 0xb3a   :  { %3415 = vmatpush3.bf16.msra.mxu1 %v3557_v55 }
 0xb3b   :  { %3416 = vmatprep.subr.bf16.mxu1 %v3558_v56 }
 0xb3e   :  { %3417 = vmatpush3.bf16.msra.mxu1 %v3558_v56 }
 0xb3f   :  { %3418 = vmatprep.subr.bf16.mxu1 %v3559_v57 }
 0xb42   :  { %3419 = vmatpush3.bf16.msra.mxu1 %v3559_v57 }
 0xb43   :  { %3420 = vmatprep.subr.bf16.mxu1 %v3560_v58 }
 0xb46   :  { %3421 = vmatpush3.bf16.msra.mxu1 %v3560_v58 }
 0xbfc   :  { %v1683_v60 = vpop.f32.mrb[40].mxu1 }
 0xbfd   :  { %v3398_v61 = vpop.f32.mrb[41].mxu1 }
 0xbfe   :  { %v1686_v62 = vpop.f32.mrb[42].mxu1  ;;  %v3564_v61 = vld [vmem:[#allocation23 + $0x8] ss:$16 sps:$4 sm:$0xff]  }
 0xbff   :  { %v3501_v63 = vpack.i.bf16 %v1686_v62, %v1683_v60  ;;  %v3399_v1 = vpop.f32.mrb[43].mxu1  ;;  %v3563_v60 = vld [vmem:[#allocation23 + $0x4] ss:$16 sps:$4 sm:$0xff]  }
 0xc00   :  { %v3569_v62 = vld [vmem:[#allocation23 + $0x24] ss:$16 sps:$4 sm:$0xff]   ;;  %2211 = vmatprep.subr.bf16.mxu0 %v3563_v60  ;;  %v3567_v1 = vld [vmem:[#allocation23 + $0x20] ss:$16 sps:$4 sm:$0xff]  }
 0xc01   :  { %3502 = vrot.lane.b32.xlu0 %v3501_v63, %s4309_s14  ;;  %v3572_v63 = vld [vmem:[#allocation23 + $0x2c] ss:$16 sps:$4 sm:$0xff]  }
 0xc02   :  { %v1730_v3 = vpop.f32.mrb[32].mxu0 }
 0xc03   :  { %v3404_v4 = vpop.f32.mrb[33].mxu0 }
 0xc04   :  { %v1733_v5 = vpop.f32.mrb[34].mxu0 }
 0xc05   :  { %v3506_v6 = vpack.i.bf16 %v1733_v5, %v1730_v3  ;;  %v3405_v7 = vpop.f32.mrb[35].mxu0 }
 0xc07   :  { %3507 = vrot.lane.b32.xlu1 %v3506_v6, %s4309_s14 }
 0xc73   :  { %v3503_v21 = vpop.permute.xlu0 %3502 }
 0xc74   :  { %v3505_v23 = vunpack.i.h.bf16 %v3503_v21  ;;  %v3504_v26 = vunpack.i.l.bf16 %v3503_v21 }
 0xc76   :  { %v1795_v0 = vsel %vm1794_vm4, %v1790_v33, %v3504_v26  ;;  %v1796_v30 = vsel %vm1794_vm4, %v1791_v37, %v3505_v23  ;;  %v3575_v23 = vld [vmem:[#allocation23 + $0x44] ss:$16 sps:$4 sm:$0xff]   ;;  %v3578_v26 = vld [vmem:[#allocation23 + $0x4c] ss:$16 sps:$4 sm:$0xff]   ;;  %v3573_v33 = vld [vmem:[#allocation23 + $0x40] ss:$16 sps:$4 sm:$0xff]  }
 0xc77   :  { %v1799_v28 = vpack.c.bf16 %v1796_v30, %v1795_v0  ;;  %v3576_v37 = vld [vmem:[#allocation23 + $0x48] ss:$16 sps:$4 sm:$0xff]   ;;  %v3579_v0 = vld [vmem:[#allocation23 + $0x60] ss:$16 sps:$4 sm:$0xff]  }
 0xc78   :  { %v3582_v30 = vld [vmem:[#allocation23 + $0x68] ss:$16 sps:$4 sm:$0xff]  }
 0xc79   :  { %v3508_v13 = vpop.permute.xlu1 %3507  ;;  %3422 = vmatprep.mubr.bf16.mxu1 %v1799_v28  ;;  %v3585_v28 = vld [vmem:[#allocation23 + $0x80] ss:$16 sps:$4 sm:$0xff]  }
 0xc7a   :  { %v3510_v34 = vunpack.i.h.bf16 %v3508_v13  ;;  %v3509_v39 = vunpack.i.l.bf16 %v3508_v13  ;;  %v3588_v13 = vld [vmem:[#allocation23 + $0x88] ss:$16 sps:$4 sm:$0xff]  }
 0xc7c   :  { %v1797_v44 = vsel %vm1794_vm4, %v1792_v2, %v3509_v39  ;;  %v1798_v45 = vsel %vm1794_vm4, %v1793_v41, %v3510_v34  ;;  %v3591_v34 = vld [vmem:[#allocation23 + $0xa0] ss:$16 sps:$4 sm:$0xff]   ;;  %v3594_v39 = vld [vmem:[#allocation23 + $0xa8] ss:$16 sps:$4 sm:$0xff]   ;;  %v3599_v2 = vld [vmem:[#allocation23 + $0xc4] ss:$16 sps:$4 sm:$0xff]  }
 0xc7d   :  { %v1800_v46 = vpack.c.bf16 %v1798_v45, %v1797_v44  ;;  %v3602_v41 = vld [vmem:[#allocation23 + $0xcc] ss:$16 sps:$4 sm:$0xff]   ;;  %v3597_v44 = vld [vmem:[#allocation23 + $0xc0] ss:$16 sps:$4 sm:$0xff]   ;;  %v3600_v45 = vld [vmem:[#allocation23 + $0xc8] ss:$16 sps:$4 sm:$0xff]  }
 0xc7f   :  { %3423 = vmatmul.mubr.bf16.vlgmr.msra.gmra.mrb[44].mxu1 %v1800_v46  ;;  %v3605_v46 = vld [vmem:[#allocation23 + $0xe4] ss:$16 sps:$4 sm:$0xff]  }
 0xc80   :  { %2296 = vmatprep.mubr.bf16.mxu1 %v4306_v59 }
 0xd52   :  { %v3424_v47 = vpop.f32.mrb[44].mxu1 }
 0xd53   :  { %v1899_v29 = vpop.f32.mrb[45].mxu1  ;;  %v1916_v51 = vadd.f32 %v3424_v47, %v4698_v12  ;;  %v3561_v12 = vld [vmem:[#allocation23] ss:$16 sps:$4 sm:$0xff]   ;;  %v3608_v47 = vld [vmem:[#allocation23 + $0xec] ss:$16 sps:$4 sm:$0xff]  }
 0xd54   :  { %v1914_v49 = vadd.f32 %v1899_v29, %v4700_v14  ;;  %v3425_v24 = vpop.f32.mrb[46].mxu1  ;;  %2212 = vmatpush1.bf16.msra.mxu0 %v3561_v12  ;;  %v3606_v29 = vld [vmem:[#allocation23 + $0xe8] ss:$16 sps:$4 sm:$0xff]  }
 0xd55   :  { %v1902_v50 = vpop.f32.mrb[47].mxu1  ;;  %v4967_v57 = vadd.f32 %v3064_v48, %v1916_v51  ;;  %v1917_v58 = vadd.f32 %v3425_v24, %v4704_v18  ;;  %2213 = vmatprep.subr.bf16.mxu0 %v3569_v62  ;;  %v3570_v18 = vld [vmem:[#allocation23 + $0x28] ss:$16 sps:$4 sm:$0xff]  }
 0xd56   :  { %v4961_v53 = vadd.f32 %v3064_v48, %v1914_v49  ;;  %v1915_v55 = vadd.f32 %v1902_v50, %v4706_v19  ;;  %v3566_v19 = vld [vmem:[#allocation23 + $0xc] ss:$16 sps:$4 sm:$0xff]   ;;  %v3609_v49 = vld [vmem:[#allocation26 + $0x40] sm:$0xff]  }
 0xd57   :  { %v4972_v14 = vadd.f32 %v3064_v48, %v1917_v58  ;;  %2264 = vmatprep.subr.bf16.mxu1 %v3566_v19  ;;  %v3610_v24 = vld [vmem:[#allocation26 + $0xc0] sm:$0xff]  }
 0xd58   :  { %v4964_v56 = vadd.f32 %v3064_v48, %v1915_v55  ;;  %1931 = vadd.xlane.f32.xlu0 %v4961_v53  ;;  %2265 = vmatpush1.bf16.msra.mxu1 %v3564_v61  ;;  %v3603_v48 = vld [vmem:[#allocation23 + $0xe0] ss:$16 sps:$4 sm:$0xff]  }
 0xd59   :  { %2266 = vmatprep.subr.bf16.mxu1 %v3572_v63  ;;  %2214 = vmatpush1.bf16.msra.mxu0 %v3567_v1 }
 0xd5a   :  { %1933 = vadd.xlane.f32.xlu1 %v4964_v56  ;;  %2215 = vmatprep.subr.bf16.mxu0 %v3575_v23 }
 0xd5c   :  { %1935 = vadd.xlane.f32.xlu0 %v4967_v57  ;;  %2267 = vmatpush1.bf16.msra.mxu1 %v3570_v18 }
 0xd5d   :  { %2268 = vmatprep.subr.bf16.mxu1 %v3578_v26  ;;  %2216 = vmatpush1.bf16.msra.mxu0 %v3573_v33 }
 0xd5e   :  { %2217 = vmatprep.subr.bf16.mxu0 %v3581_v42  ;;  %v3612_v42 = vld [vmem:[#allocation26 + $0x80] sm:$0xff]  }
 0xd60   :  { %1937 = vadd.xlane.f32.xlu0 %v4972_v14  ;;  %2269 = vmatpush1.bf16.msra.mxu1 %v3576_v37  ;;  %v3611_v37 = vld [vmem:[#allocation26] sm:$0xff]  }
 0xd61   :  { %2270 = vmatprep.subr.bf16.mxu1 %v3584_v27  ;;  %2218 = vmatpush1.bf16.msra.mxu0 %v3579_v0  ;;  %v3613_v27 = vld [vmem:[#allocation26 + $0x48] sm:$0xff]  }
 0xd62   :  { %2219 = vmatprep.subr.bf16.mxu0 %v3587_v43  ;;  %v3614_v0 = vld [vmem:[#allocation26 + $0xc8] sm:$0xff]  }
 0xd63   :  { %v3616_v43 = vld [vmem:[#allocation26 + $0x88] sm:$0xff]  }
 0xd64   :  { %2271 = vmatpush1.bf16.msra.mxu1 %v3582_v30 }
 0xd65   :  { %2272 = vmatprep.subr.bf16.mxu1 %v3590_v25  ;;  %2220 = vmatpush1.bf16.msra.mxu0 %v3585_v28  ;;  %v3617_v28 = vld [vmem:[#allocation26 + $0x50] sm:$0xff]  }
 0xd66   :  { %2221 = vmatprep.subr.bf16.mxu0 %v3593_v8  ;;  %v3619_v8 = vld [vmem:[#allocation26 + $0x10] sm:$0xff]  }
 0xd68   :  { %2273 = vmatpush1.bf16.msra.mxu1 %v3588_v13  ;;  %v3618_v13 = vld [vmem:[#allocation26 + $0xd0] sm:$0xff]  }
 0xd69   :  { %2274 = vmatprep.subr.bf16.mxu1 %v3596_v32  ;;  %2222 = vmatpush1.bf16.msra.mxu0 %v3591_v34  ;;  %v3620_v32 = vld [vmem:[#allocation26 + $0x90] sm:$0xff]   ;;  %v3622_v34 = vld [vmem:[#allocation26 + $0xd8] sm:$0xff]  }
 0xd6a   :  { %2223 = vmatprep.subr.bf16.mxu0 %v3599_v2  ;;  %v3624_v2 = vld [vmem:[#allocation26 + $0x98] sm:$0xff]  }
 0xd6c   :  { %2275 = vmatpush1.bf16.msra.mxu1 %v3594_v39  ;;  %v3623_v39 = vld [vmem:[#allocation26 + $0x18] sm:$0xff]  }
 0xd6d   :  { %2276 = vmatprep.subr.bf16.mxu1 %v3602_v41  ;;  %2224 = vmatpush1.bf16.msra.mxu0 %v3597_v44  ;;  %v3625_v41 = vld [vmem:[#allocation26 + $0x60] sm:$0xff]  }
 0xd6e   :  { %2225 = vmatprep.subr.bf16.mxu0 %v3605_v46  ;;  %v3626_v44 = vld [vmem:[#allocation26 + $0xe0] sm:$0xff]  }
 0xd6f   :  { %v3628_v46 = vld [vmem:[#allocation26 + $0xa0] sm:$0xff]  }
 0xd70   :  { %2277 = vmatpush1.bf16.msra.mxu1 %v3600_v45  ;;  %v3627_v45 = vld [vmem:[#allocation26 + $0x20] sm:$0xff]  }
 0xd71   :  { %2278 = vmatprep.subr.bf16.mxu1 %v3608_v47  ;;  %2226 = vmatpush1.bf16.msra.mxu0 %v3603_v48  ;;  %v3629_v47 = vld [vmem:[#allocation26 + $0x68] sm:$0xff]  }
 0xd72   :  { %3205 = vmatprep.subr.bf16.mxu0 %v3609_v49  ;;  %v3630_v48 = vld [vmem:[#allocation26 + $0xe8] sm:$0xff]  }
 0xd73   :  { %v3632_v49 = vld [vmem:[#allocation26 + $0xa8] sm:$0xff]  }
 0xd74   :  { %2279 = vmatpush1.bf16.msra.mxu1 %v3606_v29  ;;  %v3631_v29 = vld [vmem:[#allocation26 + $0x28] sm:$0xff]  }
 0xd75   :  { %3233 = vmatprep.subr.bf16.mxu1 %v3610_v24  ;;  %v3633_v24 = vld [vmem:[#allocation26 + $0x70] sm:$0xff]  }
 0xde5   :  { %v1932_v3 = vpop.xlane.xlu0 %1931 }
 0xde6   :  { %v1939_v4 = vmul.f32 0.0078125, %v1932_v3 }
 0xde7   :  { %v1934_v5 = vpop.xlane.xlu1 %1933 }
 0xde8   :  { %v4976_v6 = vsub.f32 %v4961_v53, %v1939_v4  ;;  %v1940_v7 = vmul.f32 0.0078125, %v1934_v5  ;;  %v3065_v4 = vld [vmem:[#allocation20] ss:$0 sm:$0xff] }
 0xde9   :  { %v1936_v11 = vpop.xlane.xlu0 %1935 }
 0xdea   :  { %v4979_v15 = vsub.f32 %v4964_v56, %v1940_v7  ;;  %v1941_v16 = vmul.f32 0.0078125, %v1936_v11  ;;  %v1947_v17 = vmul.f32 %v4976_v6, %v4976_v6 }
 0xdec   :  { %v4984_v54 = vsub.f32 %v4967_v57, %v1941_v16  ;;  %1951 = vadd.xlane.f32.xlu0 %v1947_v17  ;;  %v1948_v10 = vmul.f32 %v4979_v15, %v4979_v15 }
 0xded   :  { %v1938_v20 = vpop.xlane.xlu0 %1937 }
 0xdee   :  { %v1942_v21 = vmul.f32 0.0078125, %v1938_v20  ;;  %1953 = vadd.xlane.f32.xlu1 %v1948_v10  ;;  %v1949_v9 = vmul.f32 %v4984_v54, %v4984_v54  ;;  %v3066_v10 = vld [vmem:[#allocation22] ss:$0 sm:$0xff] }
 0xdf0   :  { %v4991_v22 = vsub.f32 %v4972_v14, %v1942_v21  ;;  %1955 = vadd.xlane.f32.xlu0 %v1949_v9 }
 0xdf2   :  { %v1950_v52 = vmul.f32 %v4991_v22, %v4991_v22 }
 0xdf4   :  { %1957 = vadd.xlane.f32.xlu1 %v1950_v52 }
 0xe79   :  { %v1952_v50 = vpop.xlane.xlu0 %1951 }
 0xe7a   :  { %v1959_v51 = vmul.f32 0.0078125, %v1952_v50  ;;  %v3634_v50 = vld [vmem:[#allocation26 + $0xf0] sm:$0xff]  }
 0xe7b   :  { %v1954_v55 = vpop.xlane.xlu1 %1953 }
 0xe7c   :  { %v1963_v58 = vadd.f32 1e-06, %v1959_v51  ;;  %v1960_v12 = vmul.f32 0.0078125, %v1954_v55  ;;  %v3635_v51 = vld [vmem:[#allocation26 + $0x30] sm:$0xff]  }
 0xe7d   :  { %v1956_v60 = vpop.xlane.xlu0 %1955  ;;  %v3636_v55 = vld [vmem:[#allocation26 + $0xb0] sm:$0xff]  }
 0xe7e   :  { %3721 = vrsqrt.f32 %v1963_v58  ;;  %v1964_v61 = vadd.f32 1e-06, %v1960_v12  ;;  %v1961_v19 = vmul.f32 0.0078125, %v1956_v60  ;;  %v3637_v58 = vld [vmem:[#allocation26 + $0x78] sm:$0xff]  }
 0xe7f   :  { %v3638_v12 = vld [vmem:[#allocation26 + $0xf8] sm:$0xff]  }
 0xe80   :  { %3723 = vrsqrt.f32 %v1964_v61  ;;  %v1965_v62 = vadd.f32 1e-06, %v1961_v19  ;;  %v3639_v60 = vld [vmem:[#allocation26 + $0x38] sm:$0xff]  }
 0xe81   :  { %v1958_v63 = vpop.xlane.xlu1 %1957  ;;  %v3640_v61 = vld [vmem:[#allocation26 + $0xb8] sm:$0xff]  }
 0xe82   :  { %3725 = vrsqrt.f32 %v1965_v62  ;;  %v1962_v1 = vmul.f32 0.0078125, %v1958_v63  ;;  %v2029_v19 = vld [vmem:[#allocation25] sm:$0xf]  ;;  %v2045_v62 = vsub.s32 3, %v4742_v35 }
 0xe83   :  { %v2034_v63 = vrot.slane %v2029_v19, %v572_v36 }
 0xe84   :  { %v1966_v18 = vadd.f32 1e-06, %v1962_v1  ;;  %v2042_v1 = vrot.slane %v2029_v19, %v580_v40 }
 0xe86   :  { %3727 = vrsqrt.f32 %v1966_v18  ;;  %v2038_v18 = vrot.slane %v2029_v19, %v576_v38 }
 0xe88   :  { %v3722_v3 = vpop.eup %3721 }
 0xe89   :  { %v1971_v5 = vmul.f32 %v3722_v3, %v4976_v6  ;;  %v2046_v3 = vrot.slane %v2029_v19, %v2045_v62 }
 0xe8a   :  { %v3724_v7 = vpop.eup %3723 }
 0xe8b   :  { %v1972_v11 = vmul.f32 %v3724_v7, %v4979_v15  ;;  %v1981_v16 = vmul.f32 %v3065_v4, %v1971_v5 }
 0xe8c   :  { %v3726_v17 = vpop.eup %3725 }
 0xe8d   :  { %v1982_v20 = vmul.f32 %v3065_v4, %v1972_v11  ;;  %v1991_v21 = vadd.f32 %v3066_v10, %v1981_v16  ;;  %v1973_v52 = vmul.f32 %v3726_v17, %v4984_v54  ;;  %v3615_v54 = vld [vmem:[#allocation26 + $0x8] sm:$0xff]  }
 0xe8f   :  { %v1992_v9 = vadd.f32 %v3066_v10, %v1982_v20  ;;  %v1983_v6 = vmul.f32 %v3065_v4, %v1973_v52 }
 0xe90   :  { %v3728_v23 = vpop.eup %3727 }
 0xe91   :  { %v1995_v26 = vpack.c.bf16 %v1992_v9, %v1991_v21  ;;  %v1974_v33 = vmul.f32 %v3728_v23, %v4991_v22  ;;  %v1993_v22 = vadd.f32 %v3066_v10, %v1983_v6 }
 0xe93   :  { %2244 = vmatmul.mubr.bf16.vlgmr.msra.gmra.mrb[36].mxu0 %v1995_v26  ;;  %2297 = vmatmul.mubr.bf16.vlgmr.msra.gmra.mrb[48].mxu1 %v1995_v26  ;;  %v1984_v15 = vmul.f32 %v3065_v4, %v1974_v33 }
 0xe94   :  { %2253 = vmatprep.mubr.bf16.mxu0 %v4306_v59  ;;  %2306 = vmatprep.mubr.bf16.mxu1 %v4306_v59  ;;  %v3621_v59 = vld [vmem:[#allocation26 + $0x58] sm:$0xff]  }
 0xe95   :  { %v1994_v30 = vadd.f32 %v3066_v10, %v1984_v15  ;;  %3206 = vmatpush3.bf16.msra.mxu0 %v3611_v37  ;;  %3234 = vmatpush3.bf16.msra.mxu1 %v3612_v42 }
 0xe96   :  { %3207 = vmatprep.subr.bf16.mxu0 %v3613_v27  ;;  %3235 = vmatprep.subr.bf16.mxu1 %v3614_v0 }
 0xe97   :  { %v1996_v25 = vpack.c.bf16 %v1994_v30, %v1993_v22 }
 0xe99   :  { %3208 = vmatpush3.bf16.msra.mxu0 %v3615_v54  ;;  %3236 = vmatpush3.bf16.msra.mxu1 %v3616_v43 }
 0xe9a   :  { %3209 = vmatprep.subr.bf16.mxu0 %v3617_v28  ;;  %3237 = vmatprep.subr.bf16.mxu1 %v3618_v13 }
 0xe9b   :  { %2254 = vmatmul.mubr.bf16.gmra.mrb[40].mxu0 %v1996_v25  ;;  %2307 = vmatmul.mubr.bf16.gmra.mrb[52].mxu1 %v1996_v25 }
 0xe9d   :  { %3210 = vmatpush3.bf16.msra.mxu0 %v3619_v8  ;;  %3238 = vmatpush3.bf16.msra.mxu1 %v3620_v32 }
 0xe9e   :  { %3211 = vmatprep.subr.bf16.mxu0 %v3621_v59  ;;  %3239 = vmatprep.subr.bf16.mxu1 %v3622_v34 }
 0xea1   :  { %3212 = vmatpush3.bf16.msra.mxu0 %v3623_v39  ;;  %3240 = vmatpush3.bf16.msra.mxu1 %v3624_v2 }
 0xea2   :  { %3213 = vmatprep.subr.bf16.mxu0 %v3625_v41  ;;  %3241 = vmatprep.subr.bf16.mxu1 %v3626_v44 }
 0xea5   :  { %3214 = vmatpush3.bf16.msra.mxu0 %v3627_v45  ;;  %3242 = vmatpush3.bf16.msra.mxu1 %v3628_v46 }
 0xea6   :  { %3215 = vmatprep.subr.bf16.mxu0 %v3629_v47  ;;  %3243 = vmatprep.subr.bf16.mxu1 %v3630_v48 }
 0xea9   :  { %3216 = vmatpush3.bf16.msra.mxu0 %v3631_v29  ;;  %3244 = vmatpush3.bf16.msra.mxu1 %v3632_v49 }
 0xeaa   :  { %3217 = vmatprep.subr.bf16.mxu0 %v3633_v24  ;;  %3245 = vmatprep.subr.bf16.mxu1 %v3634_v50 }
 0xead   :  { %3218 = vmatpush3.bf16.msra.mxu0 %v3635_v51  ;;  %3246 = vmatpush3.bf16.msra.mxu1 %v3636_v55 }
 0xeae   :  { %3219 = vmatprep.subr.bf16.mxu0 %v3637_v58  ;;  %3247 = vmatprep.subr.bf16.mxu1 %v3638_v12 }
 0xeb1   :  { %3220 = vmatpush3.bf16.msra.mxu0 %v3639_v60  ;;  %3248 = vmatpush3.bf16.msra.mxu1 %v3640_v61 }
 0xeb2   :  { %3426 = vmatprep.subr.bf16.mxu0 %v4307_v31 }
 0xf66   :  { %v2245_v4 = vpop.f32.mrb[36].mxu0  ;;  %v2298_v5 = vpop.f32.mrb[48].mxu1 }
 0xf67   :  { %v2246_v7 = vadd.f32 %v2245_v4, %v2034_v63  ;;  %v2299_v11 = vadd.f32 %v2298_v5, %v2042_v1  ;;  %v2247_v16 = vpop.f32.mrb[37].mxu0  ;;  %v2300_v17 = vpop.f32.mrb[49].mxu1 }
 0xf68   :  { %v2248_v10 = vadd.f32 %v2247_v16, %v2038_v18  ;;  %v2301_v20 = vadd.f32 %v2300_v17, %v2046_v3  ;;  %v2249_v21 = vpop.f32.mrb[38].mxu0  ;;  %v2302_v9 = vpop.f32.mrb[50].mxu1 }
 0xf69   :  { %v2333_v52 = vmul.f32 0.70710677, %v2246_v7  ;;  %v2335_v23 = vmul.f32 0.70710677, %v2299_v11  ;;  %v2250_v40 = vadd.f32 %v2249_v21, %v2034_v63  ;;  %v5009_v33 = vadd.f32 %v2302_v9, %v2042_v1  ;;  %v2251_v35 = vpop.f32.mrb[39].mxu0  ;;  %v2304_v38 = vpop.f32.mrb[51].mxu1 }
 0xf6a   :  { %v2334_v36 = vmul.f32 0.70710677, %v2248_v10  ;;  %v2336_v26 = vmul.f32 0.70710677, %v2301_v20  ;;  %v2252_v37 = vadd.f32 %v2251_v35, %v2038_v18  ;;  %v5011_v42 = vadd.f32 %v2304_v38, %v2046_v3 }
 0xf6b   :  { %3729 = verf.f32 %v2333_v52  ;;  %v2337_v27 = vmul.f32 0.70710677, %v2250_v40  ;;  %v2339_v0 = vmul.f32 0.70710677, %v5009_v33  ;;  %v2317_v55 = vmul.f32 0.5, %v2246_v7 }
 0xf6c   :  { %3731 = verf.f32 %v2335_v23  ;;  %v2338_v6 = vmul.f32 0.70710677, %v2252_v37  ;;  %v2340_v30 = vmul.f32 0.70710677, %v5011_v42  ;;  %v2319_v58 = vmul.f32 0.5, %v2299_v11 }
 0xf6d   :  { %3733 = verf.f32 %v2334_v36  ;;  %v2318_v19 = vmul.f32 0.5, %v2248_v10  ;;  %v2321_v4 = vmul.f32 0.5, %v2250_v40  ;;  %v2323_v21 = vmul.f32 0.5, %v5009_v33 }
 0xf6e   :  { %3735 = verf.f32 %v2336_v26  ;;  %v2255_v15 = vpop.f32.mrb[40].mxu0  ;;  %v2308_v43 = vpop.f32.mrb[52].mxu1  ;;  %v2322_v10 = vmul.f32 0.5, %v2252_v37  ;;  %v2324_v35 = vmul.f32 0.5, %v5011_v42 }
 0xf6f   :  { %3737 = verf.f32 %v2337_v27  ;;  %v5015_v54 = vadd.f32 %v2255_v15, %v2034_v63  ;;  %v2257_v22 = vpop.f32.mrb[41].mxu0  ;;  %v5017_v25 = vadd.f32 %v2308_v43, %v2042_v1  ;;  %v2310_v13 = vpop.f32.mrb[53].mxu1 }
 0xf70   :  { %3739 = verf.f32 %v2339_v0  ;;  %v5019_v28 = vadd.f32 %v2257_v22, %v2038_v18  ;;  %v2259_v8 = vpop.f32.mrb[42].mxu0  ;;  %v5022_v59 = vadd.f32 %v2310_v13, %v2046_v3  ;;  %v2312_v34 = vpop.f32.mrb[54].mxu1 }
 0xf71   :  { %3741 = verf.f32 %v2338_v6  ;;  %v2341_v32 = vmul.f32 0.70710677, %v5015_v54  ;;  %v2261_v39 = vpop.f32.mrb[43].mxu0  ;;  %v2343_v2 = vmul.f32 0.70710677, %v5017_v25  ;;  %v2314_v41 = vpop.f32.mrb[55].mxu1  ;;  %v2260_v46 = vadd.f32 %v2259_v8, %v2034_v63 }
 0xf72   :  { %3743 = verf.f32 %v2340_v30  ;;  %v2342_v44 = vmul.f32 0.70710677, %v5019_v28  ;;  %v2344_v45 = vmul.f32 0.70710677, %v5022_v59  ;;  %v5027_v47 = vadd.f32 %v2312_v34, %v2042_v1 }
 0xf73   :  { %3745 = verf.f32 %v2341_v32  ;;  %v5029_v48 = vadd.f32 %v2261_v39, %v2038_v18  ;;  %v2345_v24 = vmul.f32 0.70710677, %v2260_v46  ;;  %v5031_v50 = vadd.f32 %v2314_v41, %v2046_v3 }
 0xf74   :  { %3747 = verf.f32 %v2343_v2  ;;  %v2347_v12 = vmul.f32 0.70710677, %v5027_v47  ;;  %v2320_v18 = vmul.f32 0.5, %v2301_v20  ;;  %v2325_v2 = vmul.f32 0.5, %v5015_v54 }
 0xf75   :  { %v3730_v29 = vpop.eup %3729  ;;  %3749 = verf.f32 %v2342_v44  ;;  %v2346_v62 = vmul.f32 0.70710677, %v5029_v48  ;;  %v2348_v7 = vmul.f32 0.70710677, %v5031_v50  ;;  %v2327_v44 = vmul.f32 0.5, %v5017_v25 }
 0xf76   :  { %v3732_v49 = vpop.eup %3731  ;;  %3751 = verf.f32 %v2344_v45  ;;  %v2365_v61 = vadd.f32 1.0, %v3730_v29  ;;  %v2329_v29 = vmul.f32 0.5, %v2260_v46  ;;  %v2328_v46 = vmul.f32 0.5, %v5022_v59 }
 0xf77   :  { %v3734_v51 = vpop.eup %3733  ;;  %3753 = verf.f32 %v2345_v24  ;;  %v2367_v1 = vadd.f32 1.0, %v3732_v49 }
 0xf78   :  { %v3736_v60 = vpop.eup %3735  ;;  %3755 = verf.f32 %v2347_v12  ;;  %v2366_v3 = vadd.f32 1.0, %v3734_v51  ;;  %v2381_v23 = vmul.f32 %v2365_v61, %v2317_v55  ;;  %v2326_v51 = vmul.f32 0.5, %v5019_v28 }
 0xf79   :  { %v3738_v63 = vpop.eup %3737  ;;  %3757 = verf.f32 %v2346_v62  ;;  %v2368_v17 = vadd.f32 1.0, %v3736_v60  ;;  %v2383_v20 = vmul.f32 %v2367_v1, %v2319_v58  ;;  %v2331_v55 = vmul.f32 0.5, %v5027_v47 }
 0xf7a   :  { %v3740_v5 = vpop.eup %3739  ;;  %v2369_v16 = vadd.f32 1.0, %v3738_v63  ;;  %3759 = verf.f32 %v2348_v7  ;;  %v2382_v0 = vmul.f32 %v2366_v3, %v2318_v19  ;;  %v2330_v12 = vmul.f32 0.5, %v5029_v48 }
 0xf7b   :  { %v3742_v11 = vpop.eup %3741  ;;  %v2371_v9 = vadd.f32 1.0, %v3740_v5  ;;  %v2384_v43 = vmul.f32 %v2368_v17, %v2320_v18  ;;  %v2332_v1 = vmul.f32 0.5, %v5031_v50  ;;  %v3099_v17 = vld [vmem:[#allocation28] ss:$0 sm:$0xff] }
 0xf7c   :  { %v3744_v52 = vpop.eup %3743  ;;  %v2385_v36 = vmul.f32 %v2369_v16, %v2321_v4  ;;  %v2370_v26 = vadd.f32 1.0, %v3742_v11 }
 0xf7d   :  { %v2387_v40 = vmul.f32 %v2371_v9, %v2323_v21  ;;  %v2372_v38 = vadd.f32 1.0, %v3744_v52  ;;  %v3746_v27 = vpop.eup %3745 }
 0xf7e   :  { %v2397_v6 = vpack.c.bf16 %v2385_v36, %v2381_v23  ;;  %v2386_v15 = vmul.f32 %v2370_v26, %v2322_v10  ;;  %v3748_v30 = vpop.eup %3747  ;;  %v2373_v32 = vadd.f32 1.0, %v3746_v27 }
 0xf7f   :  { %v2399_v22 = vpack.c.bf16 %v2387_v40, %v2383_v20  ;;  %v2388_v33 = vmul.f32 %v2372_v38, %v2324_v35  ;;  %v3750_v13 = vpop.eup %3749  ;;  %v2375_v41 = vadd.f32 1.0, %v3748_v30 }
 0xf80   :  { %v2398_v37 = vpack.c.bf16 %v2386_v15, %v2382_v0  ;;  %v3752_v8 = vpop.eup %3751  ;;  %v2374_v45 = vadd.f32 1.0, %v3750_v13  ;;  %v2389_v54 = vmul.f32 %v2373_v32, %v2325_v2 }
 0xf81   :  { %v2400_v34 = vpack.c.bf16 %v2388_v33, %v2384_v43  ;;  %v3754_v39 = vpop.eup %3753  ;;  %v2376_v60 = vadd.f32 1.0, %v3752_v8  ;;  %v2391_v25 = vmul.f32 %v2375_v41, %v2327_v44 }
 0xf82   :  { %2700 = vmatprep.mubr.bf16.mxu0 %v2398_v37  ;;  %v3756_v42 = vpop.eup %3755  ;;  %v2377_v49 = vadd.f32 1.0, %v3754_v39  ;;  %v2390_v18 = vmul.f32 %v2374_v45, %v2326_v51 }
 0xf83   :  { %2749 = vmatprep.mubr.bf16.mxu1 %v2400_v34  ;;  %2701 = vmatmul.mubr.bf16.vlgmr.msra.gmra.mrb[44].mxu0 %v2397_v6  ;;  %v3758_v24 = vpop.eup %3757  ;;  %v2379_v58 = vadd.f32 1.0, %v3756_v42  ;;  %v2392_v3 = vmul.f32 %v2376_v60, %v2328_v46 }
 0xf84   :  { %2750 = vmatmul.mubr.bf16.vlgmr.msra.gmra.mrb[56].mxu1 %v2399_v22  ;;  %v2393_v61 = vmul.f32 %v2377_v49, %v2329_v29  ;;  %v2378_v19 = vadd.f32 1.0, %v3758_v24  ;;  %v3760_v62 = vpop.eup %3759 }
 0xf85   :  { %v2395_v63 = vmul.f32 %v2379_v58, %v2331_v55  ;;  %v2380_v28 = vadd.f32 1.0, %v3760_v62 }
 0xf86   :  { %v2394_v4 = vmul.f32 %v2378_v19, %v2330_v12  ;;  %v2401_v5 = vpack.c.bf16 %v2393_v61, %v2389_v54 }
 0xf87   :  { %v2403_v47 = vpack.c.bf16 %v2395_v63, %v2391_v25  ;;  %v2396_v16 = vmul.f32 %v2380_v28, %v2332_v1  ;;  %v3641_v1 = vld [vmem:[#allocation32] sm:$0xff]   ;;  %v3644_v28 = vld [vmem:[#allocation32 + $0x18] sm:$0xff]  }
 0xf88   :  { %v2402_v48 = vpack.c.bf16 %v2394_v4, %v2390_v18  ;;  %3427 = vmatpush3.bf16.msra.mxu0 %v3641_v1  ;;  %v3642_v18 = vld [vmem:[#allocation32 + $0x8] sm:$0xff]   ;;  %v3643_v4 = vld [vmem:[#allocation32 + $0x10] sm:$0xff]   ;;  %v3134_v1 = vld [vmem:[#allocation34] ss:$0 sm:$0xff] }
 0xf89   :  { %v2404_v7 = vpack.c.bf16 %v2396_v16, %v2392_v3  ;;  %3428 = vmatprep.subr.bf16.mxu0 %v4307_v31  ;;  %v3647_v3 = vld [vmem:[#allocation32 + $0x30] sm:$0xff]   ;;  %v3648_v16 = vld [vmem:[#allocation32 + $0x38] sm:$0xff]  }
 0xf8a   :  { %2708 = vmatprep.mubr.bf16.mxu0 %v2402_v48 }
 0xf8b   :  { %2709 = vmatmul.mubr.bf16.gmra.mrb[48].mxu0 %v2401_v5  ;;  %2757 = vmatprep.mubr.bf16.mxu1 %v2404_v7  ;;  %v3645_v5 = vld [vmem:[#allocation32 + $0x20] sm:$0xff]  }
 0xf8c   :  { %3442 = vmatprep.mubr.msk.bf16.mxu0 %vm4308_vm0, %v4307_v31  ;;  %2758 = vmatmul.mubr.bf16.gmra.mrb[60].mxu1 %v2403_v47  ;;  %v3646_v47 = vld [vmem:[#allocation32 + $0x28] sm:$0xff]  }
 0xf8d   :  { %3429 = vmatpush3.bf16.msra.mxu0 %v3642_v18 }
 0xf8e   :  { %3430 = vmatprep.subr.bf16.mxu0 %v4307_v31 }
 0xf91   :  { %3431 = vmatpush3.bf16.msra.mxu0 %v3643_v4 }
 0xf92   :  { %3432 = vmatprep.subr.bf16.mxu0 %v4307_v31 }
 0xf95   :  { %3433 = vmatpush3.bf16.msra.mxu0 %v3644_v28 }
 0xf96   :  { %3434 = vmatprep.subr.bf16.mxu0 %v4307_v31 }
 0xf99   :  { %3435 = vmatpush3.bf16.msra.mxu0 %v3645_v5 }
 0xf9a   :  { %3436 = vmatprep.subr.bf16.mxu0 %v4307_v31 }
 0xf9d   :  { %3437 = vmatpush3.bf16.msra.mxu0 %v3646_v47 }
 0xf9e   :  { %3438 = vmatprep.subr.bf16.mxu0 %v4307_v31 }
 0xfa1   :  { %3439 = vmatpush3.bf16.msra.mxu0 %v3647_v3 }
 0xfa2   :  { %3440 = vmatprep.subr.bf16.mxu0 %v4307_v31 }
 0xfa5   :  { %3441 = vmatpush3.bf16.msra.mxu0 %v3648_v16 }
0x1056   :  { %v3221_v59 = vpop.f32.mrb[44].mxu0 }
0x1057   :  { %v3249_v11 = vpop.f32.mrb[56].mxu1  ;;  %v3222_v50 = vpop.f32.mrb[45].mxu0 }
0x1058   :  { %v3223_v21 = vadd.f32 %v3222_v50, %v3221_v59  ;;  %v3250_v9 = vpop.f32.mrb[57].mxu1  ;;  %v3224_v10 = vpop.f32.mrb[46].mxu0 }
0x1059   :  { %v3251_v52 = vadd.f32 %v3250_v9, %v3249_v11  ;;  %v3252_v23 = vpop.f32.mrb[58].mxu1  ;;  %v3225_v36 = vpop.f32.mrb[47].mxu0 }
0x105a   :  { %v2703_v26 = vadd.f32 %v3223_v21, %v3099_v17  ;;  %v3226_v20 = vadd.f32 %v3225_v36, %v3224_v10  ;;  %v3253_v40 = vpop.f32.mrb[59].mxu1 }
0x105b   :  { %v3254_v35 = vadd.f32 %v3253_v40, %v3252_v23 }
0x105c   :  { %v2752_v38 = vadd.f32 %v3251_v52, %v2703_v26  ;;  %v2706_v27 = vadd.f32 %v3226_v20, %v3099_v17  ;;  %v3132_v20 = vld [vmem:[#allocation29] ss:$0 sm:$0xff] }
0x105e   :  { %v2755_v0 = vadd.f32 %v3254_v35, %v2706_v27  ;;  %v2766_v6 = vadd.f32 %v2752_v38, %v4961_v53  ;;  %v3227_v15 = vpop.f32.mrb[48].mxu0  ;;  %v3133_v35 = vld [vmem:[#allocation31] ss:$0 sm:$0xff] }
0x105f   :  { %v3228_v30 = vpop.f32.mrb[49].mxu0  ;;  %v3255_v22 = vpop.f32.mrb[60].mxu1 }
0x1060   :  { %2772 = vadd.xlane.f32.xlu0 %v2766_v6  ;;  %v2767_v43 = vadd.f32 %v2755_v0, %v4964_v56  ;;  %v3229_v33 = vadd.f32 %v3228_v30, %v3227_v15  ;;  %v3230_v13 = vpop.f32.mrb[50].mxu0  ;;  %v3256_v37 = vpop.f32.mrb[61].mxu1  ;;  %v2836_v15 = vld [vmem:[#allocation10] sm:$0xff]  ;;  %v2837_v30 = vld [vmem:[#allocation10 + $0x8] sm:$0xff] }
0x1061   :  { %v3231_v8 = vpop.f32.mrb[51].mxu0  ;;  %v3257_v34 = vadd.f32 %v3256_v37, %v3255_v22  ;;  %v3258_v39 = vpop.f32.mrb[62].mxu1 }
0x1062   :  { %2774 = vadd.xlane.f32.xlu1 %v2767_v43  ;;  %v2711_v32 = vadd.f32 %v3229_v33, %v3099_v17  ;;  %v3232_v2 = vadd.f32 %v3231_v8, %v3230_v13  ;;  %v3259_v41 = vpop.f32.mrb[63].mxu1 }
0x1063   :  { %v3260_v45 = vadd.f32 %v3259_v41, %v3258_v39 }
0x1064   :  { %v2760_v42 = vadd.f32 %v3257_v34, %v2711_v32  ;;  %v2714_v44 = vadd.f32 %v3232_v2, %v3099_v17 }
0x1066   :  { %v2763_v53 = vadd.f32 %v3260_v45, %v2714_v44  ;;  %v2768_v29 = vadd.f32 %v2760_v42, %v4967_v57 }
0x1068   :  { %2776 = vadd.xlane.f32.xlu0 %v2768_v29  ;;  %v2769_v56 = vadd.f32 %v2763_v53, %v4972_v14 }
0x106a   :  { %2778 = vadd.xlane.f32.xlu1 %v2769_v56 }
0x10ed   :  { %v2773_v49 = vpop.xlane.xlu0 %2772 }
0x10ee   :  { %v2780_v24 = vmul.f32 0.0078125, %v2773_v49 }
0x10ef   :  { %v2775_v51 = vpop.xlane.xlu1 %2774 }
0x10f0   :  { %v2784_v55 = vsub.f32 %v2766_v6, %v2780_v24  ;;  %v2781_v58 = vmul.f32 0.0078125, %v2775_v51 }
0x10f2   :  { %v2785_v12 = vsub.f32 %v2767_v43, %v2781_v58  ;;  %v2788_v54 = vmul.f32 %v2784_v55, %v2784_v55 }
0x10f4   :  { %2792 = vadd.xlane.f32.xlu0 %v2788_v54  ;;  %v2789_v60 = vmul.f32 %v2785_v12, %v2785_v12 }
0x10f5   :  { %v2777_v61 = vpop.xlane.xlu0 %2776 }
0x10f6   :  { %2794 = vadd.xlane.f32.xlu1 %v2789_v60  ;;  %v2782_v19 = vmul.f32 0.0078125, %v2777_v61 }
0x10f7   :  { %v2779_v62 = vpop.xlane.xlu1 %2778 }
0x10f8   :  { %v2786_v25 = vsub.f32 %v2768_v29, %v2782_v19  ;;  %v2783_v46 = vmul.f32 0.0078125, %v2779_v62 }
0x10fa   :  { %v5051_v57 = vsub.f32 %v2769_v56, %v2783_v46  ;;  %v2790_v63 = vmul.f32 %v2786_v25, %v2786_v25 }
0x10fc   :  { %2796 = vadd.xlane.f32.xlu0 %v2790_v63  ;;  %v2791_v14 = vmul.f32 %v5051_v57, %v5051_v57 }
0x10fe   :  { %2798 = vadd.xlane.f32.xlu1 %v2791_v14 }
0x1181   :  { %v2793_v48 = vpop.xlane.xlu0 %2792 }
0x1182   :  { %v2800_v7 = vmul.f32 0.0078125, %v2793_v48 }
0x1183   :  { %v2795_v59 = vpop.xlane.xlu1 %2794 }
0x1184   :  { %v2804_v11 = vadd.f32 1e-06, %v2800_v7  ;;  %v2801_v17 = vmul.f32 0.0078125, %v2795_v59 }
0x1186   :  { %3761 = vrsqrt.f32 %v2804_v11  ;;  %v2805_v50 = vadd.f32 1e-06, %v2801_v17 }
0x1188   :  { %3763 = vrsqrt.f32 %v2805_v50 }
0x1189   :  { %v2797_v21 = vpop.xlane.xlu0 %2796 }
0x118a   :  { %v2802_v9 = vmul.f32 0.0078125, %v2797_v21 }
0x118b   :  { %v2799_v10 = vpop.xlane.xlu1 %2798 }
0x118c   :  { %v2806_v52 = vadd.f32 1e-06, %v2802_v9  ;;  %v2803_v23 = vmul.f32 0.0078125, %v2799_v10 }
0x118e   :  { %3765 = vrsqrt.f32 %v2806_v52  ;;  %v2807_v36 = vadd.f32 1e-06, %v2803_v23 }
0x1190   :  { %v3762_v26 = vpop.eup %3761  ;;  %3767 = vrsqrt.f32 %v2807_v36 }
0x1191   :  { %v2812_v40 = vmul.f32 %v3762_v26, %v2784_v55 }
0x1192   :  { %v3764_v31 = vpop.eup %3763 }
0x1193   :  { %v2822_v38 = vmul.f32 %v3132_v20, %v2812_v40  ;;  %v2813_v27 = vmul.f32 %v3764_v31, %v2785_v12 }
0x1195   :  { %v2832_v0 = vadd.f32 %v3133_v35, %v2822_v38  ;;  %v2823_v6 = vmul.f32 %v3132_v20, %v2813_v27 }
0x1197   :  { %v2833_v43 = vadd.f32 %v3133_v35, %v2823_v6  ;;  %v2838_v33 = vmul.f32 %v2836_v15, %v2832_v0 }
0x1198   :  { %v3766_v22 = vpop.eup %3765 }
0x1199   :  { %v2839_v13 = vmul.f32 %v2837_v30, %v2833_v43  ;;  %v2814_v37 = vmul.f32 %v3766_v22, %v2786_v25 }
0x119a   :  { %v3768_v8 = vpop.eup %3767 }
0x119b   :  { %v2842_v32 = vadd.f32 %v2839_v13, %v2838_v33  ;;  %v2824_v34 = vmul.f32 %v3132_v20, %v2814_v37  ;;  %v2815_v39 = vmul.f32 %v3768_v8, %v5051_v57 }
0x119d   :  { %v2843_v2 = vrot.slane %v2842_v32, 4  ;;  %v2834_v41 = vadd.f32 %v3133_v35, %v2824_v34  ;;  %v2825_v42 = vmul.f32 %v3132_v20, %v2815_v39 }
0x119f   :  { %v2844_v44 = vadd.f32 %v2843_v2, %v2842_v32  ;;  %v2835_v45 = vadd.f32 %v3133_v35, %v2825_v42  ;;  %v2840_v29 = vmul.f32 %v2836_v15, %v2834_v41 }
0x11a1   :  { %v2845_v53 = vrot.slane %v2844_v44, 2  ;;  %v2841_v56 = vmul.f32 %v2837_v30, %v2835_v45 }
0x11a3   :  { %v2849_v49 = vadd.f32 %v2841_v56, %v2840_v29  ;;  %v2846_v24 = vadd.f32 %v2845_v53, %v2844_v44 }
0x11a5   :  { %v2850_v51 = vrot.slane %v2849_v49, 4  ;;  %v2847_v55 = vrot.slane %v2846_v24, 1 }
0x11a7   :  { %v2851_v58 = vadd.f32 %v2850_v51, %v2849_v49  ;;  %v2848_v54 = vadd.f32 %v2847_v55, %v2846_v24 }
0x11a9   :  { %v2852_v12 = vrot.slane %v2851_v58, 2  ;;  %v2856_v62 = vpack.c.bf16 %v2848_v54, %v2848_v54 }
0x11ab   :  { %v2853_v60 = vadd.f32 %v2852_v12, %v2851_v58  ;;  %v2883_v46 = vunpack.c.l.b16 %v2856_v62 }
0x11ad   :  { %v2854_v61 = vrot.slane %v2853_v60, 1 }
0x11af   :  { %v2855_v19 = vadd.f32 %v2854_v61, %v2853_v60 }
0x11b1   :  { %v2857_v25 = vpack.c.bf16 %v2855_v19, %v2855_v19 }
0x11b3   :  { %v2884_v57 = vunpack.c.l.b16 %v2857_v25 }
0x11b5   :  { %v2886_v63 = vsel %vm2885_vm5, %v2884_v57, %v2883_v46 }
0x11b6   :  { %v2887_v14 = vpack.c.b16 %v2886_v63, %v2886_v63 }
0x11b8   :  { %3443 = vmatmul.mubr.bf16.vlgmr.msra.gmra.mrb[52].mxu0 %v2887_v14 }
0x128b   :  { %v2971_v18 = vpop.f32.mrb[52].mxu0 }
0x128c   :  { %v2972_v4 = vadd.f32 %v3134_v1, %v2971_v18  ;;  %v3444_v28 = vpop.f32.mrb[53].mxu0 }
0x128d   :  { %v2974_v5 = vpop.f32.mrb[54].mxu0 }
0x128e   :  { %v3445_v47 = vpop.f32.mrb[55].mxu0  ;;  %2978 = vst.msk [vmem:[#allocation35] sm:$0x3] %vm2977_vm6, %v2972_v4 }
0x128f   :  { %4242 = shalt.err (!%p4239_p4)
}
0x1290   :  { %s5129_s11 = sld [smem:[#allocation56_spill]] }
0x1296   :  { %s4243_s20 = scalar_lea.hbm %s5129_s11, 32 }
0x1297   :  { %p4244_p5 = scmp.ne.s32.totalorder %s5129_s11, %s4243_s20  ;;  %p4247_p6 = scmp.lt.u32.totalorder %s4243_s20, %s5129_s11 }
0x1299   :  { %p4249_p7 = pnand %p4247_p6, %p4244_p5 }
0x129b   :  { %4252 = shalt.err (!%p4249_p7)
}
0x129c   :  { %2988 = dma.vmem_to_hbm [thread:$0]  %s2986_s13, 32, %s5129_s11, [#allocation4]  }
0x129d   :  { %4275 = dma.done.wait [#allocation4], 32  }
0x129e   :  { %4276 = vsyncadd [#allocation4], 4294967264 }
0x129f   :  { %2992 = vsyncpa [#allocation3], 1 }
0x12a0   :  { %2993 = vsyncpa [#allocation6], 1 }
0x12a1   :  { %2994 = vsyncpa [#allocation9], 1 }
0x12a2   :  { %2995 = vsyncpa [#allocation12], 1 }
0x12a3   :  { %2996 = vsyncpa [#allocation15], 1 }
0x12a4   :  { %2997 = vsyncpa [#allocation18], 1 }
0x12a5   :  { %2998 = vsyncpa [#allocation21], 1 }
0x12a6   :  { %2999 = vsyncpa [#allocation24], 1 }
0x12a7   :  { %3000 = vsyncpa [#allocation27], 1 }
0x12a8   :  { %3001 = vsyncpa [#allocation30], 1 }
0x12a9   :  { %3002 = vsyncpa [#allocation33], 1 }
0x12aa   :  { %3003 = vsyncpa [#allocation4], 1 }

</bundles_post_ra>
